<compile_context>
chip_gen: v6e
topology: v6e:2x2x1
jax: 0.10.0
libtpu: 0.0.40
codegen_flags: <defaults>
</compile_context>

<pallas_src>
import functools
import math

import jax
import jax.numpy as jnp
from jax import lax
from jax.experimental import pallas as pl
from jax.experimental.pallas import tpu as pltpu

F32 = jnp.float32
BF16 = jnp.bfloat16

# EUP approximate reciprocal for the softmax denominator (~1e-3 rel. error per
# row, fine under the test tolerance).  Set False for exact division.
_APPROX_SOFTMAX_RECIP = True


# ----------------------------------------------------------------------------
# In-kernel math helpers (pure functions of loaded values, all f32 math)
# ----------------------------------------------------------------------------

def _rms(x, w, eps):
    """RMSNorm in f32: x * rsqrt(mean(x^2) + eps) * w (w broadcasts over rows)."""
    ms = jnp.mean(x * x, axis=-1, keepdims=True)
    return x * lax.rsqrt(ms + eps) * w


def _softmax_rows(s):
    s = s - jnp.max(s, axis=-1, keepdims=True)
    p = jnp.exp(s)
    den = jnp.sum(p, axis=-1, keepdims=True)
    if _APPROX_SOFTMAX_RECIP:
        return p * pl.reciprocal(den, approx=True)
    return p / den


def _attention_half(x, n1, wqkv, bqkv, wo, bo, n2, *, num_heads, eps):
    """One batch element: norm1 -> qkv -> MHA -> out proj -> +res -> norm2.

    x: (S, H) f32.  The out projection is accumulated per head so only one
    (S, S) score block and one (S, H) accumulator are live (no concat).
    """
    s_len, hid = x.shape
    dh = hid // num_heads
    scale = 1.0 / math.sqrt(dh)

    xn = _rms(x, n1, eps)
    qkv = jnp.dot(xn.astype(BF16), wqkv, preferred_element_type=F32) + bqkv

    # TODO(synk): for dh < 128 on v6e/v7x, batch 2-4 heads per dot_general so
    # the 256-wide MXU stays full; for long S switch to flash-style q/kv tiling
    # with online softmax (the full (S, S) block fits in VMEM here).
    acc = jnp.zeros((s_len, hid), F32)
    for h in range(num_heads):
        lo = h * dh
        qh = qkv[:, lo:lo + dh].astype(BF16)
        kh = qkv[:, hid + lo:hid + lo + dh].astype(BF16)
        vh = qkv[:, 2 * hid + lo:2 * hid + lo + dh].astype(BF16)
        # q @ k^T without an explicit transpose: contract the head dim of both.
        sc = lax.dot_general(qh, kh, (((1,), (1,)), ((), ())),
                             preferred_element_type=F32) * scale      # (S, S)
        p = _softmax_rows(sc)
        ho = jnp.dot(p.astype(BF16), vh, preferred_element_type=F32)  # (S, Dh)
        acc = acc + jnp.dot(ho.astype(BF16), wo[lo:lo + dh, :],
                            preferred_element_type=F32)               # (S, H)
    return _rms(x + acc + bo, n2, eps)


def _mlp_half(x, n3, w1, w2, n4, *, inter, eps):
    """All rows at once: norm3 -> fc1 -> swiglu -> fc2 -> +res -> norm4."""
    xn = _rms(x, n3, eps)
    hme = jnp.dot(xn.astype(BF16), w1, preferred_element_type=F32)    # (M, 2I)
    gate = hme[:, :inter]
    value = hme[:, inter:]
    act = gate * lax.logistic(gate) * value                           # silu*val
    mo = jnp.dot(act.astype(BF16), w2, preferred_element_type=F32)    # (M, H)
    return _rms(x + mo, n4, eps)


# ----------------------------------------------------------------------------
# Fully fused forward kernel: grid = (num_iterations,)
# ----------------------------------------------------------------------------

def _fused_forward_kernel(
        emb_ref, st0_ref, aws_ref, awe_ref,
        n1_ref, wqkv_ref, bqkv_ref, wo_ref, bo_ref, n2_ref,
        n3_ref, w1_ref, w2_ref, n4_ref, fnorm_ref,
        states_ref, out_ref, state_vmem,
        *, num_layers, num_heads, inter, batch, seq, eps):
    it = pl.program_id(0)

    @pl.when(it == 0)
    def _():
        state_vmem[...] = st0_ref[...]

    # all_states[it] = state at the start of this iteration (f32).
    states_ref[0] = state_vmem[...]

    # Adapter: concat([state, emb], -1) @ W  ==  state @ Ws + emb @ We.
    x = (jnp.dot(state_vmem[...].astype(BF16), aws_ref[...],
                 preferred_element_type=F32)
         + jnp.dot(emb_ref[...], awe_ref[...], preferred_element_type=F32))

    # Sandwich transformer blocks (weights are VMEM-resident across the whole
    # grid because every weight BlockSpec has a constant index_map).
    # TODO(synk): for large H / intermediate_size (v7x 64 MiB VMEM) the layer
    # weights should instead be streamed per layer with a double-buffered
    # prefetch and the fc1/fc2 matmuls N/K-tiled.
    for layer in range(num_layers):
        n1, n2, n3, n4 = n1_ref[layer], n2_ref[layer], n3_ref[layer], n4_ref[layer]
        wqkv, bqkv = wqkv_ref[layer], bqkv_ref[layer]
        wo, bo = wo_ref[layer], bo_ref[layer]
        w1, w2 = w1_ref[layer], w2_ref[layer]

        rows = []
        for b in range(batch):                       # attention is per batch
            xb = x[b * seq:(b + 1) * seq, :]
            rows.append(_attention_half(xb, n1, wqkv, bqkv, wo, bo, n2,
                                        num_heads=num_heads, eps=eps))
        x = jnp.concatenate(rows, axis=0) if batch > 1 else rows[0]
        x = _mlp_half(x, n3, w1, w2, n4, inter=inter, eps=eps)

    state_vmem[...] = x

    @pl.when(it == pl.num_programs(0) - 1)
    def _():
        out_ref[...] = _rms(x, fnorm_ref[...], eps)


# ----------------------------------------------------------------------------
# VMEM budgeting (per-step resident blocks + in-kernel intermediates)
# ----------------------------------------------------------------------------

def _fused_vmem_estimate(inputs, M, H, S, inter):
    in_bytes = sum(int(a.size) * a.dtype.itemsize for a in inputs)
    out_bytes = M * H * 4 * 2                 # one all_states block + out block
    scratch = M * H * 4                       # state carry
    temps = (M * 3 * H * 4                    # qkv (f32)
             + M * 2 * inter * 4              # swiglu intermediate (f32)
             + 2 * S * S * 4                  # live scores / probs (one head)
             + 8 * M * H * 4)                 # x / residual / accumulator copies
    # Inputs & outputs double-buffered by the pipeline even with constant maps.
    return 2 * (in_bytes + out_bytes) + scratch + temps


def _vmem_limit_bytes(needed):
    try:
        cap = int(pltpu.get_tpu_info().vmem_capacity_bytes)
    except Exception:
        cap = 64 << 20                        # v7x per-TensorCore floor
    # Headroom for compiler-internal scratch; never below 16 MiB, never above
    # 3/4 of the physical capacity of this generation.
    return int(min(max(needed + (4 << 20), 16 << 20), (cap * 3) // 4))


# ----------------------------------------------------------------------------
# Wrapper
# ----------------------------------------------------------------------------

def recurrent_depth_forward(embedded_inputs, state0, kp, *,
                            num_iterations, num_heads, eps=1e-6):
    """Forward pass of RecurrentDepthReasoning (non-adaptive path).

    Returns (output_state (B,S,H) f32, all_states list of (B,S,H) f32).
    """
    # TODO(synk): adaptive per-token compute (use_adaptive_compute=True) with
    # data-dependent early exit and the attention_mask path are not implemented.
    B, S, H = embedded_inputs.shape
    M = B * S
    L = kp["wqkv"].shape[0]
    inter = kp["w2"].shape[1]

    emb2 = embedded_inputs.reshape(M, H).astype(BF16)
    st0 = state0.reshape(M, H).astype(F32)

    def full(shape):
        return pl.BlockSpec(shape, lambda i, _s=shape: (0,) * len(_s))

    in_specs = [
        full((M, H)),                 # embedded inputs (bf16)
        full((M, H)),                 # initial state (f32)
        full((H, H)),                 # adapter W_state (bf16)
        full((H, H)),                 # adapter W_emb   (bf16)
        full((L, 1, H)),              # norm1
        full((L, H, 3 * H)),          # in_proj W (bf16)
        full((L, 1, 3 * H)),          # in_proj b
        full((L, H, H)),              # out_proj W (bf16)
        full((L, 1, H)),              # out_proj b
        full((L, 1, H)),              # norm2
        full((L, 1, H)),              # norm3
        full((L, H, 2 * inter)),      # fc1 W (bf16)
        full((L, inter, H)),          # fc2 W (bf16)
        full((L, 1, H)),              # norm4
        full((1, H)),                 # final norm
    ]
    out_specs = (
        pl.BlockSpec((1, M, H), lambda i: (i, 0, 0)),   # all_states
        pl.BlockSpec((M, H), lambda i: (0, 0)),         # final output
    )
    out_shape = (
        jax.ShapeDtypeStruct((num_iterations, M, H), F32),
        jax.ShapeDtypeStruct((M, H), F32),
    )

    inputs = (emb2, st0, kp["adapter_ws"], kp["adapter_we"],
              kp["n1"], kp["wqkv"], kp["bqkv"], kp["wo"], kp["bo"], kp["n2"],
              kp["n3"], kp["w1"], kp["w2"], kp["n4"], kp["final_norm"])

    kern = functools.partial(_fused_forward_kernel, num_layers=L,
                             num_heads=num_heads, inter=inter,
                             batch=B, seq=S, eps=eps)

    states, out = pl.pallas_call(
        kern,
        out_shape=out_shape,
        grid=(num_iterations,),
        in_specs=in_specs,
        out_specs=out_specs,
        scratch_shapes=[pltpu.VMEM((M, H), F32)],
        compiler_params=pltpu.CompilerParams(
            dimension_semantics=("arbitrary",),     # sequential recurrence
            vmem_limit_bytes=_vmem_limit_bytes(
                _fused_vmem_estimate(inputs, M, H, S, inter)),
        ),
    )(*inputs)

    out3 = out.reshape(B, S, H)
    all_states = [states[i].reshape(B, S, H) for i in range(num_iterations)]
    return out3, all_states


# ----------------------------------------------------------------------------
# Pure-JAX f32 reference (spec semantics, for the correctness check)
# ----------------------------------------------------------------------------

def _rmsnorm_ref(x, w, eps=1e-6):
    ms = jnp.mean(x * x, axis=-1, keepdims=True)
    return x * lax.rsqrt(ms + eps) * w


def _block_ref(x, p, num_heads):
    B, S, H = x.shape
    Dh = H // num_heads
    residual = x
    xn = _rmsnorm_ref(x, p["norm1_w"])
    qkv = xn @ p["in_proj_w"] + p["in_proj_b"]
    q, k, v = jnp.split(qkv, 3, axis=-1)

    def sh(t):
        return t.reshape(B, S, num_heads, Dh).transpose(0, 2, 1, 3)

    q, k, v = sh(q), sh(k), sh(v)
    s = jnp.einsum("bhqd,bhkd->bhqk", q, k) / math.sqrt(Dh)
    p_attn = jax.nn.softmax(s, axis=-1)
    ao = jnp.einsum("bhqk,bhkd->bhqd", p_attn, v)
    ao = ao.transpose(0, 2, 1, 3).reshape(B, S, H)
    ao = ao @ p["out_proj_w"] + p["out_proj_b"]
    x = _rmsnorm_ref(residual + ao, p["norm2_w"])
    residual = x
    xn = _rmsnorm_ref(x, p["norm3_w"])
    h = xn @ p["fc1_w"]
    gate, value = jnp.split(h, 2, axis=-1)
    h = jax.nn.silu(gate) * value
    h = h @ p["fc2_w"]
    return _rmsnorm_ref(residual + h, p["norm4_w"])


def forward_ref(embedded_inputs, state, params, num_iterations, num_heads):
    for _ in range(num_iterations):
        combined = jnp.concatenate([state, embedded_inputs], axis=-1)
        state = combined @ params["adapter_w"]
        for bp in params["blocks"]:
            state = _block_ref(state, bp, num_heads)
    return _rmsnorm_ref(state, params["final_norm_w"])


# ----------------------------------------------------------------------------
# Deterministic parameter init (weights stored pre-transposed: (in, out))
# ----------------------------------------------------------------------------

def init_params(key, H, I, num_layers):
    std = 0.02

    def w(k, shape):
        return jax.random.normal(k, shape, F32) * std

    keys = jax.random.split(key, 1 + num_layers)
    params = {
        "adapter_w": w(keys[0], (2 * H, H)),
        "final_norm_w": jnp.ones((H,), F32),
        "blocks": [],
    }
    for li in range(num_layers):
        bk = jax.random.split(keys[1 + li], 6)
        params["blocks"].append({
            "norm1_w": jnp.ones((H,), F32),
            "norm2_w": jnp.ones((H,), F32),
            "norm3_w": jnp.ones((H,), F32),
            "norm4_w": jnp.ones((H,), F32),
            "in_proj_w": w(bk[0], (H, 3 * H)),
            "in_proj_b": w(bk[1], (3 * H,)),
            "out_proj_w": w(bk[2], (H, H)),
            "out_proj_b": w(bk[3], (H,)),
            "fc1_w": w(bk[4], (H, 2 * I)),
            "fc2_w": w(bk[5], (I, H)),
        })
    return params


def prepare_kernel_params(params):
    """Stack per-layer weights, cast matmul weights to bf16, split adapter."""
    H = params["final_norm_w"].shape[0]
    blocks = params["blocks"]

    def stack(name, dtype=None, lead_one=False):
        a = jnp.stack([bp[name] for bp in blocks], axis=0)
        if lead_one:
            a = a.reshape(a.shape[0], 1, -1)
        if dtype is not None:
            a = a.astype(dtype)
        return a

    return {
        "adapter_ws": params["adapter_w"][:H].astype(BF16),   # state half
        "adapter_we": params["adapter_w"][H:].astype(BF16),   # embedding half
        "final_norm": params["final_norm_w"].reshape(1, H),
        "n1": stack("norm1_w", lead_one=True),
        "n2": stack("norm2_w", lead_one=True),
        "n3": stack("norm3_w", lead_one=True),
        "n4": stack("norm4_w", lead_one=True),
        "wqkv": stack("in_proj_w", BF16),
        "bqkv": stack("in_proj_b", lead_one=True),
        "wo": stack("out_proj_w", BF16),
        "bo": stack("out_proj_b", lead_one=True),
        "w1": stack("fc1_w", BF16),
        "w2": stack("fc2_w", BF16),
    }


# ----------------------------------------------------------------------------
# Main
# ----------------------------------------------------------------------------

if __name__ == "__main__":
    B, S, H = 2, 8, 32
    NUM_HEADS = 4
    INTERMEDIATE = 64
    NUM_LAYERS = 2
    NUM_ITERATIONS = 3
    STATE_INIT_STD = 0.4

    key = jax.random.PRNGKey(0)
    k_emb, k_state, k_params = jax.random.split(key, 3)

    embedded_inputs = jax.random.normal(k_emb, (B, S, H), F32)
    # initialize_state semantics: clamp(randn, +/-3*std) * std
    state0 = (
        jnp.clip(
            jax.random.normal(k_state, (B, S, H), F32),
            -3.0 * STATE_INIT_STD,
            3.0 * STATE_INIT_STD,
        )
        * STATE_INIT_STD
    )
    params = init_params(k_params, H, INTERMEDIATE, NUM_LAYERS)
    kparams = prepare_kernel_params(params)

    fwd = jax.jit(functools.partial(recurrent_depth_forward,
                                    num_iterations=NUM_ITERATIONS,
                                    num_heads=NUM_HEADS))
    out, all_states = fwd(embedded_inputs, state0, kparams)
    out = jax.block_until_ready(out)

    # Correctness vs. the pure-f32 reference (bf16 matmul inputs -> loose tol).
    out_ref = forward_ref(embedded_inputs, state0, params,
                          NUM_ITERATIONS, NUM_HEADS)
    assert out.shape == (B, S, H)
    assert len(all_states) == NUM_ITERATIONS
    assert bool(jnp.allclose(all_states[0], state0, atol=1e-6)), \
        "all_states[0] != initial state"
    assert bool(jnp.allclose(out, out_ref, atol=5e-2, rtol=5e-2)), \
        "mismatch vs reference"

    print("KERNEL_OK")
</pallas_src>

<mosaic_0001>
module attributes {stable_mosaic.version = 11 : i64} {
  func.func @_fused_forward_kernel(%arg0: i32, %arg1: memref<16x32xbf16, #tpu.memory_space<vmem>>, %arg2: memref<16x32xf32, #tpu.memory_space<vmem>>, %arg3: memref<32x32xbf16, #tpu.memory_space<vmem>>, %arg4: memref<32x32xbf16, #tpu.memory_space<vmem>>, %arg5: memref<2x1x32xf32, #tpu.memory_space<vmem>>, %arg6: memref<2x32x96xbf16, #tpu.memory_space<vmem>>, %arg7: memref<2x1x96xf32, #tpu.memory_space<vmem>>, %arg8: memref<2x32x32xbf16, #tpu.memory_space<vmem>>, %arg9: memref<2x1x32xf32, #tpu.memory_space<vmem>>, %arg10: memref<2x1x32xf32, #tpu.memory_space<vmem>>, %arg11: memref<2x1x32xf32, #tpu.memory_space<vmem>>, %arg12: memref<2x32x128xbf16, #tpu.memory_space<vmem>>, %arg13: memref<2x64x32xbf16, #tpu.memory_space<vmem>>, %arg14: memref<2x1x32xf32, #tpu.memory_space<vmem>>, %arg15: memref<1x32xf32, #tpu.memory_space<vmem>>, %arg16: memref<1x16x32xf32, #tpu.memory_space<vmem>>, %arg17: memref<16x32xf32, #tpu.memory_space<vmem>>, %arg18: memref<16x32xf32, #tpu.memory_space<vmem>>) attributes {dimension_semantics = [#tpu.dimension_semantics<arbitrary>], iteration_bounds = array<i64: 3>, scalar_prefetch = 0 : i64, scratch_operands = 1 : i64, tpu.core_type = #tpu.core_type<tc>, window_params = [{pipeline_mode = #tpu.pipeline_mode<synchronous>, transform_indices = @transform_0, window_bounds = array<i64: 16, 32>}, {pipeline_mode = #tpu.pipeline_mode<synchronous>, transform_indices = @transform_1, window_bounds = array<i64: 16, 32>}, {pipeline_mode = #tpu.pipeline_mode<synchronous>, transform_indices = @transform_2, window_bounds = array<i64: 32, 32>}, {pipeline_mode = #tpu.pipeline_mode<synchronous>, transform_indices = @transform_3, window_bounds = array<i64: 32, 32>}, {pipeline_mode = #tpu.pipeline_mode<synchronous>, transform_indices = @transform_4, window_bounds = array<i64: 2, 1, 32>}, {pipeline_mode = #tpu.pipeline_mode<synchronous>, transform_indices = @transform_5, window_bounds = array<i64: 2, 32, 96>}, {pipeline_mode = #tpu.pipeline_mode<synchronous>, transform_indices = @transform_6, window_bounds = array<i64: 2, 1, 96>}, {pipeline_mode = #tpu.pipeline_mode<synchronous>, transform_indices = @transform_7, window_bounds = array<i64: 2, 32, 32>}, {pipeline_mode = #tpu.pipeline_mode<synchronous>, transform_indices = @transform_8, window_bounds = array<i64: 2, 1, 32>}, {pipeline_mode = #tpu.pipeline_mode<synchronous>, transform_indices = @transform_9, window_bounds = array<i64: 2, 1, 32>}, {pipeline_mode = #tpu.pipeline_mode<synchronous>, transform_indices = @transform_10, window_bounds = array<i64: 2, 1, 32>}, {pipeline_mode = #tpu.pipeline_mode<synchronous>, transform_indices = @transform_11, window_bounds = array<i64: 2, 32, 128>}, {pipeline_mode = #tpu.pipeline_mode<synchronous>, transform_indices = @transform_12, window_bounds = array<i64: 2, 64, 32>}, {pipeline_mode = #tpu.pipeline_mode<synchronous>, transform_indices = @transform_13, window_bounds = array<i64: 2, 1, 32>}, {pipeline_mode = #tpu.pipeline_mode<synchronous>, transform_indices = @transform_14, window_bounds = array<i64: 1, 32>}, {transform_indices = @transform_15, window_bounds = array<i64: 1, 16, 32>}, {pipeline_mode = #tpu.pipeline_mode<synchronous>, transform_indices = @transform_16, window_bounds = array<i64: 16, 32>}]} {
    %c0_i32 = arith.constant 0 : i32
    %0 = arith.cmpi eq, %arg0, %c0_i32 : i32
    %1 = arith.extui %0 : i1 to i32
    %c0_i32_0 = arith.constant 0 : i32
    %2 = arith.cmpi ne, %1, %c0_i32_0 : i32
    scf.if %2 {
      %c0_222 = arith.constant 0 : index
      %c0_223 = arith.constant 0 : index
      %669 = vector.load %arg2[%c0_222, %c0_223] : memref<16x32xf32, #tpu.memory_space<vmem>>, vector<16x32xf32>
      %c0_224 = arith.constant 0 : index
      %c0_225 = arith.constant 0 : index
      %670 = vector.load %arg18[%c0_224, %c0_225] : memref<16x32xf32, #tpu.memory_space<vmem>>, vector<16x32xf32>
      tpu.vector_store %arg18[%c0_224, %c0_225], %669 {strides = array<i32>} : memref<16x32xf32, #tpu.memory_space<vmem>>, vector<16x32xf32>,
    } else {
    }
    %c0 = arith.constant 0 : index
    %c0_1 = arith.constant 0 : index
    %3 = vector.load %arg18[%c0, %c0_1] : memref<16x32xf32, #tpu.memory_space<vmem>>, vector<16x32xf32>
    %c0_2 = arith.constant 0 : index
    %c0_3 = arith.constant 0 : index
    %c0_4 = arith.constant 0 : index
    %4 = vector.load %arg16[%c0_2, %c0_3, %c0_4] : memref<1x16x32xf32, #tpu.memory_space<vmem>>, vector<1x16x32xf32>
    %5 = vector.shape_cast %4 : vector<1x16x32xf32> to vector<16x32xf32>
    %6 = vector.shape_cast %3 : vector<16x32xf32> to vector<1x16x32xf32>
    tpu.vector_store %arg16[%c0_2, %c0_3, %c0_4], %6 {strides = array<i32>} : memref<1x16x32xf32, #tpu.memory_space<vmem>>, vector<1x16x32xf32>,
    %c0_5 = arith.constant 0 : index
    %c0_6 = arith.constant 0 : index
    %7 = vector.load %arg18[%c0_5, %c0_6] : memref<16x32xf32, #tpu.memory_space<vmem>>, vector<16x32xf32>
    %8 = arith.truncf %7 : vector<16x32xf32> to vector<16x32xbf16>
    %c0_7 = arith.constant 0 : index
    %c0_8 = arith.constant 0 : index
    %9 = vector.load %arg3[%c0_7, %c0_8] : memref<32x32xbf16, #tpu.memory_space<vmem>>, vector<32x32xbf16>
    %cst = arith.constant dense<0.000000e+00> : vector<16x32xf32>
    %10 = tpu.matmul %8, %9, %cst {dimension_numbers = #tpu.dot_dimension_numbers<[1], [0], [0], [1], [0, 0, 1, 1], [], []>} : vector<16x32xbf16>, vector<32x32xbf16>, vector<16x32xf32> -> vector<16x32xf32>
    %c0_9 = arith.constant 0 : index
    %c0_10 = arith.constant 0 : index
    %11 = vector.load %arg1[%c0_9, %c0_10] : memref<16x32xbf16, #tpu.memory_space<vmem>>, vector<16x32xbf16>
    %c0_11 = arith.constant 0 : index
    %c0_12 = arith.constant 0 : index
    %12 = vector.load %arg4[%c0_11, %c0_12] : memref<32x32xbf16, #tpu.memory_space<vmem>>, vector<32x32xbf16>
    %cst_13 = arith.constant dense<0.000000e+00> : vector<16x32xf32>
    %13 = tpu.matmul %11, %12, %cst_13 {dimension_numbers = #tpu.dot_dimension_numbers<[1], [0], [0], [1], [0, 0, 1, 1], [], []>} : vector<16x32xbf16>, vector<32x32xbf16>, vector<16x32xf32> -> vector<16x32xf32>
    %14 = arith.addf %10, %13 : vector<16x32xf32>
    %c0_14 = arith.constant 0 : index
    %c0_15 = arith.constant 0 : index
    %c0_16 = arith.constant 0 : index
    %15 = vector.load %arg5[%c0_14, %c0_15, %c0_16] : memref<2x1x32xf32, #tpu.memory_space<vmem>>, vector<1x1x32xf32>
    %16 = vector.shape_cast %15 : vector<1x1x32xf32> to vector<1x32xf32>
    %c0_17 = arith.constant 0 : index
    %c0_18 = arith.constant 0 : index
    %c0_19 = arith.constant 0 : index
    %17 = vector.load %arg10[%c0_17, %c0_18, %c0_19] : memref<2x1x32xf32, #tpu.memory_space<vmem>>, vector<1x1x32xf32>
    %18 = vector.shape_cast %17 : vector<1x1x32xf32> to vector<1x32xf32>
    %c0_20 = arith.constant 0 : index
    %c0_21 = arith.constant 0 : index
    %c0_22 = arith.constant 0 : index
    %19 = vector.load %arg11[%c0_20, %c0_21, %c0_22] : memref<2x1x32xf32, #tpu.memory_space<vmem>>, vector<1x1x32xf32>
    %20 = vector.shape_cast %19 : vector<1x1x32xf32> to vector<1x32xf32>
    %c0_23 = arith.constant 0 : index
    %c0_24 = arith.constant 0 : index
    %c0_25 = arith.constant 0 : index
    %21 = vector.load %arg14[%c0_23, %c0_24, %c0_25] : memref<2x1x32xf32, #tpu.memory_space<vmem>>, vector<1x1x32xf32>
    %22 = vector.shape_cast %21 : vector<1x1x32xf32> to vector<1x32xf32>
    %c0_26 = arith.constant 0 : index
    %c0_27 = arith.constant 0 : index
    %c0_28 = arith.constant 0 : index
    %23 = vector.load %arg6[%c0_26, %c0_27, %c0_28] : memref<2x32x96xbf16, #tpu.memory_space<vmem>>, vector<1x32x96xbf16>
    %24 = vector.shape_cast %23 : vector<1x32x96xbf16> to vector<32x96xbf16>
    %c0_29 = arith.constant 0 : index
    %c0_30 = arith.constant 0 : index
    %c0_31 = arith.constant 0 : index
    %25 = vector.load %arg7[%c0_29, %c0_30, %c0_31] : memref<2x1x96xf32, #tpu.memory_space<vmem>>, vector<1x1x96xf32>
    %26 = vector.shape_cast %25 : vector<1x1x96xf32> to vector<1x96xf32>
    %c0_32 = arith.constant 0 : index
    %c0_33 = arith.constant 0 : index
    %c0_34 = arith.constant 0 : index
    %27 = vector.load %arg8[%c0_32, %c0_33, %c0_34] : memref<2x32x32xbf16, #tpu.memory_space<vmem>>, vector<1x32x32xbf16>
    %28 = vector.shape_cast %27 : vector<1x32x32xbf16> to vector<32x32xbf16>
    %c0_35 = arith.constant 0 : index
    %c0_36 = arith.constant 0 : index
    %c0_37 = arith.constant 0 : index
    %29 = vector.load %arg9[%c0_35, %c0_36, %c0_37] : memref<2x1x32xf32, #tpu.memory_space<vmem>>, vector<1x1x32xf32>
    %30 = vector.shape_cast %29 : vector<1x1x32xf32> to vector<1x32xf32>
    %c0_38 = arith.constant 0 : index
    %c0_39 = arith.constant 0 : index
    %c0_40 = arith.constant 0 : index
    %31 = vector.load %arg12[%c0_38, %c0_39, %c0_40] : memref<2x32x128xbf16, #tpu.memory_space<vmem>>, vector<1x32x128xbf16>
    %32 = vector.shape_cast %31 : vector<1x32x128xbf16> to vector<32x128xbf16>
    %c0_41 = arith.constant 0 : index
    %c0_42 = arith.constant 0 : index
    %c0_43 = arith.constant 0 : index
    %33 = vector.load %arg13[%c0_41, %c0_42, %c0_43] : memref<2x64x32xbf16, #tpu.memory_space<vmem>>, vector<1x64x32xbf16>
    %34 = vector.shape_cast %33 : vector<1x64x32xbf16> to vector<64x32xbf16>
    %35 = vector.extract_strided_slice %14 {offsets = [0, 0], sizes = [8, 32], strides = [1, 1]} : vector<16x32xf32> to vector<8x32xf32>
    %36 = arith.mulf %35, %35 : vector<8x32xf32>
    %cst_44 = arith.constant dense<0.000000e+00> : vector<8xf32>
    %37 = vector.multi_reduction <add>, %36, %cst_44 [1] : vector<8x32xf32> to vector<8xf32>
    %38 = vector.shape_cast %37 : vector<8xf32> to vector<8x1xf32>
    %cst_45 = arith.constant 3.200000e+01 : f32
    %39 = vector.broadcast %cst_45 : f32 to vector<8x1xf32>
    %40 = arith.divf %38, %39 : vector<8x1xf32>
    %cst_46 = arith.constant 9.99999997E-7 : f32
    %41 = vector.broadcast %cst_46 : f32 to vector<8x1xf32>
    %42 = arith.addf %40, %41 : vector<8x1xf32>
    %43 = math.rsqrt %42 : vector<8x1xf32>
    %44 = vector.broadcast %43 : vector<8x1xf32> to vector<8x32xf32>
    %45 = arith.mulf %35, %44 : vector<8x32xf32>
    %46 = vector.broadcast %16 : vector<1x32xf32> to vector<8x32xf32>
    %47 = arith.mulf %45, %46 : vector<8x32xf32>
    %48 = arith.truncf %47 : vector<8x32xf32> to vector<8x32xbf16>
    %cst_47 = arith.constant dense<0.000000e+00> : vector<8x96xf32>
    %49 = tpu.matmul %48, %24, %cst_47 {dimension_numbers = #tpu.dot_dimension_numbers<[1], [0], [0], [1], [0, 0, 1, 1], [], []>} : vector<8x32xbf16>, vector<32x96xbf16>, vector<8x96xf32> -> vector<8x96xf32>
    %50 = vector.broadcast %26 : vector<1x96xf32> to vector<8x96xf32>
    %51 = arith.addf %49, %50 : vector<8x96xf32>
    %cst_48 = arith.constant 0.000000e+00 : f32
    %52 = vector.broadcast %cst_48 : f32 to vector<8x32xf32>
    %53 = vector.extract_strided_slice %51 {offsets = [0, 0], sizes = [8, 8], strides = [1, 1]} : vector<8x96xf32> to vector<8x8xf32>
    %54 = arith.truncf %53 : vector<8x8xf32> to vector<8x8xbf16>
    %55 = vector.extract_strided_slice %51 {offsets = [0, 32], sizes = [8, 8], strides = [1, 1]} : vector<8x96xf32> to vector<8x8xf32>
    %56 = arith.truncf %55 : vector<8x8xf32> to vector<8x8xbf16>
    %57 = vector.extract_strided_slice %51 {offsets = [0, 64], sizes = [8, 8], strides = [1, 1]} : vector<8x96xf32> to vector<8x8xf32>
    %58 = arith.truncf %57 : vector<8x8xf32> to vector<8x8xbf16>
    %cst_49 = arith.constant dense<0.000000e+00> : vector<8x8xf32>
    %59 = tpu.matmul %54, %56, %cst_49 {dimension_numbers = #tpu.dot_dimension_numbers<[1], [1], [0], [0], [0, 0, 1, 0], [], []>} : vector<8x8xbf16>, vector<8x8xbf16>, vector<8x8xf32> -> vector<8x8xf32>
    %cst_50 = arith.constant 0.353553385 : f32
    %60 = vector.broadcast %cst_50 : f32 to vector<8x8xf32>
    %61 = arith.mulf %59, %60 : vector<8x8xf32>
    %cst_51 = arith.constant dense<0xFF800000> : vector<8xf32>
    %62 = vector.multi_reduction <maximumf>, %61, %cst_51 [1] : vector<8x8xf32> to vector<8xf32>
    %63 = vector.shape_cast %62 : vector<8xf32> to vector<8x1xf32>
    %64 = vector.broadcast %63 : vector<8x1xf32> to vector<8x8xf32>
    %65 = arith.subf %61, %64 : vector<8x8xf32>
    %66 = math.exp %65 : vector<8x8xf32>
    %cst_52 = arith.constant dense<0.000000e+00> : vector<8xf32>
    %67 = vector.multi_reduction <add>, %66, %cst_52 [1] : vector<8x8xf32> to vector<8xf32>
    %68 = vector.shape_cast %67 : vector<8xf32> to vector<8x1xf32>
    %69 = tpu.reciprocal %68 {approx = true} : vector<8x1xf32> -> vector<8x1xf32>
    %70 = vector.broadcast %69 : vector<8x1xf32> to vector<8x8xf32>
    %71 = arith.mulf %66, %70 : vector<8x8xf32>
    %72 = arith.truncf %71 : vector<8x8xf32> to vector<8x8xbf16>
    %cst_53 = arith.constant dense<0.000000e+00> : vector<8x8xf32>
    %73 = tpu.matmul %72, %58, %cst_53 {dimension_numbers = #tpu.dot_dimension_numbers<[1], [0], [0], [1], [0, 0, 1, 1], [], []>} : vector<8x8xbf16>, vector<8x8xbf16>, vector<8x8xf32> -> vector<8x8xf32>
    %74 = arith.truncf %73 : vector<8x8xf32> to vector<8x8xbf16>
    %75 = vector.extract_strided_slice %28 {offsets = [0, 0], sizes = [8, 32], strides = [1, 1]} : vector<32x32xbf16> to vector<8x32xbf16>
    %cst_54 = arith.constant dense<0.000000e+00> : vector<8x32xf32>
    %76 = tpu.matmul %74, %75, %cst_54 {dimension_numbers = #tpu.dot_dimension_numbers<[1], [0], [0], [1], [0, 0, 1, 1], [], []>} : vector<8x8xbf16>, vector<8x32xbf16>, vector<8x32xf32> -> vector<8x32xf32>
    %77 = arith.addf %52, %76 : vector<8x32xf32>
    %78 = vector.extract_strided_slice %51 {offsets = [0, 8], sizes = [8, 8], strides = [1, 1]} : vector<8x96xf32> to vector<8x8xf32>
    %79 = arith.truncf %78 : vector<8x8xf32> to vector<8x8xbf16>
    %80 = vector.extract_strided_slice %51 {offsets = [0, 40], sizes = [8, 8], strides = [1, 1]} : vector<8x96xf32> to vector<8x8xf32>
    %81 = arith.truncf %80 : vector<8x8xf32> to vector<8x8xbf16>
    %82 = vector.extract_strided_slice %51 {offsets = [0, 72], sizes = [8, 8], strides = [1, 1]} : vector<8x96xf32> to vector<8x8xf32>
    %83 = arith.truncf %82 : vector<8x8xf32> to vector<8x8xbf16>
    %cst_55 = arith.constant dense<0.000000e+00> : vector<8x8xf32>
    %84 = tpu.matmul %79, %81, %cst_55 {dimension_numbers = #tpu.dot_dimension_numbers<[1], [1], [0], [0], [0, 0, 1, 0], [], []>} : vector<8x8xbf16>, vector<8x8xbf16>, vector<8x8xf32> -> vector<8x8xf32>
    %cst_56 = arith.constant 0.353553385 : f32
    %85 = vector.broadcast %cst_56 : f32 to vector<8x8xf32>
    %86 = arith.mulf %84, %85 : vector<8x8xf32>
    %cst_57 = arith.constant dense<0xFF800000> : vector<8xf32>
    %87 = vector.multi_reduction <maximumf>, %86, %cst_57 [1] : vector<8x8xf32> to vector<8xf32>
    %88 = vector.shape_cast %87 : vector<8xf32> to vector<8x1xf32>
    %89 = vector.broadcast %88 : vector<8x1xf32> to vector<8x8xf32>
    %90 = arith.subf %86, %89 : vector<8x8xf32>
    %91 = math.exp %90 : vector<8x8xf32>
    %cst_58 = arith.constant dense<0.000000e+00> : vector<8xf32>
    %92 = vector.multi_reduction <add>, %91, %cst_58 [1] : vector<8x8xf32> to vector<8xf32>
    %93 = vector.shape_cast %92 : vector<8xf32> to vector<8x1xf32>
    %94 = tpu.reciprocal %93 {approx = true} : vector<8x1xf32> -> vector<8x1xf32>
    %95 = vector.broadcast %94 : vector<8x1xf32> to vector<8x8xf32>
    %96 = arith.mulf %91, %95 : vector<8x8xf32>
    %97 = arith.truncf %96 : vector<8x8xf32> to vector<8x8xbf16>
    %cst_59 = arith.constant dense<0.000000e+00> : vector<8x8xf32>
    %98 = tpu.matmul %97, %83, %cst_59 {dimension_numbers = #tpu.dot_dimension_numbers<[1], [0], [0], [1], [0, 0, 1, 1], [], []>} : vector<8x8xbf16>, vector<8x8xbf16>, vector<8x8xf32> -> vector<8x8xf32>
    %99 = arith.truncf %98 : vector<8x8xf32> to vector<8x8xbf16>
    %100 = vector.extract_strided_slice %28 {offsets = [8, 0], sizes = [8, 32], strides = [1, 1]} : vector<32x32xbf16> to vector<8x32xbf16>
    %cst_60 = arith.constant dense<0.000000e+00> : vector<8x32xf32>
    %101 = tpu.matmul %99, %100, %cst_60 {dimension_numbers = #tpu.dot_dimension_numbers<[1], [0], [0], [1], [0, 0, 1, 1], [], []>} : vector<8x8xbf16>, vector<8x32xbf16>, vector<8x32xf32> -> vector<8x32xf32>
    %102 = arith.addf %77, %101 : vector<8x32xf32>
    %103 = vector.extract_strided_slice %51 {offsets = [0, 16], sizes = [8, 8], strides = [1, 1]} : vector<8x96xf32> to vector<8x8xf32>
    %104 = arith.truncf %103 : vector<8x8xf32> to vector<8x8xbf16>
    %105 = vector.extract_strided_slice %51 {offsets = [0, 48], sizes = [8, 8], strides = [1, 1]} : vector<8x96xf32> to vector<8x8xf32>
    %106 = arith.truncf %105 : vector<8x8xf32> to vector<8x8xbf16>
    %107 = vector.extract_strided_slice %51 {offsets = [0, 80], sizes = [8, 8], strides = [1, 1]} : vector<8x96xf32> to vector<8x8xf32>
    %108 = arith.truncf %107 : vector<8x8xf32> to vector<8x8xbf16>
    %cst_61 = arith.constant dense<0.000000e+00> : vector<8x8xf32>
    %109 = tpu.matmul %104, %106, %cst_61 {dimension_numbers = #tpu.dot_dimension_numbers<[1], [1], [0], [0], [0, 0, 1, 0], [], []>} : vector<8x8xbf16>, vector<8x8xbf16>, vector<8x8xf32> -> vector<8x8xf32>
    %cst_62 = arith.constant 0.353553385 : f32
    %110 = vector.broadcast %cst_62 : f32 to vector<8x8xf32>
    %111 = arith.mulf %109, %110 : vector<8x8xf32>
    %cst_63 = arith.constant dense<0xFF800000> : vector<8xf32>
    %112 = vector.multi_reduction <maximumf>, %111, %cst_63 [1] : vector<8x8xf32> to vector<8xf32>
    %113 = vector.shape_cast %112 : vector<8xf32> to vector<8x1xf32>
    %114 = vector.broadcast %113 : vector<8x1xf32> to vector<8x8xf32>
    %115 = arith.subf %111, %114 : vector<8x8xf32>
    %116 = math.exp %115 : vector<8x8xf32>
    %cst_64 = arith.constant dense<0.000000e+00> : vector<8xf32>
    %117 = vector.multi_reduction <add>, %116, %cst_64 [1] : vector<8x8xf32> to vector<8xf32>
    %118 = vector.shape_cast %117 : vector<8xf32> to vector<8x1xf32>
    %119 = tpu.reciprocal %118 {approx = true} : vector<8x1xf32> -> vector<8x1xf32>
    %120 = vector.broadcast %119 : vector<8x1xf32> to vector<8x8xf32>
    %121 = arith.mulf %116, %120 : vector<8x8xf32>
    %122 = arith.truncf %121 : vector<8x8xf32> to vector<8x8xbf16>
    %cst_65 = arith.constant dense<0.000000e+00> : vector<8x8xf32>
    %123 = tpu.matmul %122, %108, %cst_65 {dimension_numbers = #tpu.dot_dimension_numbers<[1], [0], [0], [1], [0, 0, 1, 1], [], []>} : vector<8x8xbf16>, vector<8x8xbf16>, vector<8x8xf32> -> vector<8x8xf32>
    %124 = arith.truncf %123 : vector<8x8xf32> to vector<8x8xbf16>
    %125 = vector.extract_strided_slice %28 {offsets = [16, 0], sizes = [8, 32], strides = [1, 1]} : vector<32x32xbf16> to vector<8x32xbf16>
    %cst_66 = arith.constant dense<0.000000e+00> : vector<8x32xf32>
    %126 = tpu.matmul %124, %125, %cst_66 {dimension_numbers = #tpu.dot_dimension_numbers<[1], [0], [0], [1], [0, 0, 1, 1], [], []>} : vector<8x8xbf16>, vector<8x32xbf16>, vector<8x32xf32> -> vector<8x32xf32>
    %127 = arith.addf %102, %126 : vector<8x32xf32>
    %128 = vector.extract_strided_slice %51 {offsets = [0, 24], sizes = [8, 8], strides = [1, 1]} : vector<8x96xf32> to vector<8x8xf32>
    %129 = arith.truncf %128 : vector<8x8xf32> to vector<8x8xbf16>
    %130 = vector.extract_strided_slice %51 {offsets = [0, 56], sizes = [8, 8], strides = [1, 1]} : vector<8x96xf32> to vector<8x8xf32>
    %131 = arith.truncf %130 : vector<8x8xf32> to vector<8x8xbf16>
    %132 = vector.extract_strided_slice %51 {offsets = [0, 88], sizes = [8, 8], strides = [1, 1]} : vector<8x96xf32> to vector<8x8xf32>
    %133 = arith.truncf %132 : vector<8x8xf32> to vector<8x8xbf16>
    %cst_67 = arith.constant dense<0.000000e+00> : vector<8x8xf32>
    %134 = tpu.matmul %129, %131, %cst_67 {dimension_numbers = #tpu.dot_dimension_numbers<[1], [1], [0], [0], [0, 0, 1, 0], [], []>} : vector<8x8xbf16>, vector<8x8xbf16>, vector<8x8xf32> -> vector<8x8xf32>
    %cst_68 = arith.constant 0.353553385 : f32
    %135 = vector.broadcast %cst_68 : f32 to vector<8x8xf32>
    %136 = arith.mulf %134, %135 : vector<8x8xf32>
    %cst_69 = arith.constant dense<0xFF800000> : vector<8xf32>
    %137 = vector.multi_reduction <maximumf>, %136, %cst_69 [1] : vector<8x8xf32> to vector<8xf32>
    %138 = vector.shape_cast %137 : vector<8xf32> to vector<8x1xf32>
    %139 = vector.broadcast %138 : vector<8x1xf32> to vector<8x8xf32>
    %140 = arith.subf %136, %139 : vector<8x8xf32>
    %141 = math.exp %140 : vector<8x8xf32>
    %cst_70 = arith.constant dense<0.000000e+00> : vector<8xf32>
    %142 = vector.multi_reduction <add>, %141, %cst_70 [1] : vector<8x8xf32> to vector<8xf32>
    %143 = vector.shape_cast %142 : vector<8xf32> to vector<8x1xf32>
    %144 = tpu.reciprocal %143 {approx = true} : vector<8x1xf32> -> vector<8x1xf32>
    %145 = vector.broadcast %144 : vector<8x1xf32> to vector<8x8xf32>
    %146 = arith.mulf %141, %145 : vector<8x8xf32>
    %147 = arith.truncf %146 : vector<8x8xf32> to vector<8x8xbf16>
    %cst_71 = arith.constant dense<0.000000e+00> : vector<8x8xf32>
    %148 = tpu.matmul %147, %133, %cst_71 {dimension_numbers = #tpu.dot_dimension_numbers<[1], [0], [0], [1], [0, 0, 1, 1], [], []>} : vector<8x8xbf16>, vector<8x8xbf16>, vector<8x8xf32> -> vector<8x8xf32>
    %149 = arith.truncf %148 : vector<8x8xf32> to vector<8x8xbf16>
    %150 = vector.extract_strided_slice %28 {offsets = [24, 0], sizes = [8, 32], strides = [1, 1]} : vector<32x32xbf16> to vector<8x32xbf16>
    %cst_72 = arith.constant dense<0.000000e+00> : vector<8x32xf32>
    %151 = tpu.matmul %149, %150, %cst_72 {dimension_numbers = #tpu.dot_dimension_numbers<[1], [0], [0], [1], [0, 0, 1, 1], [], []>} : vector<8x8xbf16>, vector<8x32xbf16>, vector<8x32xf32> -> vector<8x32xf32>
    %152 = arith.addf %127, %151 : vector<8x32xf32>
    %153 = arith.addf %35, %152 : vector<8x32xf32>
    %154 = vector.broadcast %30 : vector<1x32xf32> to vector<8x32xf32>
    %155 = arith.addf %153, %154 : vector<8x32xf32>
    %156 = arith.mulf %155, %155 : vector<8x32xf32>
    %cst_73 = arith.constant dense<0.000000e+00> : vector<8xf32>
    %157 = vector.multi_reduction <add>, %156, %cst_73 [1] : vector<8x32xf32> to vector<8xf32>
    %158 = vector.shape_cast %157 : vector<8xf32> to vector<8x1xf32>
    %cst_74 = arith.constant 3.200000e+01 : f32
    %159 = vector.broadcast %cst_74 : f32 to vector<8x1xf32>
    %160 = arith.divf %158, %159 : vector<8x1xf32>
    %cst_75 = arith.constant 9.99999997E-7 : f32
    %161 = vector.broadcast %cst_75 : f32 to vector<8x1xf32>
    %162 = arith.addf %160, %161 : vector<8x1xf32>
    %163 = math.rsqrt %162 : vector<8x1xf32>
    %164 = vector.broadcast %163 : vector<8x1xf32> to vector<8x32xf32>
    %165 = arith.mulf %155, %164 : vector<8x32xf32>
    %166 = vector.broadcast %18 : vector<1x32xf32> to vector<8x32xf32>
    %167 = arith.mulf %165, %166 : vector<8x32xf32>
    %168 = vector.extract_strided_slice %14 {offsets = [8, 0], sizes = [8, 32], strides = [1, 1]} : vector<16x32xf32> to vector<8x32xf32>
    %169 = arith.mulf %168, %168 : vector<8x32xf32>
    %cst_76 = arith.constant dense<0.000000e+00> : vector<8xf32>
    %170 = vector.multi_reduction <add>, %169, %cst_76 [1] : vector<8x32xf32> to vector<8xf32>
    %171 = vector.shape_cast %170 : vector<8xf32> to vector<8x1xf32>
    %cst_77 = arith.constant 3.200000e+01 : f32
    %172 = vector.broadcast %cst_77 : f32 to vector<8x1xf32>
    %173 = arith.divf %171, %172 : vector<8x1xf32>
    %cst_78 = arith.constant 9.99999997E-7 : f32
    %174 = vector.broadcast %cst_78 : f32 to vector<8x1xf32>
    %175 = arith.addf %173, %174 : vector<8x1xf32>
    %176 = math.rsqrt %175 : vector<8x1xf32>
    %177 = vector.broadcast %176 : vector<8x1xf32> to vector<8x32xf32>
    %178 = arith.mulf %168, %177 : vector<8x32xf32>
    %179 = vector.broadcast %16 : vector<1x32xf32> to vector<8x32xf32>
    %180 = arith.mulf %178, %179 : vector<8x32xf32>
    %181 = arith.truncf %180 : vector<8x32xf32> to vector<8x32xbf16>
    %cst_79 = arith.constant dense<0.000000e+00> : vector<8x96xf32>
    %182 = tpu.matmul %181, %24, %cst_79 {dimension_numbers = #tpu.dot_dimension_numbers<[1], [0], [0], [1], [0, 0, 1, 1], [], []>} : vector<8x32xbf16>, vector<32x96xbf16>, vector<8x96xf32> -> vector<8x96xf32>
    %183 = vector.broadcast %26 : vector<1x96xf32> to vector<8x96xf32>
    %184 = arith.addf %182, %183 : vector<8x96xf32>
    %cst_80 = arith.constant 0.000000e+00 : f32
    %185 = vector.broadcast %cst_80 : f32 to vector<8x32xf32>
    %186 = vector.extract_strided_slice %184 {offsets = [0, 0], sizes = [8, 8], strides = [1, 1]} : vector<8x96xf32> to vector<8x8xf32>
    %187 = arith.truncf %186 : vector<8x8xf32> to vector<8x8xbf16>
    %188 = vector.extract_strided_slice %184 {offsets = [0, 32], sizes = [8, 8], strides = [1, 1]} : vector<8x96xf32> to vector<8x8xf32>
    %189 = arith.truncf %188 : vector<8x8xf32> to vector<8x8xbf16>
    %190 = vector.extract_strided_slice %184 {offsets = [0, 64], sizes = [8, 8], strides = [1, 1]} : vector<8x96xf32> to vector<8x8xf32>
    %191 = arith.truncf %190 : vector<8x8xf32> to vector<8x8xbf16>
    %cst_81 = arith.constant dense<0.000000e+00> : vector<8x8xf32>
    %192 = tpu.matmul %187, %189, %cst_81 {dimension_numbers = #tpu.dot_dimension_numbers<[1], [1], [0], [0], [0, 0, 1, 0], [], []>} : vector<8x8xbf16>, vector<8x8xbf16>, vector<8x8xf32> -> vector<8x8xf32>
    %cst_82 = arith.constant 0.353553385 : f32
    %193 = vector.broadcast %cst_82 : f32 to vector<8x8xf32>
    %194 = arith.mulf %192, %193 : vector<8x8xf32>
    %cst_83 = arith.constant dense<0xFF800000> : vector<8xf32>
    %195 = vector.multi_reduction <maximumf>, %194, %cst_83 [1] : vector<8x8xf32> to vector<8xf32>
    %196 = vector.shape_cast %195 : vector<8xf32> to vector<8x1xf32>
    %197 = vector.broadcast %196 : vector<8x1xf32> to vector<8x8xf32>
    %198 = arith.subf %194, %197 : vector<8x8xf32>
    %199 = math.exp %198 : vector<8x8xf32>
    %cst_84 = arith.constant dense<0.000000e+00> : vector<8xf32>
    %200 = vector.multi_reduction <add>, %199, %cst_84 [1] : vector<8x8xf32> to vector<8xf32>
    %201 = vector.shape_cast %200 : vector<8xf32> to vector<8x1xf32>
    %202 = tpu.reciprocal %201 {approx = true} : vector<8x1xf32> -> vector<8x1xf32>
    %203 = vector.broadcast %202 : vector<8x1xf32> to vector<8x8xf32>
    %204 = arith.mulf %199, %203 : vector<8x8xf32>
    %205 = arith.truncf %204 : vector<8x8xf32> to vector<8x8xbf16>
    %cst_85 = arith.constant dense<0.000000e+00> : vector<8x8xf32>
    %206 = tpu.matmul %205, %191, %cst_85 {dimension_numbers = #tpu.dot_dimension_numbers<[1], [0], [0], [1], [0, 0, 1, 1], [], []>} : vector<8x8xbf16>, vector<8x8xbf16>, vector<8x8xf32> -> vector<8x8xf32>
    %207 = arith.truncf %206 : vector<8x8xf32> to vector<8x8xbf16>
    %208 = vector.extract_strided_slice %28 {offsets = [0, 0], sizes = [8, 32], strides = [1, 1]} : vector<32x32xbf16> to vector<8x32xbf16>
    %cst_86 = arith.constant dense<0.000000e+00> : vector<8x32xf32>
    %209 = tpu.matmul %207, %208, %cst_86 {dimension_numbers = #tpu.dot_dimension_numbers<[1], [0], [0], [1], [0, 0, 1, 1], [], []>} : vector<8x8xbf16>, vector<8x32xbf16>, vector<8x32xf32> -> vector<8x32xf32>
    %210 = arith.addf %185, %209 : vector<8x32xf32>
    %211 = vector.extract_strided_slice %184 {offsets = [0, 8], sizes = [8, 8], strides = [1, 1]} : vector<8x96xf32> to vector<8x8xf32>
    %212 = arith.truncf %211 : vector<8x8xf32> to vector<8x8xbf16>
    %213 = vector.extract_strided_slice %184 {offsets = [0, 40], sizes = [8, 8], strides = [1, 1]} : vector<8x96xf32> to vector<8x8xf32>
    %214 = arith.truncf %213 : vector<8x8xf32> to vector<8x8xbf16>
    %215 = vector.extract_strided_slice %184 {offsets = [0, 72], sizes = [8, 8], strides = [1, 1]} : vector<8x96xf32> to vector<8x8xf32>
    %216 = arith.truncf %215 : vector<8x8xf32> to vector<8x8xbf16>
    %cst_87 = arith.constant dense<0.000000e+00> : vector<8x8xf32>
    %217 = tpu.matmul %212, %214, %cst_87 {dimension_numbers = #tpu.dot_dimension_numbers<[1], [1], [0], [0], [0, 0, 1, 0], [], []>} : vector<8x8xbf16>, vector<8x8xbf16>, vector<8x8xf32> -> vector<8x8xf32>
    %cst_88 = arith.constant 0.353553385 : f32
    %218 = vector.broadcast %cst_88 : f32 to vector<8x8xf32>
    %219 = arith.mulf %217, %218 : vector<8x8xf32>
    %cst_89 = arith.constant dense<0xFF800000> : vector<8xf32>
    %220 = vector.multi_reduction <maximumf>, %219, %cst_89 [1] : vector<8x8xf32> to vector<8xf32>
    %221 = vector.shape_cast %220 : vector<8xf32> to vector<8x1xf32>
    %222 = vector.broadcast %221 : vector<8x1xf32> to vector<8x8xf32>
    %223 = arith.subf %219, %222 : vector<8x8xf32>
    %224 = math.exp %223 : vector<8x8xf32>
    %cst_90 = arith.constant dense<0.000000e+00> : vector<8xf32>
    %225 = vector.multi_reduction <add>, %224, %cst_90 [1] : vector<8x8xf32> to vector<8xf32>
    %226 = vector.shape_cast %225 : vector<8xf32> to vector<8x1xf32>
    %227 = tpu.reciprocal %226 {approx = true} : vector<8x1xf32> -> vector<8x1xf32>
    %228 = vector.broadcast %227 : vector<8x1xf32> to vector<8x8xf32>
    %229 = arith.mulf %224, %228 : vector<8x8xf32>
    %230 = arith.truncf %229 : vector<8x8xf32> to vector<8x8xbf16>
    %cst_91 = arith.constant dense<0.000000e+00> : vector<8x8xf32>
    %231 = tpu.matmul %230, %216, %cst_91 {dimension_numbers = #tpu.dot_dimension_numbers<[1], [0], [0], [1], [0, 0, 1, 1], [], []>} : vector<8x8xbf16>, vector<8x8xbf16>, vector<8x8xf32> -> vector<8x8xf32>
    %232 = arith.truncf %231 : vector<8x8xf32> to vector<8x8xbf16>
    %233 = vector.extract_strided_slice %28 {offsets = [8, 0], sizes = [8, 32], strides = [1, 1]} : vector<32x32xbf16> to vector<8x32xbf16>
    %cst_92 = arith.constant dense<0.000000e+00> : vector<8x32xf32>
    %234 = tpu.matmul %232, %233, %cst_92 {dimension_numbers = #tpu.dot_dimension_numbers<[1], [0], [0], [1], [0, 0, 1, 1], [], []>} : vector<8x8xbf16>, vector<8x32xbf16>, vector<8x32xf32> -> vector<8x32xf32>
    %235 = arith.addf %210, %234 : vector<8x32xf32>
    %236 = vector.extract_strided_slice %184 {offsets = [0, 16], sizes = [8, 8], strides = [1, 1]} : vector<8x96xf32> to vector<8x8xf32>
    %237 = arith.truncf %236 : vector<8x8xf32> to vector<8x8xbf16>
    %238 = vector.extract_strided_slice %184 {offsets = [0, 48], sizes = [8, 8], strides = [1, 1]} : vector<8x96xf32> to vector<8x8xf32>
    %239 = arith.truncf %238 : vector<8x8xf32> to vector<8x8xbf16>
    %240 = vector.extract_strided_slice %184 {offsets = [0, 80], sizes = [8, 8], strides = [1, 1]} : vector<8x96xf32> to vector<8x8xf32>
    %241 = arith.truncf %240 : vector<8x8xf32> to vector<8x8xbf16>
    %cst_93 = arith.constant dense<0.000000e+00> : vector<8x8xf32>
    %242 = tpu.matmul %237, %239, %cst_93 {dimension_numbers = #tpu.dot_dimension_numbers<[1], [1], [0], [0], [0, 0, 1, 0], [], []>} : vector<8x8xbf16>, vector<8x8xbf16>, vector<8x8xf32> -> vector<8x8xf32>
    %cst_94 = arith.constant 0.353553385 : f32
    %243 = vector.broadcast %cst_94 : f32 to vector<8x8xf32>
    %244 = arith.mulf %242, %243 : vector<8x8xf32>
    %cst_95 = arith.constant dense<0xFF800000> : vector<8xf32>
    %245 = vector.multi_reduction <maximumf>, %244, %cst_95 [1] : vector<8x8xf32> to vector<8xf32>
    %246 = vector.shape_cast %245 : vector<8xf32> to vector<8x1xf32>
    %247 = vector.broadcast %246 : vector<8x1xf32> to vector<8x8xf32>
    %248 = arith.subf %244, %247 : vector<8x8xf32>
    %249 = math.exp %248 : vector<8x8xf32>
    %cst_96 = arith.constant dense<0.000000e+00> : vector<8xf32>
    %250 = vector.multi_reduction <add>, %249, %cst_96 [1] : vector<8x8xf32> to vector<8xf32>
    %251 = vector.shape_cast %250 : vector<8xf32> to vector<8x1xf32>
    %252 = tpu.reciprocal %251 {approx = true} : vector<8x1xf32> -> vector<8x1xf32>
    %253 = vector.broadcast %252 : vector<8x1xf32> to vector<8x8xf32>
    %254 = arith.mulf %249, %253 : vector<8x8xf32>
    %255 = arith.truncf %254 : vector<8x8xf32> to vector<8x8xbf16>
    %cst_97 = arith.constant dense<0.000000e+00> : vector<8x8xf32>
    %256 = tpu.matmul %255, %241, %cst_97 {dimension_numbers = #tpu.dot_dimension_numbers<[1], [0], [0], [1], [0, 0, 1, 1], [], []>} : vector<8x8xbf16>, vector<8x8xbf16>, vector<8x8xf32> -> vector<8x8xf32>
    %257 = arith.truncf %256 : vector<8x8xf32> to vector<8x8xbf16>
    %258 = vector.extract_strided_slice %28 {offsets = [16, 0], sizes = [8, 32], strides = [1, 1]} : vector<32x32xbf16> to vector<8x32xbf16>
    %cst_98 = arith.constant dense<0.000000e+00> : vector<8x32xf32>
    %259 = tpu.matmul %257, %258, %cst_98 {dimension_numbers = #tpu.dot_dimension_numbers<[1], [0], [0], [1], [0, 0, 1, 1], [], []>} : vector<8x8xbf16>, vector<8x32xbf16>, vector<8x32xf32> -> vector<8x32xf32>
    %260 = arith.addf %235, %259 : vector<8x32xf32>
    %261 = vector.extract_strided_slice %184 {offsets = [0, 24], sizes = [8, 8], strides = [1, 1]} : vector<8x96xf32> to vector<8x8xf32>
    %262 = arith.truncf %261 : vector<8x8xf32> to vector<8x8xbf16>
    %263 = vector.extract_strided_slice %184 {offsets = [0, 56], sizes = [8, 8], strides = [1, 1]} : vector<8x96xf32> to vector<8x8xf32>
    %264 = arith.truncf %263 : vector<8x8xf32> to vector<8x8xbf16>
    %265 = vector.extract_strided_slice %184 {offsets = [0, 88], sizes = [8, 8], strides = [1, 1]} : vector<8x96xf32> to vector<8x8xf32>
    %266 = arith.truncf %265 : vector<8x8xf32> to vector<8x8xbf16>
    %cst_99 = arith.constant dense<0.000000e+00> : vector<8x8xf32>
    %267 = tpu.matmul %262, %264, %cst_99 {dimension_numbers = #tpu.dot_dimension_numbers<[1], [1], [0], [0], [0, 0, 1, 0], [], []>} : vector<8x8xbf16>, vector<8x8xbf16>, vector<8x8xf32> -> vector<8x8xf32>
    %cst_100 = arith.constant 0.353553385 : f32
    %268 = vector.broadcast %cst_100 : f32 to vector<8x8xf32>
    %269 = arith.mulf %267, %268 : vector<8x8xf32>
    %cst_101 = arith.constant dense<0xFF800000> : vector<8xf32>
    %270 = vector.multi_reduction <maximumf>, %269, %cst_101 [1] : vector<8x8xf32> to vector<8xf32>
    %271 = vector.shape_cast %270 : vector<8xf32> to vector<8x1xf32>
    %272 = vector.broadcast %271 : vector<8x1xf32> to vector<8x8xf32>
    %273 = arith.subf %269, %272 : vector<8x8xf32>
    %274 = math.exp %273 : vector<8x8xf32>
    %cst_102 = arith.constant dense<0.000000e+00> : vector<8xf32>
    %275 = vector.multi_reduction <add>, %274, %cst_102 [1] : vector<8x8xf32> to vector<8xf32>
    %276 = vector.shape_cast %275 : vector<8xf32> to vector<8x1xf32>
    %277 = tpu.reciprocal %276 {approx = true} : vector<8x1xf32> -> vector<8x1xf32>
    %278 = vector.broadcast %277 : vector<8x1xf32> to vector<8x8xf32>
    %279 = arith.mulf %274, %278 : vector<8x8xf32>
    %280 = arith.truncf %279 : vector<8x8xf32> to vector<8x8xbf16>
    %cst_103 = arith.constant dense<0.000000e+00> : vector<8x8xf32>
    %281 = tpu.matmul %280, %266, %cst_103 {dimension_numbers = #tpu.dot_dimension_numbers<[1], [0], [0], [1], [0, 0, 1, 1], [], []>} : vector<8x8xbf16>, vector<8x8xbf16>, vector<8x8xf32> -> vector<8x8xf32>
    %282 = arith.truncf %281 : vector<8x8xf32> to vector<8x8xbf16>
    %283 = vector.extract_strided_slice %28 {offsets = [24, 0], sizes = [8, 32], strides = [1, 1]} : vector<32x32xbf16> to vector<8x32xbf16>
    %cst_104 = arith.constant dense<0.000000e+00> : vector<8x32xf32>
    %284 = tpu.matmul %282, %283, %cst_104 {dimension_numbers = #tpu.dot_dimension_numbers<[1], [0], [0], [1], [0, 0, 1, 1], [], []>} : vector<8x8xbf16>, vector<8x32xbf16>, vector<8x32xf32> -> vector<8x32xf32>
    %285 = arith.addf %260, %284 : vector<8x32xf32>
    %286 = arith.addf %168, %285 : vector<8x32xf32>
    %287 = vector.broadcast %30 : vector<1x32xf32> to vector<8x32xf32>
    %288 = arith.addf %286, %287 : vector<8x32xf32>
    %289 = arith.mulf %288, %288 : vector<8x32xf32>
    %cst_105 = arith.constant dense<0.000000e+00> : vector<8xf32>
    %290 = vector.multi_reduction <add>, %289, %cst_105 [1] : vector<8x32xf32> to vector<8xf32>
    %291 = vector.shape_cast %290 : vector<8xf32> to vector<8x1xf32>
    %cst_106 = arith.constant 3.200000e+01 : f32
    %292 = vector.broadcast %cst_106 : f32 to vector<8x1xf32>
    %293 = arith.divf %291, %292 : vector<8x1xf32>
    %cst_107 = arith.constant 9.99999997E-7 : f32
    %294 = vector.broadcast %cst_107 : f32 to vector<8x1xf32>
    %295 = arith.addf %293, %294 : vector<8x1xf32>
    %296 = math.rsqrt %295 : vector<8x1xf32>
    %297 = vector.broadcast %296 : vector<8x1xf32> to vector<8x32xf32>
    %298 = arith.mulf %288, %297 : vector<8x32xf32>
    %299 = vector.broadcast %18 : vector<1x32xf32> to vector<8x32xf32>
    %300 = arith.mulf %298, %299 : vector<8x32xf32>
    %301 = tpu.concatenate %167, %300 in 0 : vector<8x32xf32>, vector<8x32xf32> -> vector<16x32xf32>
    %302 = arith.mulf %301, %301 : vector<16x32xf32>
    %cst_108 = arith.constant dense<0.000000e+00> : vector<16xf32>
    %303 = vector.multi_reduction <add>, %302, %cst_108 [1] : vector<16x32xf32> to vector<16xf32>
    %304 = vector.shape_cast %303 : vector<16xf32> to vector<16x1xf32>
    %cst_109 = arith.constant 3.200000e+01 : f32
    %305 = vector.broadcast %cst_109 : f32 to vector<16x1xf32>
    %306 = arith.divf %304, %305 : vector<16x1xf32>
    %cst_110 = arith.constant 9.99999997E-7 : f32
    %307 = vector.broadcast %cst_110 : f32 to vector<16x1xf32>
    %308 = arith.addf %306, %307 : vector<16x1xf32>
    %309 = math.rsqrt %308 : vector<16x1xf32>
    %310 = vector.broadcast %309 : vector<16x1xf32> to vector<16x32xf32>
    %311 = arith.mulf %301, %310 : vector<16x32xf32>
    %312 = vector.broadcast %20 : vector<1x32xf32> to vector<16x32xf32>
    %313 = arith.mulf %311, %312 : vector<16x32xf32>
    %314 = arith.truncf %313 : vector<16x32xf32> to vector<16x32xbf16>
    %cst_111 = arith.constant dense<0.000000e+00> : vector<16x128xf32>
    %315 = tpu.matmul %314, %32, %cst_111 {dimension_numbers = #tpu.dot_dimension_numbers<[1], [0], [0], [1], [0, 0, 1, 1], [], []>} : vector<16x32xbf16>, vector<32x128xbf16>, vector<16x128xf32> -> vector<16x128xf32>
    %316 = vector.extract_strided_slice %315 {offsets = [0, 0], sizes = [16, 64], strides = [1, 1]} : vector<16x128xf32> to vector<16x64xf32>
    %317 = vector.extract_strided_slice %315 {offsets = [0, 64], sizes = [16, 64], strides = [1, 1]} : vector<16x128xf32> to vector<16x64xf32>
    %318 = arith.negf %316 : vector<16x64xf32>
    %319 = math.exp %318 : vector<16x64xf32>
    %cst_112 = arith.constant 1.000000e+00 : f32
    %320 = vector.broadcast %cst_112 : f32 to vector<16x64xf32>
    %321 = arith.addf %320, %319 : vector<16x64xf32>
    %322 = arith.divf %320, %321 : vector<16x64xf32>
    %323 = arith.mulf %316, %322 : vector<16x64xf32>
    %324 = arith.mulf %323, %317 : vector<16x64xf32>
    %325 = arith.truncf %324 : vector<16x64xf32> to vector<16x64xbf16>
    %cst_113 = arith.constant dense<0.000000e+00> : vector<16x32xf32>
    %326 = tpu.matmul %325, %34, %cst_113 {dimension_numbers = #tpu.dot_dimension_numbers<[1], [0], [0], [1], [0, 0, 1, 1], [], []>} : vector<16x64xbf16>, vector<64x32xbf16>, vector<16x32xf32> -> vector<16x32xf32>
    %327 = arith.addf %301, %326 : vector<16x32xf32>
    %328 = arith.mulf %327, %327 : vector<16x32xf32>
    %cst_114 = arith.constant dense<0.000000e+00> : vector<16xf32>
    %329 = vector.multi_reduction <add>, %328, %cst_114 [1] : vector<16x32xf32> to vector<16xf32>
    %330 = vector.shape_cast %329 : vector<16xf32> to vector<16x1xf32>
    %cst_115 = arith.constant 3.200000e+01 : f32
    %331 = vector.broadcast %cst_115 : f32 to vector<16x1xf32>
    %332 = arith.divf %330, %331 : vector<16x1xf32>
    %cst_116 = arith.constant 9.99999997E-7 : f32
    %333 = vector.broadcast %cst_116 : f32 to vector<16x1xf32>
    %334 = arith.addf %332, %333 : vector<16x1xf32>
    %335 = math.rsqrt %334 : vector<16x1xf32>
    %336 = vector.broadcast %335 : vector<16x1xf32> to vector<16x32xf32>
    %337 = arith.mulf %327, %336 : vector<16x32xf32>
    %338 = vector.broadcast %22 : vector<1x32xf32> to vector<16x32xf32>
    %339 = arith.mulf %337, %338 : vector<16x32xf32>
    %c1 = arith.constant 1 : index
    %c0_117 = arith.constant 0 : index
    %c0_118 = arith.constant 0 : index
    %340 = vector.load %arg5[%c1, %c0_117, %c0_118] : memref<2x1x32xf32, #tpu.memory_space<vmem>>, vector<1x1x32xf32>
    %341 = vector.shape_cast %340 : vector<1x1x32xf32> to vector<1x32xf32>
    %c1_119 = arith.constant 1 : index
    %c0_120 = arith.constant 0 : index
    %c0_121 = arith.constant 0 : index
    %342 = vector.load %arg10[%c1_119, %c0_120, %c0_121] : memref<2x1x32xf32, #tpu.memory_space<vmem>>, vector<1x1x32xf32>
    %343 = vector.shape_cast %342 : vector<1x1x32xf32> to vector<1x32xf32>
    %c1_122 = arith.constant 1 : index
    %c0_123 = arith.constant 0 : index
    %c0_124 = arith.constant 0 : index
    %344 = vector.load %arg11[%c1_122, %c0_123, %c0_124] : memref<2x1x32xf32, #tpu.memory_space<vmem>>, vector<1x1x32xf32>
    %345 = vector.shape_cast %344 : vector<1x1x32xf32> to vector<1x32xf32>
    %c1_125 = arith.constant 1 : index
    %c0_126 = arith.constant 0 : index
    %c0_127 = arith.constant 0 : index
    %346 = vector.load %arg14[%c1_125, %c0_126, %c0_127] : memref<2x1x32xf32, #tpu.memory_space<vmem>>, vector<1x1x32xf32>
    %347 = vector.shape_cast %346 : vector<1x1x32xf32> to vector<1x32xf32>
    %c1_128 = arith.constant 1 : index
    %c0_129 = arith.constant 0 : index
    %c0_130 = arith.constant 0 : index
    %348 = vector.load %arg6[%c1_128, %c0_129, %c0_130] : memref<2x32x96xbf16, #tpu.memory_space<vmem>>, vector<1x32x96xbf16>
    %349 = vector.shape_cast %348 : vector<1x32x96xbf16> to vector<32x96xbf16>
    %c1_131 = arith.constant 1 : index
    %c0_132 = arith.constant 0 : index
    %c0_133 = arith.constant 0 : index
    %350 = vector.load %arg7[%c1_131, %c0_132, %c0_133] : memref<2x1x96xf32, #tpu.memory_space<vmem>>, vector<1x1x96xf32>
    %351 = vector.shape_cast %350 : vector<1x1x96xf32> to vector<1x96xf32>
    %c1_134 = arith.constant 1 : index
    %c0_135 = arith.constant 0 : index
    %c0_136 = arith.constant 0 : index
    %352 = vector.load %arg8[%c1_134, %c0_135, %c0_136] : memref<2x32x32xbf16, #tpu.memory_space<vmem>>, vector<1x32x32xbf16>
    %353 = vector.shape_cast %352 : vector<1x32x32xbf16> to vector<32x32xbf16>
    %c1_137 = arith.constant 1 : index
    %c0_138 = arith.constant 0 : index
    %c0_139 = arith.constant 0 : index
    %354 = vector.load %arg9[%c1_137, %c0_138, %c0_139] : memref<2x1x32xf32, #tpu.memory_space<vmem>>, vector<1x1x32xf32>
    %355 = vector.shape_cast %354 : vector<1x1x32xf32> to vector<1x32xf32>
    %c1_140 = arith.constant 1 : index
    %c0_141 = arith.constant 0 : index
    %c0_142 = arith.constant 0 : index
    %356 = vector.load %arg12[%c1_140, %c0_141, %c0_142] : memref<2x32x128xbf16, #tpu.memory_space<vmem>>, vector<1x32x128xbf16>
    %357 = vector.shape_cast %356 : vector<1x32x128xbf16> to vector<32x128xbf16>
    %c1_143 = arith.constant 1 : index
    %c0_144 = arith.constant 0 : index
    %c0_145 = arith.constant 0 : index
    %358 = vector.load %arg13[%c1_143, %c0_144, %c0_145] : memref<2x64x32xbf16, #tpu.memory_space<vmem>>, vector<1x64x32xbf16>
    %359 = vector.shape_cast %358 : vector<1x64x32xbf16> to vector<64x32xbf16>
    %360 = vector.extract_strided_slice %339 {offsets = [0, 0], sizes = [8, 32], strides = [1, 1]} : vector<16x32xf32> to vector<8x32xf32>
    %361 = arith.mulf %360, %360 : vector<8x32xf32>
    %cst_146 = arith.constant dense<0.000000e+00> : vector<8xf32>
    %362 = vector.multi_reduction <add>, %361, %cst_146 [1] : vector<8x32xf32> to vector<8xf32>
    %363 = vector.shape_cast %362 : vector<8xf32> to vector<8x1xf32>
    %cst_147 = arith.constant 3.200000e+01 : f32
    %364 = vector.broadcast %cst_147 : f32 to vector<8x1xf32>
    %365 = arith.divf %363, %364 : vector<8x1xf32>
    %cst_148 = arith.constant 9.99999997E-7 : f32
    %366 = vector.broadcast %cst_148 : f32 to vector<8x1xf32>
    %367 = arith.addf %365, %366 : vector<8x1xf32>
    %368 = math.rsqrt %367 : vector<8x1xf32>
    %369 = vector.broadcast %368 : vector<8x1xf32> to vector<8x32xf32>
    %370 = arith.mulf %360, %369 : vector<8x32xf32>
    %371 = vector.broadcast %341 : vector<1x32xf32> to vector<8x32xf32>
    %372 = arith.mulf %370, %371 : vector<8x32xf32>
    %373 = arith.truncf %372 : vector<8x32xf32> to vector<8x32xbf16>
    %cst_149 = arith.constant dense<0.000000e+00> : vector<8x96xf32>
    %374 = tpu.matmul %373, %349, %cst_149 {dimension_numbers = #tpu.dot_dimension_numbers<[1], [0], [0], [1], [0, 0, 1, 1], [], []>} : vector<8x32xbf16>, vector<32x96xbf16>, vector<8x96xf32> -> vector<8x96xf32>
    %375 = vector.broadcast %351 : vector<1x96xf32> to vector<8x96xf32>
    %376 = arith.addf %374, %375 : vector<8x96xf32>
    %cst_150 = arith.constant 0.000000e+00 : f32
    %377 = vector.broadcast %cst_150 : f32 to vector<8x32xf32>
    %378 = vector.extract_strided_slice %376 {offsets = [0, 0], sizes = [8, 8], strides = [1, 1]} : vector<8x96xf32> to vector<8x8xf32>
    %379 = arith.truncf %378 : vector<8x8xf32> to vector<8x8xbf16>
    %380 = vector.extract_strided_slice %376 {offsets = [0, 32], sizes = [8, 8], strides = [1, 1]} : vector<8x96xf32> to vector<8x8xf32>
    %381 = arith.truncf %380 : vector<8x8xf32> to vector<8x8xbf16>
    %382 = vector.extract_strided_slice %376 {offsets = [0, 64], sizes = [8, 8], strides = [1, 1]} : vector<8x96xf32> to vector<8x8xf32>
    %383 = arith.truncf %382 : vector<8x8xf32> to vector<8x8xbf16>
    %cst_151 = arith.constant dense<0.000000e+00> : vector<8x8xf32>
    %384 = tpu.matmul %379, %381, %cst_151 {dimension_numbers = #tpu.dot_dimension_numbers<[1], [1], [0], [0], [0, 0, 1, 0], [], []>} : vector<8x8xbf16>, vector<8x8xbf16>, vector<8x8xf32> -> vector<8x8xf32>
    %cst_152 = arith.constant 0.353553385 : f32
    %385 = vector.broadcast %cst_152 : f32 to vector<8x8xf32>
    %386 = arith.mulf %384, %385 : vector<8x8xf32>
    %cst_153 = arith.constant dense<0xFF800000> : vector<8xf32>
    %387 = vector.multi_reduction <maximumf>, %386, %cst_153 [1] : vector<8x8xf32> to vector<8xf32>
    %388 = vector.shape_cast %387 : vector<8xf32> to vector<8x1xf32>
    %389 = vector.broadcast %388 : vector<8x1xf32> to vector<8x8xf32>
    %390 = arith.subf %386, %389 : vector<8x8xf32>
    %391 = math.exp %390 : vector<8x8xf32>
    %cst_154 = arith.constant dense<0.000000e+00> : vector<8xf32>
    %392 = vector.multi_reduction <add>, %391, %cst_154 [1] : vector<8x8xf32> to vector<8xf32>
    %393 = vector.shape_cast %392 : vector<8xf32> to vector<8x1xf32>
    %394 = tpu.reciprocal %393 {approx = true} : vector<8x1xf32> -> vector<8x1xf32>
    %395 = vector.broadcast %394 : vector<8x1xf32> to vector<8x8xf32>
    %396 = arith.mulf %391, %395 : vector<8x8xf32>
    %397 = arith.truncf %396 : vector<8x8xf32> to vector<8x8xbf16>
    %cst_155 = arith.constant dense<0.000000e+00> : vector<8x8xf32>
    %398 = tpu.matmul %397, %383, %cst_155 {dimension_numbers = #tpu.dot_dimension_numbers<[1], [0], [0], [1], [0, 0, 1, 1], [], []>} : vector<8x8xbf16>, vector<8x8xbf16>, vector<8x8xf32> -> vector<8x8xf32>
    %399 = arith.truncf %398 : vector<8x8xf32> to vector<8x8xbf16>
    %400 = vector.extract_strided_slice %353 {offsets = [0, 0], sizes = [8, 32], strides = [1, 1]} : vector<32x32xbf16> to vector<8x32xbf16>
    %cst_156 = arith.constant dense<0.000000e+00> : vector<8x32xf32>
    %401 = tpu.matmul %399, %400, %cst_156 {dimension_numbers = #tpu.dot_dimension_numbers<[1], [0], [0], [1], [0, 0, 1, 1], [], []>} : vector<8x8xbf16>, vector<8x32xbf16>, vector<8x32xf32> -> vector<8x32xf32>
    %402 = arith.addf %377, %401 : vector<8x32xf32>
    %403 = vector.extract_strided_slice %376 {offsets = [0, 8], sizes = [8, 8], strides = [1, 1]} : vector<8x96xf32> to vector<8x8xf32>
    %404 = arith.truncf %403 : vector<8x8xf32> to vector<8x8xbf16>
    %405 = vector.extract_strided_slice %376 {offsets = [0, 40], sizes = [8, 8], strides = [1, 1]} : vector<8x96xf32> to vector<8x8xf32>
    %406 = arith.truncf %405 : vector<8x8xf32> to vector<8x8xbf16>
    %407 = vector.extract_strided_slice %376 {offsets = [0, 72], sizes = [8, 8], strides = [1, 1]} : vector<8x96xf32> to vector<8x8xf32>
    %408 = arith.truncf %407 : vector<8x8xf32> to vector<8x8xbf16>
    %cst_157 = arith.constant dense<0.000000e+00> : vector<8x8xf32>
    %409 = tpu.matmul %404, %406, %cst_157 {dimension_numbers = #tpu.dot_dimension_numbers<[1], [1], [0], [0], [0, 0, 1, 0], [], []>} : vector<8x8xbf16>, vector<8x8xbf16>, vector<8x8xf32> -> vector<8x8xf32>
    %cst_158 = arith.constant 0.353553385 : f32
    %410 = vector.broadcast %cst_158 : f32 to vector<8x8xf32>
    %411 = arith.mulf %409, %410 : vector<8x8xf32>
    %cst_159 = arith.constant dense<0xFF800000> : vector<8xf32>
    %412 = vector.multi_reduction <maximumf>, %411, %cst_159 [1] : vector<8x8xf32> to vector<8xf32>
    %413 = vector.shape_cast %412 : vector<8xf32> to vector<8x1xf32>
    %414 = vector.broadcast %413 : vector<8x1xf32> to vector<8x8xf32>
    %415 = arith.subf %411, %414 : vector<8x8xf32>
    %416 = math.exp %415 : vector<8x8xf32>
    %cst_160 = arith.constant dense<0.000000e+00> : vector<8xf32>
    %417 = vector.multi_reduction <add>, %416, %cst_160 [1] : vector<8x8xf32> to vector<8xf32>
    %418 = vector.shape_cast %417 : vector<8xf32> to vector<8x1xf32>
    %419 = tpu.reciprocal %418 {approx = true} : vector<8x1xf32> -> vector<8x1xf32>
    %420 = vector.broadcast %419 : vector<8x1xf32> to vector<8x8xf32>
    %421 = arith.mulf %416, %420 : vector<8x8xf32>
    %422 = arith.truncf %421 : vector<8x8xf32> to vector<8x8xbf16>
    %cst_161 = arith.constant dense<0.000000e+00> : vector<8x8xf32>
    %423 = tpu.matmul %422, %408, %cst_161 {dimension_numbers = #tpu.dot_dimension_numbers<[1], [0], [0], [1], [0, 0, 1, 1], [], []>} : vector<8x8xbf16>, vector<8x8xbf16>, vector<8x8xf32> -> vector<8x8xf32>
    %424 = arith.truncf %423 : vector<8x8xf32> to vector<8x8xbf16>
    %425 = vector.extract_strided_slice %353 {offsets = [8, 0], sizes = [8, 32], strides = [1, 1]} : vector<32x32xbf16> to vector<8x32xbf16>
    %cst_162 = arith.constant dense<0.000000e+00> : vector<8x32xf32>
    %426 = tpu.matmul %424, %425, %cst_162 {dimension_numbers = #tpu.dot_dimension_numbers<[1], [0], [0], [1], [0, 0, 1, 1], [], []>} : vector<8x8xbf16>, vector<8x32xbf16>, vector<8x32xf32> -> vector<8x32xf32>
    %427 = arith.addf %402, %426 : vector<8x32xf32>
    %428 = vector.extract_strided_slice %376 {offsets = [0, 16], sizes = [8, 8], strides = [1, 1]} : vector<8x96xf32> to vector<8x8xf32>
    %429 = arith.truncf %428 : vector<8x8xf32> to vector<8x8xbf16>
    %430 = vector.extract_strided_slice %376 {offsets = [0, 48], sizes = [8, 8], strides = [1, 1]} : vector<8x96xf32> to vector<8x8xf32>
    %431 = arith.truncf %430 : vector<8x8xf32> to vector<8x8xbf16>
    %432 = vector.extract_strided_slice %376 {offsets = [0, 80], sizes = [8, 8], strides = [1, 1]} : vector<8x96xf32> to vector<8x8xf32>
    %433 = arith.truncf %432 : vector<8x8xf32> to vector<8x8xbf16>
    %cst_163 = arith.constant dense<0.000000e+00> : vector<8x8xf32>
    %434 = tpu.matmul %429, %431, %cst_163 {dimension_numbers = #tpu.dot_dimension_numbers<[1], [1], [0], [0], [0, 0, 1, 0], [], []>} : vector<8x8xbf16>, vector<8x8xbf16>, vector<8x8xf32> -> vector<8x8xf32>
    %cst_164 = arith.constant 0.353553385 : f32
    %435 = vector.broadcast %cst_164 : f32 to vector<8x8xf32>
    %436 = arith.mulf %434, %435 : vector<8x8xf32>
    %cst_165 = arith.constant dense<0xFF800000> : vector<8xf32>
    %437 = vector.multi_reduction <maximumf>, %436, %cst_165 [1] : vector<8x8xf32> to vector<8xf32>
    %438 = vector.shape_cast %437 : vector<8xf32> to vector<8x1xf32>
    %439 = vector.broadcast %438 : vector<8x1xf32> to vector<8x8xf32>
    %440 = arith.subf %436, %439 : vector<8x8xf32>
    %441 = math.exp %440 : vector<8x8xf32>
    %cst_166 = arith.constant dense<0.000000e+00> : vector<8xf32>
    %442 = vector.multi_reduction <add>, %441, %cst_166 [1] : vector<8x8xf32> to vector<8xf32>
    %443 = vector.shape_cast %442 : vector<8xf32> to vector<8x1xf32>
    %444 = tpu.reciprocal %443 {approx = true} : vector<8x1xf32> -> vector<8x1xf32>
    %445 = vector.broadcast %444 : vector<8x1xf32> to vector<8x8xf32>
    %446 = arith.mulf %441, %445 : vector<8x8xf32>
    %447 = arith.truncf %446 : vector<8x8xf32> to vector<8x8xbf16>
    %cst_167 = arith.constant dense<0.000000e+00> : vector<8x8xf32>
    %448 = tpu.matmul %447, %433, %cst_167 {dimension_numbers = #tpu.dot_dimension_numbers<[1], [0], [0], [1], [0, 0, 1, 1], [], []>} : vector<8x8xbf16>, vector<8x8xbf16>, vector<8x8xf32> -> vector<8x8xf32>
    %449 = arith.truncf %448 : vector<8x8xf32> to vector<8x8xbf16>
    %450 = vector.extract_strided_slice %353 {offsets = [16, 0], sizes = [8, 32], strides = [1, 1]} : vector<32x32xbf16> to vector<8x32xbf16>
    %cst_168 = arith.constant dense<0.000000e+00> : vector<8x32xf32>
    %451 = tpu.matmul %449, %450, %cst_168 {dimension_numbers = #tpu.dot_dimension_numbers<[1], [0], [0], [1], [0, 0, 1, 1], [], []>} : vector<8x8xbf16>, vector<8x32xbf16>, vector<8x32xf32> -> vector<8x32xf32>
    %452 = arith.addf %427, %451 : vector<8x32xf32>
    %453 = vector.extract_strided_slice %376 {offsets = [0, 24], sizes = [8, 8], strides = [1, 1]} : vector<8x96xf32> to vector<8x8xf32>
    %454 = arith.truncf %453 : vector<8x8xf32> to vector<8x8xbf16>
    %455 = vector.extract_strided_slice %376 {offsets = [0, 56], sizes = [8, 8], strides = [1, 1]} : vector<8x96xf32> to vector<8x8xf32>
    %456 = arith.truncf %455 : vector<8x8xf32> to vector<8x8xbf16>
    %457 = vector.extract_strided_slice %376 {offsets = [0, 88], sizes = [8, 8], strides = [1, 1]} : vector<8x96xf32> to vector<8x8xf32>
    %458 = arith.truncf %457 : vector<8x8xf32> to vector<8x8xbf16>
    %cst_169 = arith.constant dense<0.000000e+00> : vector<8x8xf32>
    %459 = tpu.matmul %454, %456, %cst_169 {dimension_numbers = #tpu.dot_dimension_numbers<[1], [1], [0], [0], [0, 0, 1, 0], [], []>} : vector<8x8xbf16>, vector<8x8xbf16>, vector<8x8xf32> -> vector<8x8xf32>
    %cst_170 = arith.constant 0.353553385 : f32
    %460 = vector.broadcast %cst_170 : f32 to vector<8x8xf32>
    %461 = arith.mulf %459, %460 : vector<8x8xf32>
    %cst_171 = arith.constant dense<0xFF800000> : vector<8xf32>
    %462 = vector.multi_reduction <maximumf>, %461, %cst_171 [1] : vector<8x8xf32> to vector<8xf32>
    %463 = vector.shape_cast %462 : vector<8xf32> to vector<8x1xf32>
    %464 = vector.broadcast %463 : vector<8x1xf32> to vector<8x8xf32>
    %465 = arith.subf %461, %464 : vector<8x8xf32>
    %466 = math.exp %465 : vector<8x8xf32>
    %cst_172 = arith.constant dense<0.000000e+00> : vector<8xf32>
    %467 = vector.multi_reduction <add>, %466, %cst_172 [1] : vector<8x8xf32> to vector<8xf32>
    %468 = vector.shape_cast %467 : vector<8xf32> to vector<8x1xf32>
    %469 = tpu.reciprocal %468 {approx = true} : vector<8x1xf32> -> vector<8x1xf32>
    %470 = vector.broadcast %469 : vector<8x1xf32> to vector<8x8xf32>
    %471 = arith.mulf %466, %470 : vector<8x8xf32>
    %472 = arith.truncf %471 : vector<8x8xf32> to vector<8x8xbf16>
    %cst_173 = arith.constant dense<0.000000e+00> : vector<8x8xf32>
    %473 = tpu.matmul %472, %458, %cst_173 {dimension_numbers = #tpu.dot_dimension_numbers<[1], [0], [0], [1], [0, 0, 1, 1], [], []>} : vector<8x8xbf16>, vector<8x8xbf16>, vector<8x8xf32> -> vector<8x8xf32>
    %474 = arith.truncf %473 : vector<8x8xf32> to vector<8x8xbf16>
    %475 = vector.extract_strided_slice %353 {offsets = [24, 0], sizes = [8, 32], strides = [1, 1]} : vector<32x32xbf16> to vector<8x32xbf16>
    %cst_174 = arith.constant dense<0.000000e+00> : vector<8x32xf32>
    %476 = tpu.matmul %474, %475, %cst_174 {dimension_numbers = #tpu.dot_dimension_numbers<[1], [0], [0], [1], [0, 0, 1, 1], [], []>} : vector<8x8xbf16>, vector<8x32xbf16>, vector<8x32xf32> -> vector<8x32xf32>
    %477 = arith.addf %452, %476 : vector<8x32xf32>
    %478 = arith.addf %360, %477 : vector<8x32xf32>
    %479 = vector.broadcast %355 : vector<1x32xf32> to vector<8x32xf32>
    %480 = arith.addf %478, %479 : vector<8x32xf32>
    %481 = arith.mulf %480, %480 : vector<8x32xf32>
    %cst_175 = arith.constant dense<0.000000e+00> : vector<8xf32>
    %482 = vector.multi_reduction <add>, %481, %cst_175 [1] : vector<8x32xf32> to vector<8xf32>
    %483 = vector.shape_cast %482 : vector<8xf32> to vector<8x1xf32>
    %cst_176 = arith.constant 3.200000e+01 : f32
    %484 = vector.broadcast %cst_176 : f32 to vector<8x1xf32>
    %485 = arith.divf %483, %484 : vector<8x1xf32>
    %cst_177 = arith.constant 9.99999997E-7 : f32
    %486 = vector.broadcast %cst_177 : f32 to vector<8x1xf32>
    %487 = arith.addf %485, %486 : vector<8x1xf32>
    %488 = math.rsqrt %487 : vector<8x1xf32>
    %489 = vector.broadcast %488 : vector<8x1xf32> to vector<8x32xf32>
    %490 = arith.mulf %480, %489 : vector<8x32xf32>
    %491 = vector.broadcast %343 : vector<1x32xf32> to vector<8x32xf32>
    %492 = arith.mulf %490, %491 : vector<8x32xf32>
    %493 = vector.extract_strided_slice %339 {offsets = [8, 0], sizes = [8, 32], strides = [1, 1]} : vector<16x32xf32> to vector<8x32xf32>
    %494 = arith.mulf %493, %493 : vector<8x32xf32>
    %cst_178 = arith.constant dense<0.000000e+00> : vector<8xf32>
    %495 = vector.multi_reduction <add>, %494, %cst_178 [1] : vector<8x32xf32> to vector<8xf32>
    %496 = vector.shape_cast %495 : vector<8xf32> to vector<8x1xf32>
    %cst_179 = arith.constant 3.200000e+01 : f32
    %497 = vector.broadcast %cst_179 : f32 to vector<8x1xf32>
    %498 = arith.divf %496, %497 : vector<8x1xf32>
    %cst_180 = arith.constant 9.99999997E-7 : f32
    %499 = vector.broadcast %cst_180 : f32 to vector<8x1xf32>
    %500 = arith.addf %498, %499 : vector<8x1xf32>
    %501 = math.rsqrt %500 : vector<8x1xf32>
    %502 = vector.broadcast %501 : vector<8x1xf32> to vector<8x32xf32>
    %503 = arith.mulf %493, %502 : vector<8x32xf32>
    %504 = vector.broadcast %341 : vector<1x32xf32> to vector<8x32xf32>
    %505 = arith.mulf %503, %504 : vector<8x32xf32>
    %506 = arith.truncf %505 : vector<8x32xf32> to vector<8x32xbf16>
    %cst_181 = arith.constant dense<0.000000e+00> : vector<8x96xf32>
    %507 = tpu.matmul %506, %349, %cst_181 {dimension_numbers = #tpu.dot_dimension_numbers<[1], [0], [0], [1], [0, 0, 1, 1], [], []>} : vector<8x32xbf16>, vector<32x96xbf16>, vector<8x96xf32> -> vector<8x96xf32>
    %508 = vector.broadcast %351 : vector<1x96xf32> to vector<8x96xf32>
    %509 = arith.addf %507, %508 : vector<8x96xf32>
    %cst_182 = arith.constant 0.000000e+00 : f32
    %510 = vector.broadcast %cst_182 : f32 to vector<8x32xf32>
    %511 = vector.extract_strided_slice %509 {offsets = [0, 0], sizes = [8, 8], strides = [1, 1]} : vector<8x96xf32> to vector<8x8xf32>
    %512 = arith.truncf %511 : vector<8x8xf32> to vector<8x8xbf16>
    %513 = vector.extract_strided_slice %509 {offsets = [0, 32], sizes = [8, 8], strides = [1, 1]} : vector<8x96xf32> to vector<8x8xf32>
    %514 = arith.truncf %513 : vector<8x8xf32> to vector<8x8xbf16>
    %515 = vector.extract_strided_slice %509 {offsets = [0, 64], sizes = [8, 8], strides = [1, 1]} : vector<8x96xf32> to vector<8x8xf32>
    %516 = arith.truncf %515 : vector<8x8xf32> to vector<8x8xbf16>
    %cst_183 = arith.constant dense<0.000000e+00> : vector<8x8xf32>
    %517 = tpu.matmul %512, %514, %cst_183 {dimension_numbers = #tpu.dot_dimension_numbers<[1], [1], [0], [0], [0, 0, 1, 0], [], []>} : vector<8x8xbf16>, vector<8x8xbf16>, vector<8x8xf32> -> vector<8x8xf32>
    %cst_184 = arith.constant 0.353553385 : f32
    %518 = vector.broadcast %cst_184 : f32 to vector<8x8xf32>
    %519 = arith.mulf %517, %518 : vector<8x8xf32>
    %cst_185 = arith.constant dense<0xFF800000> : vector<8xf32>
    %520 = vector.multi_reduction <maximumf>, %519, %cst_185 [1] : vector<8x8xf32> to vector<8xf32>
    %521 = vector.shape_cast %520 : vector<8xf32> to vector<8x1xf32>
    %522 = vector.broadcast %521 : vector<8x1xf32> to vector<8x8xf32>
    %523 = arith.subf %519, %522 : vector<8x8xf32>
    %524 = math.exp %523 : vector<8x8xf32>
    %cst_186 = arith.constant dense<0.000000e+00> : vector<8xf32>
    %525 = vector.multi_reduction <add>, %524, %cst_186 [1] : vector<8x8xf32> to vector<8xf32>
    %526 = vector.shape_cast %525 : vector<8xf32> to vector<8x1xf32>
    %527 = tpu.reciprocal %526 {approx = true} : vector<8x1xf32> -> vector<8x1xf32>
    %528 = vector.broadcast %527 : vector<8x1xf32> to vector<8x8xf32>
    %529 = arith.mulf %524, %528 : vector<8x8xf32>
    %530 = arith.truncf %529 : vector<8x8xf32> to vector<8x8xbf16>
    %cst_187 = arith.constant dense<0.000000e+00> : vector<8x8xf32>
    %531 = tpu.matmul %530, %516, %cst_187 {dimension_numbers = #tpu.dot_dimension_numbers<[1], [0], [0], [1], [0, 0, 1, 1], [], []>} : vector<8x8xbf16>, vector<8x8xbf16>, vector<8x8xf32> -> vector<8x8xf32>
    %532 = arith.truncf %531 : vector<8x8xf32> to vector<8x8xbf16>
    %533 = vector.extract_strided_slice %353 {offsets = [0, 0], sizes = [8, 32], strides = [1, 1]} : vector<32x32xbf16> to vector<8x32xbf16>
    %cst_188 = arith.constant dense<0.000000e+00> : vector<8x32xf32>
    %534 = tpu.matmul %532, %533, %cst_188 {dimension_numbers = #tpu.dot_dimension_numbers<[1], [0], [0], [1], [0, 0, 1, 1], [], []>} : vector<8x8xbf16>, vector<8x32xbf16>, vector<8x32xf32> -> vector<8x32xf32>
    %535 = arith.addf %510, %534 : vector<8x32xf32>
    %536 = vector.extract_strided_slice %509 {offsets = [0, 8], sizes = [8, 8], strides = [1, 1]} : vector<8x96xf32> to vector<8x8xf32>
    %537 = arith.truncf %536 : vector<8x8xf32> to vector<8x8xbf16>
    %538 = vector.extract_strided_slice %509 {offsets = [0, 40], sizes = [8, 8], strides = [1, 1]} : vector<8x96xf32> to vector<8x8xf32>
    %539 = arith.truncf %538 : vector<8x8xf32> to vector<8x8xbf16>
    %540 = vector.extract_strided_slice %509 {offsets = [0, 72], sizes = [8, 8], strides = [1, 1]} : vector<8x96xf32> to vector<8x8xf32>
    %541 = arith.truncf %540 : vector<8x8xf32> to vector<8x8xbf16>
    %cst_189 = arith.constant dense<0.000000e+00> : vector<8x8xf32>
    %542 = tpu.matmul %537, %539, %cst_189 {dimension_numbers = #tpu.dot_dimension_numbers<[1], [1], [0], [0], [0, 0, 1, 0], [], []>} : vector<8x8xbf16>, vector<8x8xbf16>, vector<8x8xf32> -> vector<8x8xf32>
    %cst_190 = arith.constant 0.353553385 : f32
    %543 = vector.broadcast %cst_190 : f32 to vector<8x8xf32>
    %544 = arith.mulf %542, %543 : vector<8x8xf32>
    %cst_191 = arith.constant dense<0xFF800000> : vector<8xf32>
    %545 = vector.multi_reduction <maximumf>, %544, %cst_191 [1] : vector<8x8xf32> to vector<8xf32>
    %546 = vector.shape_cast %545 : vector<8xf32> to vector<8x1xf32>
    %547 = vector.broadcast %546 : vector<8x1xf32> to vector<8x8xf32>
    %548 = arith.subf %544, %547 : vector<8x8xf32>
    %549 = math.exp %548 : vector<8x8xf32>
    %cst_192 = arith.constant dense<0.000000e+00> : vector<8xf32>
    %550 = vector.multi_reduction <add>, %549, %cst_192 [1] : vector<8x8xf32> to vector<8xf32>
    %551 = vector.shape_cast %550 : vector<8xf32> to vector<8x1xf32>
    %552 = tpu.reciprocal %551 {approx = true} : vector<8x1xf32> -> vector<8x1xf32>
    %553 = vector.broadcast %552 : vector<8x1xf32> to vector<8x8xf32>
    %554 = arith.mulf %549, %553 : vector<8x8xf32>
    %555 = arith.truncf %554 : vector<8x8xf32> to vector<8x8xbf16>
    %cst_193 = arith.constant dense<0.000000e+00> : vector<8x8xf32>
    %556 = tpu.matmul %555, %541, %cst_193 {dimension_numbers = #tpu.dot_dimension_numbers<[1], [0], [0], [1], [0, 0, 1, 1], [], []>} : vector<8x8xbf16>, vector<8x8xbf16>, vector<8x8xf32> -> vector<8x8xf32>
    %557 = arith.truncf %556 : vector<8x8xf32> to vector<8x8xbf16>
    %558 = vector.extract_strided_slice %353 {offsets = [8, 0], sizes = [8, 32], strides = [1, 1]} : vector<32x32xbf16> to vector<8x32xbf16>
    %cst_194 = arith.constant dense<0.000000e+00> : vector<8x32xf32>
    %559 = tpu.matmul %557, %558, %cst_194 {dimension_numbers = #tpu.dot_dimension_numbers<[1], [0], [0], [1], [0, 0, 1, 1], [], []>} : vector<8x8xbf16>, vector<8x32xbf16>, vector<8x32xf32> -> vector<8x32xf32>
    %560 = arith.addf %535, %559 : vector<8x32xf32>
    %561 = vector.extract_strided_slice %509 {offsets = [0, 16], sizes = [8, 8], strides = [1, 1]} : vector<8x96xf32> to vector<8x8xf32>
    %562 = arith.truncf %561 : vector<8x8xf32> to vector<8x8xbf16>
    %563 = vector.extract_strided_slice %509 {offsets = [0, 48], sizes = [8, 8], strides = [1, 1]} : vector<8x96xf32> to vector<8x8xf32>
    %564 = arith.truncf %563 : vector<8x8xf32> to vector<8x8xbf16>
    %565 = vector.extract_strided_slice %509 {offsets = [0, 80], sizes = [8, 8], strides = [1, 1]} : vector<8x96xf32> to vector<8x8xf32>
    %566 = arith.truncf %565 : vector<8x8xf32> to vector<8x8xbf16>
    %cst_195 = arith.constant dense<0.000000e+00> : vector<8x8xf32>
    %567 = tpu.matmul %562, %564, %cst_195 {dimension_numbers = #tpu.dot_dimension_numbers<[1], [1], [0], [0], [0, 0, 1, 0], [], []>} : vector<8x8xbf16>, vector<8x8xbf16>, vector<8x8xf32> -> vector<8x8xf32>
    %cst_196 = arith.constant 0.353553385 : f32
    %568 = vector.broadcast %cst_196 : f32 to vector<8x8xf32>
    %569 = arith.mulf %567, %568 : vector<8x8xf32>
    %cst_197 = arith.constant dense<0xFF800000> : vector<8xf32>
    %570 = vector.multi_reduction <maximumf>, %569, %cst_197 [1] : vector<8x8xf32> to vector<8xf32>
    %571 = vector.shape_cast %570 : vector<8xf32> to vector<8x1xf32>
    %572 = vector.broadcast %571 : vector<8x1xf32> to vector<8x8xf32>
    %573 = arith.subf %569, %572 : vector<8x8xf32>
    %574 = math.exp %573 : vector<8x8xf32>
    %cst_198 = arith.constant dense<0.000000e+00> : vector<8xf32>
    %575 = vector.multi_reduction <add>, %574, %cst_198 [1] : vector<8x8xf32> to vector<8xf32>
    %576 = vector.shape_cast %575 : vector<8xf32> to vector<8x1xf32>
    %577 = tpu.reciprocal %576 {approx = true} : vector<8x1xf32> -> vector<8x1xf32>
    %578 = vector.broadcast %577 : vector<8x1xf32> to vector<8x8xf32>
    %579 = arith.mulf %574, %578 : vector<8x8xf32>
    %580 = arith.truncf %579 : vector<8x8xf32> to vector<8x8xbf16>
    %cst_199 = arith.constant dense<0.000000e+00> : vector<8x8xf32>
    %581 = tpu.matmul %580, %566, %cst_199 {dimension_numbers = #tpu.dot_dimension_numbers<[1], [0], [0], [1], [0, 0, 1, 1], [], []>} : vector<8x8xbf16>, vector<8x8xbf16>, vector<8x8xf32> -> vector<8x8xf32>
    %582 = arith.truncf %581 : vector<8x8xf32> to vector<8x8xbf16>
    %583 = vector.extract_strided_slice %353 {offsets = [16, 0], sizes = [8, 32], strides = [1, 1]} : vector<32x32xbf16> to vector<8x32xbf16>
    %cst_200 = arith.constant dense<0.000000e+00> : vector<8x32xf32>
    %584 = tpu.matmul %582, %583, %cst_200 {dimension_numbers = #tpu.dot_dimension_numbers<[1], [0], [0], [1], [0, 0, 1, 1], [], []>} : vector<8x8xbf16>, vector<8x32xbf16>, vector<8x32xf32> -> vector<8x32xf32>
    %585 = arith.addf %560, %584 : vector<8x32xf32>
    %586 = vector.extract_strided_slice %509 {offsets = [0, 24], sizes = [8, 8], strides = [1, 1]} : vector<8x96xf32> to vector<8x8xf32>
    %587 = arith.truncf %586 : vector<8x8xf32> to vector<8x8xbf16>
    %588 = vector.extract_strided_slice %509 {offsets = [0, 56], sizes = [8, 8], strides = [1, 1]} : vector<8x96xf32> to vector<8x8xf32>
    %589 = arith.truncf %588 : vector<8x8xf32> to vector<8x8xbf16>
    %590 = vector.extract_strided_slice %509 {offsets = [0, 88], sizes = [8, 8], strides = [1, 1]} : vector<8x96xf32> to vector<8x8xf32>
    %591 = arith.truncf %590 : vector<8x8xf32> to vector<8x8xbf16>
    %cst_201 = arith.constant dense<0.000000e+00> : vector<8x8xf32>
    %592 = tpu.matmul %587, %589, %cst_201 {dimension_numbers = #tpu.dot_dimension_numbers<[1], [1], [0], [0], [0, 0, 1, 0], [], []>} : vector<8x8xbf16>, vector<8x8xbf16>, vector<8x8xf32> -> vector<8x8xf32>
    %cst_202 = arith.constant 0.353553385 : f32
    %593 = vector.broadcast %cst_202 : f32 to vector<8x8xf32>
    %594 = arith.mulf %592, %593 : vector<8x8xf32>
    %cst_203 = arith.constant dense<0xFF800000> : vector<8xf32>
    %595 = vector.multi_reduction <maximumf>, %594, %cst_203 [1] : vector<8x8xf32> to vector<8xf32>
    %596 = vector.shape_cast %595 : vector<8xf32> to vector<8x1xf32>
    %597 = vector.broadcast %596 : vector<8x1xf32> to vector<8x8xf32>
    %598 = arith.subf %594, %597 : vector<8x8xf32>
    %599 = math.exp %598 : vector<8x8xf32>
    %cst_204 = arith.constant dense<0.000000e+00> : vector<8xf32>
    %600 = vector.multi_reduction <add>, %599, %cst_204 [1] : vector<8x8xf32> to vector<8xf32>
    %601 = vector.shape_cast %600 : vector<8xf32> to vector<8x1xf32>
    %602 = tpu.reciprocal %601 {approx = true} : vector<8x1xf32> -> vector<8x1xf32>
    %603 = vector.broadcast %602 : vector<8x1xf32> to vector<8x8xf32>
    %604 = arith.mulf %599, %603 : vector<8x8xf32>
    %605 = arith.truncf %604 : vector<8x8xf32> to vector<8x8xbf16>
    %cst_205 = arith.constant dense<0.000000e+00> : vector<8x8xf32>
    %606 = tpu.matmul %605, %591, %cst_205 {dimension_numbers = #tpu.dot_dimension_numbers<[1], [0], [0], [1], [0, 0, 1, 1], [], []>} : vector<8x8xbf16>, vector<8x8xbf16>, vector<8x8xf32> -> vector<8x8xf32>
    %607 = arith.truncf %606 : vector<8x8xf32> to vector<8x8xbf16>
    %608 = vector.extract_strided_slice %353 {offsets = [24, 0], sizes = [8, 32], strides = [1, 1]} : vector<32x32xbf16> to vector<8x32xbf16>
    %cst_206 = arith.constant dense<0.000000e+00> : vector<8x32xf32>
    %609 = tpu.matmul %607, %608, %cst_206 {dimension_numbers = #tpu.dot_dimension_numbers<[1], [0], [0], [1], [0, 0, 1, 1], [], []>} : vector<8x8xbf16>, vector<8x32xbf16>, vector<8x32xf32> -> vector<8x32xf32>
    %610 = arith.addf %585, %609 : vector<8x32xf32>
    %611 = arith.addf %493, %610 : vector<8x32xf32>
    %612 = vector.broadcast %355 : vector<1x32xf32> to vector<8x32xf32>
    %613 = arith.addf %611, %612 : vector<8x32xf32>
    %614 = arith.mulf %613, %613 : vector<8x32xf32>
    %cst_207 = arith.constant dense<0.000000e+00> : vector<8xf32>
    %615 = vector.multi_reduction <add>, %614, %cst_207 [1] : vector<8x32xf32> to vector<8xf32>
    %616 = vector.shape_cast %615 : vector<8xf32> to vector<8x1xf32>
    %cst_208 = arith.constant 3.200000e+01 : f32
    %617 = vector.broadcast %cst_208 : f32 to vector<8x1xf32>
    %618 = arith.divf %616, %617 : vector<8x1xf32>
    %cst_209 = arith.constant 9.99999997E-7 : f32
    %619 = vector.broadcast %cst_209 : f32 to vector<8x1xf32>
    %620 = arith.addf %618, %619 : vector<8x1xf32>
    %621 = math.rsqrt %620 : vector<8x1xf32>
    %622 = vector.broadcast %621 : vector<8x1xf32> to vector<8x32xf32>
    %623 = arith.mulf %613, %622 : vector<8x32xf32>
    %624 = vector.broadcast %343 : vector<1x32xf32> to vector<8x32xf32>
    %625 = arith.mulf %623, %624 : vector<8x32xf32>
    %626 = tpu.concatenate %492, %625 in 0 : vector<8x32xf32>, vector<8x32xf32> -> vector<16x32xf32>
    %627 = arith.mulf %626, %626 : vector<16x32xf32>
    %cst_210 = arith.constant dense<0.000000e+00> : vector<16xf32>
    %628 = vector.multi_reduction <add>, %627, %cst_210 [1] : vector<16x32xf32> to vector<16xf32>
    %629 = vector.shape_cast %628 : vector<16xf32> to vector<16x1xf32>
    %cst_211 = arith.constant 3.200000e+01 : f32
    %630 = vector.broadcast %cst_211 : f32 to vector<16x1xf32>
    %631 = arith.divf %629, %630 : vector<16x1xf32>
    %cst_212 = arith.constant 9.99999997E-7 : f32
    %632 = vector.broadcast %cst_212 : f32 to vector<16x1xf32>
    %633 = arith.addf %631, %632 : vector<16x1xf32>
    %634 = math.rsqrt %633 : vector<16x1xf32>
    %635 = vector.broadcast %634 : vector<16x1xf32> to vector<16x32xf32>
    %636 = arith.mulf %626, %635 : vector<16x32xf32>
    %637 = vector.broadcast %345 : vector<1x32xf32> to vector<16x32xf32>
    %638 = arith.mulf %636, %637 : vector<16x32xf32>
    %639 = arith.truncf %638 : vector<16x32xf32> to vector<16x32xbf16>
    %cst_213 = arith.constant dense<0.000000e+00> : vector<16x128xf32>
    %640 = tpu.matmul %639, %357, %cst_213 {dimension_numbers = #tpu.dot_dimension_numbers<[1], [0], [0], [1], [0, 0, 1, 1], [], []>} : vector<16x32xbf16>, vector<32x128xbf16>, vector<16x128xf32> -> vector<16x128xf32>
    %641 = vector.extract_strided_slice %640 {offsets = [0, 0], sizes = [16, 64], strides = [1, 1]} : vector<16x128xf32> to vector<16x64xf32>
    %642 = vector.extract_strided_slice %640 {offsets = [0, 64], sizes = [16, 64], strides = [1, 1]} : vector<16x128xf32> to vector<16x64xf32>
    %643 = arith.negf %641 : vector<16x64xf32>
    %644 = math.exp %643 : vector<16x64xf32>
    %cst_214 = arith.constant 1.000000e+00 : f32
    %645 = vector.broadcast %cst_214 : f32 to vector<16x64xf32>
    %646 = arith.addf %645, %644 : vector<16x64xf32>
    %647 = arith.divf %645, %646 : vector<16x64xf32>
    %648 = arith.mulf %641, %647 : vector<16x64xf32>
    %649 = arith.mulf %648, %642 : vector<16x64xf32>
    %650 = arith.truncf %649 : vector<16x64xf32> to vector<16x64xbf16>
    %cst_215 = arith.constant dense<0.000000e+00> : vector<16x32xf32>
    %651 = tpu.matmul %650, %359, %cst_215 {dimension_numbers = #tpu.dot_dimension_numbers<[1], [0], [0], [1], [0, 0, 1, 1], [], []>} : vector<16x64xbf16>, vector<64x32xbf16>, vector<16x32xf32> -> vector<16x32xf32>
    %652 = arith.addf %626, %651 : vector<16x32xf32>
    %653 = arith.mulf %652, %652 : vector<16x32xf32>
    %cst_216 = arith.constant dense<0.000000e+00> : vector<16xf32>
    %654 = vector.multi_reduction <add>, %653, %cst_216 [1] : vector<16x32xf32> to vector<16xf32>
    %655 = vector.shape_cast %654 : vector<16xf32> to vector<16x1xf32>
    %cst_217 = arith.constant 3.200000e+01 : f32
    %656 = vector.broadcast %cst_217 : f32 to vector<16x1xf32>
    %657 = arith.divf %655, %656 : vector<16x1xf32>
    %cst_218 = arith.constant 9.99999997E-7 : f32
    %658 = vector.broadcast %cst_218 : f32 to vector<16x1xf32>
    %659 = arith.addf %657, %658 : vector<16x1xf32>
    %660 = math.rsqrt %659 : vector<16x1xf32>
    %661 = vector.broadcast %660 : vector<16x1xf32> to vector<16x32xf32>
    %662 = arith.mulf %652, %661 : vector<16x32xf32>
    %663 = vector.broadcast %347 : vector<1x32xf32> to vector<16x32xf32>
    %664 = arith.mulf %662, %663 : vector<16x32xf32>
    %c0_219 = arith.constant 0 : index
    %c0_220 = arith.constant 0 : index
    %665 = vector.load %arg18[%c0_219, %c0_220] : memref<16x32xf32, #tpu.memory_space<vmem>>, vector<16x32xf32>
    tpu.vector_store %arg18[%c0_219, %c0_220], %664 {strides = array<i32>} : memref<16x32xf32, #tpu.memory_space<vmem>>, vector<16x32xf32>,
    %c2_i32 = arith.constant 2 : i32
    %666 = arith.cmpi eq, %arg0, %c2_i32 : i32
    %667 = arith.extui %666 : i1 to i32
    %c0_i32_221 = arith.constant 0 : i32
    %668 = arith.cmpi ne, %667, %c0_i32_221 : i32
    scf.if %668 {
      %c0_222 = arith.constant 0 : index
      %c0_223 = arith.constant 0 : index
      %669 = vector.load %arg15[%c0_222, %c0_223] : memref<1x32xf32, #tpu.memory_space<vmem>>, vector<1x32xf32>
      %670 = arith.mulf %664, %664 : vector<16x32xf32>
      %cst_224 = arith.constant dense<0.000000e+00> : vector<16xf32>
      %671 = vector.multi_reduction <add>, %670, %cst_224 [1] : vector<16x32xf32> to vector<16xf32>
      %672 = vector.shape_cast %671 : vector<16xf32> to vector<16x1xf32>
      %cst_225 = arith.constant 3.200000e+01 : f32
      %673 = vector.broadcast %cst_225 : f32 to vector<16x1xf32>
      %674 = arith.divf %672, %673 : vector<16x1xf32>
      %cst_226 = arith.constant 9.99999997E-7 : f32
      %675 = vector.broadcast %cst_226 : f32 to vector<16x1xf32>
      %676 = arith.addf %674, %675 : vector<16x1xf32>
      %677 = math.rsqrt %676 : vector<16x1xf32>
      %678 = vector.broadcast %677 : vector<16x1xf32> to vector<16x32xf32>
      %679 = arith.mulf %664, %678 : vector<16x32xf32>
      %680 = vector.broadcast %669 : vector<1x32xf32> to vector<16x32xf32>
      %681 = arith.mulf %679, %680 : vector<16x32xf32>
      %c0_227 = arith.constant 0 : index
      %c0_228 = arith.constant 0 : index
      %682 = vector.load %arg17[%c0_227, %c0_228] : memref<16x32xf32, #tpu.memory_space<vmem>>, vector<16x32xf32>
      tpu.vector_store %arg17[%c0_227, %c0_228], %681 {strides = array<i32>} : memref<16x32xf32, #tpu.memory_space<vmem>>, vector<16x32xf32>,
    } else {
    }
    return
  }
  func.func @transform_0(%arg0: i32) -> (i32, i32) {
    %c0_i32 = arith.constant 0 : i32
    %c0_i32_0 = arith.constant 0 : i32
    %c0_i32_1 = arith.constant 0 : i32
    return %c0_i32, %c0_i32_0 : i32, i32
  }
  func.func @transform_1(%arg0: i32) -> (i32, i32) {
    %c0_i32 = arith.constant 0 : i32
    %c0_i32_0 = arith.constant 0 : i32
    %c0_i32_1 = arith.constant 0 : i32
    return %c0_i32, %c0_i32_0 : i32, i32
  }
  func.func @transform_2(%arg0: i32) -> (i32, i32) {
    %c0_i32 = arith.constant 0 : i32
    %c0_i32_0 = arith.constant 0 : i32
    %c0_i32_1 = arith.constant 0 : i32
    return %c0_i32, %c0_i32_0 : i32, i32
  }
  func.func @transform_3(%arg0: i32) -> (i32, i32) {
    %c0_i32 = arith.constant 0 : i32
    %c0_i32_0 = arith.constant 0 : i32
    %c0_i32_1 = arith.constant 0 : i32
    return %c0_i32, %c0_i32_0 : i32, i32
  }
  func.func @transform_4(%arg0: i32) -> (i32, i32, i32) {
    %c0_i32 = arith.constant 0 : i32
    %c0_i32_0 = arith.constant 0 : i32
    %c0_i32_1 = arith.constant 0 : i32
    %c0_i32_2 = arith.constant 0 : i32
    return %c0_i32, %c0_i32_0, %c0_i32_1 : i32, i32, i32
  }
  func.func @transform_5(%arg0: i32) -> (i32, i32, i32) {
    %c0_i32 = arith.constant 0 : i32
    %c0_i32_0 = arith.constant 0 : i32
    %c0_i32_1 = arith.constant 0 : i32
    %c0_i32_2 = arith.constant 0 : i32
    return %c0_i32, %c0_i32_0, %c0_i32_1 : i32, i32, i32
  }
  func.func @transform_6(%arg0: i32) -> (i32, i32, i32) {
    %c0_i32 = arith.constant 0 : i32
    %c0_i32_0 = arith.constant 0 : i32
    %c0_i32_1 = arith.constant 0 : i32
    %c0_i32_2 = arith.constant 0 : i32
    return %c0_i32, %c0_i32_0, %c0_i32_1 : i32, i32, i32
  }
  func.func @transform_7(%arg0: i32) -> (i32, i32, i32) {
    %c0_i32 = arith.constant 0 : i32
    %c0_i32_0 = arith.constant 0 : i32
    %c0_i32_1 = arith.constant 0 : i32
    %c0_i32_2 = arith.constant 0 : i32
    return %c0_i32, %c0_i32_0, %c0_i32_1 : i32, i32, i32
  }
  func.func @transform_8(%arg0: i32) -> (i32, i32, i32) {
    %c0_i32 = arith.constant 0 : i32
    %c0_i32_0 = arith.constant 0 : i32
    %c0_i32_1 = arith.constant 0 : i32
    %c0_i32_2 = arith.constant 0 : i32
    return %c0_i32, %c0_i32_0, %c0_i32_1 : i32, i32, i32
  }
  func.func @transform_9(%arg0: i32) -> (i32, i32, i32) {
    %c0_i32 = arith.constant 0 : i32
    %c0_i32_0 = arith.constant 0 : i32
    %c0_i32_1 = arith.constant 0 : i32
    %c0_i32_2 = arith.constant 0 : i32
    return %c0_i32, %c0_i32_0, %c0_i32_1 : i32, i32, i32
  }
  func.func @transform_10(%arg0: i32) -> (i32, i32, i32) {
    %c0_i32 = arith.constant 0 : i32
    %c0_i32_0 = arith.constant 0 : i32
    %c0_i32_1 = arith.constant 0 : i32
    %c0_i32_2 = arith.constant 0 : i32
    return %c0_i32, %c0_i32_0, %c0_i32_1 : i32, i32, i32
  }
  func.func @transform_11(%arg0: i32) -> (i32, i32, i32) {
    %c0_i32 = arith.constant 0 : i32
    %c0_i32_0 = arith.constant 0 : i32
    %c0_i32_1 = arith.constant 0 : i32
    %c0_i32_2 = arith.constant 0 : i32
    return %c0_i32, %c0_i32_0, %c0_i32_1 : i32, i32, i32
  }
  func.func @transform_12(%arg0: i32) -> (i32, i32, i32) {
    %c0_i32 = arith.constant 0 : i32
    %c0_i32_0 = arith.constant 0 : i32
    %c0_i32_1 = arith.constant 0 : i32
    %c0_i32_2 = arith.constant 0 : i32
    return %c0_i32, %c0_i32_0, %c0_i32_1 : i32, i32, i32
  }
  func.func @transform_13(%arg0: i32) -> (i32, i32, i32) {
    %c0_i32 = arith.constant 0 : i32
    %c0_i32_0 = arith.constant 0 : i32
    %c0_i32_1 = arith.constant 0 : i32
    %c0_i32_2 = arith.constant 0 : i32
    return %c0_i32, %c0_i32_0, %c0_i32_1 : i32, i32, i32
  }
  func.func @transform_14(%arg0: i32) -> (i32, i32) {
    %c0_i32 = arith.constant 0 : i32
    %c0_i32_0 = arith.constant 0 : i32
    %c0_i32_1 = arith.constant 0 : i32
    return %c0_i32, %c0_i32_0 : i32, i32
  }
  func.func @transform_15(%arg0: i32) -> (i32, i32, i32) {
    %c0_i32 = arith.constant 0 : i32
    %c0_i32_0 = arith.constant 0 : i32
    %c0_i32_1 = arith.constant 0 : i32
    return %arg0, %c0_i32, %c0_i32_0 : i32, i32, i32
  }
  func.func @transform_16(%arg0: i32) -> (i32, i32) {
    %c0_i32 = arith.constant 0 : i32
    %c0_i32_0 = arith.constant 0 : i32
    %c0_i32_1 = arith.constant 0 : i32
    return %c0_i32, %c0_i32_0 : i32, i32
  }
}

</mosaic_0001>

<bundles_post_ra>
// kernel: recurrent_depth_forward.1
= control target key start
LH: loop header
LB: loop body
LE: loop exit
PB: predicated region body
PF: predicated region fallthrough
CT: control target
= control target key end

     0   :  { %s6005_s0 = inlined_call_operand.vmem [shape: bf16[16,32], index: 0, kind: input, shape index: {}]   ;;  %s6006_s1 = inlined_call_operand.hbm [shape: f32[16,32], index: 1, kind: input, shape index: {}]   ;;  %s6007_s2 = inlined_call_operand.hbm [shape: bf16[32,32], index: 2, kind: input, shape index: {}]   ;;  %s6008_s3 = inlined_call_operand.hbm [shape: bf16[32,32], index: 3, kind: input, shape index: {}]   ;;  %s6009_s4 = inlined_call_operand.vmem [shape: f32[2,1,32], index: 4, kind: input, shape index: {}]   ;;  %s6010_s5 = inlined_call_operand.vmem [shape: bf16[2,32,96], index: 5, kind: input, shape index: {}]   ;;  %s6011_s6 = inlined_call_operand.vmem [shape: f32[2,1,96], index: 6, kind: input, shape index: {}]   ;;  %s6012_s7 = inlined_call_operand.vmem [shape: bf16[2,32,32], index: 7, kind: input, shape index: {}]   ;;  %s6013_s8 = inlined_call_operand.vmem [shape: f32[2,1,32], index: 8, kind: input, shape index: {}]   ;;  %s6014_s9 = inlined_call_operand.vmem [shape: f32[2,1,32], index: 9, kind: input, shape index: {}]   ;;  %s6015_s10 = inlined_call_operand.vmem [shape: f32[2,1,32], index: 10, kind: input, shape index: {}]   ;;  %s6016_s11 = inlined_call_operand.vmem [shape: bf16[2,32,128], index: 11, kind: input, shape index: {}]   ;;  %s6017_s12 = inlined_call_operand.vmem [shape: bf16[2,64,32], index: 12, kind: input, shape index: {}]   ;;  %s6018_s13 = inlined_call_operand.vmem [shape: f32[2,1,32], index: 13, kind: input, shape index: {}]   ;;  %s6019_s14 = inlined_call_operand.vmem [shape: f32[1,32], index: 14, kind: input, shape index: {}]   ;;  %s6020_s15 = inlined_call_operand.vmem [shape: f32[3,16,32], index: 15, kind: output, shape index: {0}]   ;;  %s6021_s16 = inlined_call_operand.hbm [shape: f32[16,32], index: 16, kind: output, shape index: {1}]  }
   0x1   :  { %6038 = sst [smem:[#allocation13_spill]] %s6005_s0 }
   0x2   :  { %22 = vsyncpa [#allocation4], 0 }
   0x3   :  { %23 = vsyncpa [#allocation7], 0 }
   0x4   :  { %24 = vsyncpa [#allocation5], 0  ;;  %s5208_s21 = smov 0  }
   0x5 LB: > { %s5100_s22 = smov [#allocation6]   ;;  %s5214_s24 = sadd.s32 4294967295, %s5098_s21   ;;  %s5098_s21 = sphi %s5208_s21, %s30_s21  }
   0x6   : > { %s425_s23 = sshll.u32 %s5100_s22, 4  ;;  %p4131_p0 = scmp.ge.s32.totalorder %s5098_s21, 1  ;;  %s426_s23 = int_to_ptr.vmem [resolvable:$true] %s425_s23 }
   0x7   : > { %p397_p1 = scmp.lt.s32.totalorder %s5098_s21, 4  ;;  %p4132_p2 = scmp.ne.s32.totalorder %s5214_s24, 0 }
   0x8   : > { %p4802_p3 = scmp.eq.s32.totalorder %s5214_s24, 0  ;;  %s5101_s26 = smov [#allocation3]  }
   0x9   : > { %p5220_p4 = pnand %p4131_p0, %p397_p1  ;;  %s412_s27 = sshll.u32 %s5101_s26, 4  ;;  %s5226_s27 = int_to_ptr.vmem [resolvable:$true] %s412_s27 }
   0xa   : > { %s5102_s29 = smov [#allocation8]   ;;  %s4989_s0 = scalar_lea.vmem %s426_s23, 256 }
   0xb   : > { %p4792_p5 = pneg %p5220_p4  ;;  %s5234_s30 = sshll.u32 %s5102_s29, 4  ;;  %s439_s30 = int_to_ptr.vmem [resolvable:$true] %s5234_s30 }
   0xc   : > { %p4990_p8 = scmp.ne.s32.totalorder %s426_s23, %s4989_s0  ;;  %p4997_p11 = scmp.lt.s32.totalorder %s426_s23, %s426_s23 }
   0xd   : > { %p5230_p6 = pnand %p4802_p3, %p4792_p5  ;;  %p4998_p12 = scmp.lt.s32.totalorder %s4989_s0, %s4989_s0 }
   0xf   : > { %p4980_p7 = pneg %p5230_p6  ;;  %p4999_p13 = por %p4998_p12, %p4997_p11 }
  0x11   : > { %p4992_p9 = pnand %p4990_p8, %p4980_p7 }
  0x13   : > { %p4993_p10 = pneg %p4992_p9 }
  0x15   : > { %p5000_p0 = pnand %p4999_p13, %p4993_p10 }
  0x17   : > { %5003 = shalt.err (!%p5000_p0)
}
  0x18   : > { %s5103_s17 = smov 64   ;;  %s5104_s18 = smov 4  }
  0x19   : > { %4798 = dma.hbm_to_vmem [thread:$0]  (!%p5230_p6), %s6007_s2, 256, %s426_s23, [#allocation7], %s5103_s17, %s5103_s17, %s5104_s18  }
  0x1a   : > { %s5015_s22 = scalar_lea.vmem %s5226_s27, 256  ;;  %p5023_p9 = scmp.lt.s32.totalorder %s5226_s27, %s5226_s27 }
  0x1b   : > { %p5016_p1 = scmp.ne.s32.totalorder %s5226_s27, %s5015_s22  ;;  %p5024_p10 = scmp.lt.s32.totalorder %s5015_s22, %s5015_s22 }
  0x1d   : > { %p5018_p5 = pnand %p5016_p1, %p4980_p7  ;;  %p5025_p11 = por %p5024_p10, %p5023_p9 }
  0x1f   : > { %p5019_p8 = pneg %p5018_p5 }
  0x21   : > { %p5026_p12 = pnand %p5025_p11, %p5019_p8 }
  0x23   : > { %5029 = shalt.err (!%p5026_p12)
}
  0x24   : > { %s5105_s26 = smov 128   ;;  %s5106_s29 = smov 8  }
  0x25   : > { %4795 = dma.hbm_to_vmem [thread:$0]  (!%p5230_p6), %s6006_s1, 256, %s5226_s27, [#allocation4], %s5105_s26, %s5105_s26, %s5106_s29  }
  0x26   : > { %s5041_s19 = scalar_lea.vmem %s439_s30, 256  ;;  %p5049_p5 = scmp.lt.s32.totalorder %s439_s30, %s439_s30 }
  0x27   : > { %p5042_p13 = scmp.ne.s32.totalorder %s439_s30, %s5041_s19  ;;  %p5050_p8 = scmp.lt.s32.totalorder %s5041_s19, %s5041_s19 }
  0x29   : > { %p5044_p0 = pnand %p5042_p13, %p4980_p7  ;;  %p5051_p9 = por %p5050_p8, %p5049_p5 }
  0x2b   : > { %p5045_p1 = pneg %p5044_p0 }
  0x2d   : > { %p5052_p10 = pnand %p5051_p9, %p5045_p1 }
  0x2f   : > { %5055 = shalt.err (!%p5052_p10)
}
  0x30   : > { %4801 = dma.hbm_to_vmem [thread:$0]  (!%p5230_p6), %s6008_s3, 256, %s439_s30, [#allocation7], %s5103_s17, %s5103_s17, %s5104_s18  }
  0x31   : > { %487 = sbr.rel (%p5220_p4) target bundleno = 11868 (0x2e5c), region = 80 }
  0x36   : > { %5085 = dma.done.wait (%p4802_p3), [#allocation4], 256  }
  0x37   : > { %5087 = vsyncadd (%p4802_p3), [#allocation4], 4294967040 }
  0x38   : > { %5089 = dma.done.wait (%p4802_p3), [#allocation7], 512  }
  0x39   : > { %5091 = vsyncadd (%p4802_p3), [#allocation7], 4294966784  ;;  %p540_p7 = scmp.lt.s32.totalorder %s5214_s24, 2 }
  0x3a   : > { %549 = sbr.rel (%p4132_p2) target bundleno = 65 (0x41), region = 96 }
  0x3b   : > { %s541_s27 = scalar_select %p540_p7, %s5214_s24, 2 }
  0x3d   : > { %s4269_s28 = sshll.u32 %s541_s27, 4 }
  0x3e   : > { %s5283_s17 = scalar_lea.vmem %s6020_s15, %s4269_s28 }
  0x3f   : > { %v550_v0 = vld [vmem:[#allocation3] sm:$0xff]  ;;  %vm552_vm0 = vcmask 261120   ;;  %v551_v1 = vld [vmem:[#allocation3 + $0x8] sm:$0xff] }
  0x40   : > { %553 = vst.msk [vmem:[#allocation2] sm:$0xff] %vm552_vm0, %v550_v0  ;;  %554 = vst.msk [vmem:[#allocation2 + $0x8] sm:$0xff] %vm552_vm0, %v551_v1 }
  0x41 PF: > { %v4841_v2 = vld [vmem:[#allocation8 + $0x8] sm:$0xff]   ;;  %v5107_v3 = vmov 0.0   ;;  %v4842_v4 = vld [vmem:[#allocation8] sm:$0xff]   ;;  %vm5108_vm1 = vmmov 0   ;;  %vm557_vm2 = vcmask 261120   ;;  %s6041_s29 = sld [smem:[#allocation13_spill]] }
  0x42   : > { %4400 = vmatprep.subr.bf16.mxu1 %v5107_v3  ;;  %4416 = vmatprep.subr.bf16.mxu0 %v5107_v3  ;;  %v4844_v6 = vld [vmem:[#allocation6 + $0x8] sm:$0xff]   ;;  %v4845_v7 = vld [vmem:[#allocation6] sm:$0xff]   ;;  %s5109_s25 = smov 88   ;;  %s5110_s18 = smov 96   ;;  %vm798_vm3 = vcmask 64512   ;;  %vm863_vm4 = vcmask 1043456  }
  0x43   : > { %4401 = vmatpush3.bf16.msra.mxu1 %v4841_v2  ;;  %4404 = vmatprep.mubr.msk.bf16.mxu1 %vm5108_vm1, %v5107_v3  ;;  %v5316_v23 = vld [vmem:[%s6010_s5 + $0x8] sm:$0xff]   ;;  %v5322_v24 = vld [vmem:[%s6010_s5] sm:$0xff]   ;;  %s5111_s26 = smov 120   ;;  %s6036_s23 = smov 64   ;;  %vm2269_vm5 = vcmask 523264  }
  0x44   : > { %4402 = vmatprep.subr.bf16.mxu1 %v5107_v3  ;;  %4420 = vmatprep.mubr.msk.bf16.mxu0 %vm5108_vm1, %v5107_v3  ;;  %v5330_v29 = vld [vmem:[%s6009_s4] ss:$0 sm:$0xff]  ;;  %s6030_s0 = smov 80   ;;  %s6032_s19 = smov 112  }
  0x45   : > { %4417 = vmatpush3.bf16.msra.mxu0 %v5316_v23  ;;  %v5340_v33 = vld [vmem:[%s6011_s6] ss:$0 sm:$0xff]  ;;  %s6024_s30 = smov 72   ;;  %s6026_s20 = smov 104  }
  0x46   : > { %4418 = vmatprep.subr.bf16.mxu0 %v5107_v3  ;;  %s6028_s22 = smov 48   ;;  %s6022_s27 = smov 40  }
  0x47   : > { %v4843_v5 = vld [vmem:[%s6041_s29] sm:$0xff]   ;;  %4403 = vmatpush3.bf16.msra.mxu1 %v4842_v4  ;;  %v561_v9 = vld [vmem:[#allocation2 + $0x8] sm:$0xff]  ;;  %s6034_s29 = smov 56   ;;  %s6043_s28 = smov 56  }
  0x48   : > { %4408 = vmatprep.subr.bf16.mxu1 %v5107_v3  ;;  %v560_v8 = vld [vmem:[#allocation2] sm:$0xff]  ;;  %p4263_p2 = scmp.ne.s32.totalorder %s5214_s24, 2 }
  0x49   : > { %v562_v10 = vpack.c.bf16 %v561_v9, %v560_v8  ;;  %4419 = vmatpush3.bf16.msra.mxu0 %v5322_v24 }
  0x4a   : > { %4405 = vmatmul.mubr.msk.bf16.vlgmr.msra.gmra.mxu1 %vm557_vm2, %v4843_v5  ;;  %4430 = vmatprep.subr.bf16.mxu0 %v5107_v3 }
  0x4b   : > { %4409 = vmatpush3.bf16.msra.mxu1 %v4844_v6  ;;  %4412 = vmatprep.mubr.msk.bf16.mxu1 %vm5108_vm1, %v5107_v3 }
  0x4c   : > { %4410 = vmatprep.subr.bf16.mxu1 %v5107_v3 }
  0x4f   : > { %4411 = vmatpush3.bf16.msra.mxu1 %v4845_v7 }
  0x50   : > { %4424 = vmatprep.subr.bf16.mxu1 %v5107_v3 }
  0x52   : > { %4413 = vmatmul.mubr.msk.bf16.vlgmr.msra.gmra.mxu1 %vm557_vm2, %v562_v10 }
  0x53   : > { %4426 = vmatprep.mubr.msk.bf16.mxu1 %vm5108_vm1, %v5107_v3 }
 0x10a   : > { %v627_v11 = vpop.f32.mrf.mxu1 }
 0x10c   : > { %v4406_v12 = vpop.f32.mrf.mxu1 }
 0x10e   : > { %v630_v13 = vpop.f32.mrf.mxu1 }
 0x110   : > { %v4407_v14 = vpop.f32.mrf.mxu1 }
 0x112   : > { %v683_v15 = vpop.f32.mrf.mxu1 }
 0x113   : > { %v5306_v16 = vadd.f32 %v683_v15, %v627_v11 }
 0x114   : > { %v4414_v17 = vpop.f32.mrf.mxu1 }
 0x115   : > { %v716_v18 = vmul.f32 %v5306_v16, %v5306_v16  ;;  %v699_v17 = vld [vmem:[%s6012_s7] sm:$0xf] }
 0x116   : > { %v686_v19 = vpop.f32.mrf.mxu1 }
 0x117   : > { %v5310_v20 = vadd.f32 %v686_v19, %v630_v13  ;;  %v717_v21 = vsel %vm557_vm2, %v716_v18, 0.0  ;;  %v5388_v18 = vsel %vm863_vm4, %v699_v17, 0  ;;  %v700_v19 = vld [vmem:[%s6012_s7 + $0x4] sm:$0xf] }
 0x118   : > { %718 = vadd.xlane.f32.xlu0 %v717_v21  ;;  %v4415_v22 = vpop.f32.mrf.mxu1  ;;  %v5396_v21 = vsel %vm863_vm4, %v700_v19, 0 }
 0x119   : > { %v1453_v19 = vmul.f32 %v5310_v20, %v5310_v20 }
 0x1a1   : > { %v719_v25 = vpop.xlane.xlu0 %718 }
 0x1a2   : > { %v721_v26 = vmul.f32 0.03125, %v719_v25 }
 0x1a4   : > { %v722_v27 = vadd.f32 1e-06, %v721_v26 }
 0x1a6   : > { %4862 = vrsqrt.f32 %v722_v27 }
 0x1b3   : > { %v4863_v28 = vpop.eup %4862 }
 0x1b4   : > { %v724_v30 = vmul.f32 %v4863_v28, %v5306_v16 }
 0x1b6   : > { %v731_v31 = vmul.f32 %v5330_v29, %v724_v30 }
 0x1b8   : > { %v732_v32 = vpack.c.bf16 %v731_v31, %v731_v31 }
 0x1ba   : > { %4421 = vmatmul.mubr.msk.bf16.vlgmr.msra.gmra.mxu0 %vm557_vm2, %v732_v32 }
 0x1bb   : > { %4432 = vmatprep.mubr.msk.bf16.mxu0 %vm5108_vm1, %v5107_v3 }
 0x27a   : > { %v788_v34 = vpop.f32.mrf.mxu0 }
 0x27b   : > { %v789_v35 = vadd.f32 %v5340_v33, %v788_v34 }
 0x27c   : > { %v4422_v36 = vpop.f32.mrf.mxu0 }
 0x27d   : > { %v5343_v37 = vpack.c.bf16 %v789_v35, %v789_v35 }
 0x27e   : > { %v791_v38 = vpop.f32.mrf.mxu0 }
 0x27f   : > { %910 = vrot.lane.b32.xlu1 %v5343_v37, %s5109_s25  ;;  %796 = vrot.lane.b32.xlu0 %v5343_v37, %s5110_s18 }
 0x280   : > { %v4423_v39 = vpop.f32.mrf.mxu0 }
 0x283   : > { %908 = vrot.lane.b32.xlu1 %v5343_v37, %s5111_s26 }
 0x2f1   : > { %v797_v40 = vpop.permute.xlu0 %796  ;;  %v911_v42 = vpop.permute.xlu1 %910 }
 0x2f2   : > { %v803_v41 = vsel %vm798_vm3, %v797_v40, 0  ;;  %v916_v43 = vsel %vm798_vm3, %v911_v42, 0 }
 0x2f3   : > { %4425 = vmatpush3.bf16.xpose.msra.mxu1 %v803_v41 }
 0x2f4   : > { %4436 = vmatprep.subr.bf16.mxu1 %v5107_v3 }
 0x2f5   : > { %v909_v44 = vpop.permute.xlu1 %908 }
 0x2fa   : > { %4427 = vmatmul.mubr.msk.bf16.vlgmr.msra.gmra.mxu1 %vm798_vm3, %v5343_v37 }
 0x2fb   : > { %4437 = vmatpush3.bf16.xpose.msra.mxu1 %v916_v43  ;;  %4438 = vmatprep.mubr.msk.bf16.mxu1 %vm5108_vm1, %v5107_v3 }
 0x2fc   : > { %4448 = vmatprep.subr.bf16.mxu1 %v5107_v3 }
 0x302   : > { %4439 = vmatmul.mubr.msk.bf16.vlgmr.msra.gmra.mxu1 %vm798_vm3, %v909_v44 }
 0x303   : > { %4450 = vmatprep.mubr.msk.bf16.mxu1 %vm5108_vm1, %v5107_v3  ;;  %4449 = vmatpush3.bf16.msra.mxu1 %v5396_v21 }
 0x304   : > { %4460 = vmatprep.subr.bf16.mxu1 %v5107_v3 }
 0x3ba   : > { %v839_v45 = vpop.f32.mrf.mxu1 }
 0x3bb   : > { %v845_v46 = vmul.f32 0.35355338, %v839_v45 }
 0x3bc   : > { %v4428_v47 = vpop.f32.mrf.mxu1 }
 0x3bd   : > { %v846_v48 = vsel %vm798_vm3, %v845_v46, -inf }
 0x3be   : > { %847 = vmax.xlane.f32.xlu1 %v846_v48  ;;  %v842_v49 = vpop.f32.mrf.mxu1 }
 0x3c0   : > { %v4429_v50 = vpop.f32.mrf.mxu1 }
 0x3c2   : > { %v952_v51 = vpop.f32.mrf.mxu1 }
 0x3c3   : > { %v958_v52 = vmul.f32 0.35355338, %v952_v51 }
 0x3c4   : > { %v4440_v53 = vpop.f32.mrf.mxu1 }
 0x3c5   : > { %v959_v54 = vsel %vm798_vm3, %v958_v52, -inf }
 0x3c6   : > { %960 = vmax.xlane.f32.xlu0 %v959_v54  ;;  %v955_v55 = vpop.f32.mrf.mxu1 }
 0x3c8   : > { %v4441_v56 = vpop.f32.mrf.mxu1 }
 0x3dc   : > { %971 = vrot.lane.b32.xlu0 %v5343_v37, %s6034_s29 }
 0x447   : > { %v848_v57 = vpop.xlane.xlu1 %847 }
 0x448   : > { %v849_v58 = vsub.f32 %v845_v46, %v848_v57 }
 0x44a   : > { %v850_v59 = vmul.f32 1.442695, %v849_v58 }
 0x44c   : > { %4864 = vpow2.f32 %v850_v59 }
 0x44f   : > { %v961_v60 = vpop.xlane.xlu0 %960 }
 0x450   : > { %v962_v61 = vsub.f32 %v958_v52, %v961_v60 }
 0x452   : > { %v963_v62 = vmul.f32 1.442695, %v962_v61 }
 0x453   : > { %v972_v10 = vpop.permute.xlu0 %971 }
 0x454   : > { %4866 = vpow2.f32 %v963_v62  ;;  %v977_v12 = vsel %vm863_vm4, %v972_v10, 0 }
 0x459   : > { %v4865_v63 = vpop.eup %4864 }
 0x45a   : > { %v852_v0 = vsel %vm798_vm3, %v4865_v63, 0.0 }
 0x45b   : > { %853 = vadd.xlane.f32.xlu1 %v852_v0 }
 0x461   : > { %v4867_v1 = vpop.eup %4866 }
 0x462   : > { %v965_v2 = vsel %vm798_vm3, %v4867_v1, 0.0 }
 0x463   : > { %966 = vadd.xlane.f32.xlu1 %v965_v2 }
 0x474   : > { %858 = vrot.lane.b32.xlu1 %v5343_v37, %s6036_s23 }
 0x478   : > { %1114 = vrot.lane.b32.xlu1 %v5343_v37, %s6030_s0 }
 0x47c   : > { %1112 = vrot.lane.b32.xlu1 %v5343_v37, %s6032_s19 }
 0x4e4   : > { %v854_v4 = vpop.xlane.xlu1 %853 }
 0x4e5   : > { %4868 = vrcp.f32 %v854_v4 }
 0x4ec   : > { %v967_v5 = vpop.xlane.xlu1 %966 }
 0x4ed   : > { %4870 = vrcp.f32 %v967_v5 }
 0x4f0   : > { %v859_v6 = vpop.permute.xlu1 %858 }
 0x4f1   : > { %v865_v7 = vsel %vm863_vm4, %v859_v6, 0  ;;  %v701_v6 = vld [vmem:[%s6012_s7 + $0x8] sm:$0xf] }
 0x4f2   : > { %v4869_v8 = vpop.eup %4868  ;;  %4431 = vmatpush3.bf16.msra.mxu0 %v865_v7  ;;  %v5435_v7 = vsel %vm863_vm4, %v701_v6, 0 }
 0x4f3   : > { %4442 = vmatprep.subr.bf16.mxu0 %v5107_v3  ;;  %v856_v9 = vmul.f32 %v4869_v8, %v4865_v63 }
 0x4f4   : > { %v1115_v30 = vpop.permute.xlu1 %1114 }
 0x4f5   : > { %v857_v11 = vpack.c.bf16 %v856_v9, %v856_v9  ;;  %v1120_v35 = vsel %vm798_vm3, %v1115_v30, 0 }
 0x4f7   : > { %4433 = vmatmul.mubr.msk.bf16.vlgmr.msra.gmra.mxu0 %vm798_vm3, %v857_v11 }
 0x4f8   : > { %4443 = vmatpush3.bf16.msra.mxu0 %v977_v12  ;;  %4444 = vmatprep.mubr.msk.bf16.mxu0 %vm5108_vm1, %v5107_v3  ;;  %v1113_v39 = vpop.permute.xlu1 %1112 }
 0x4f9   : > { %4454 = vmatprep.subr.bf16.mxu0 %v5107_v3 }
 0x4fa   : > { %v4871_v13 = vpop.eup %4870 }
 0x4fb   : > { %v969_v14 = vmul.f32 %v4871_v13, %v4867_v1 }
 0x4fd   : > { %v970_v15 = vpack.c.bf16 %v969_v14, %v969_v14 }
 0x4ff   : > { %4445 = vmatmul.mubr.msk.bf16.vlgmr.msra.gmra.mxu0 %vm798_vm3, %v970_v15 }
 0x500   : > { %4456 = vmatprep.mubr.msk.bf16.mxu0 %vm5108_vm1, %v5107_v3  ;;  %4455 = vmatpush3.bf16.msra.mxu0 %v5388_v18 }
 0x501   : > { %4466 = vmatprep.subr.bf16.mxu0 %v5107_v3 }
 0x5b7   : > { %v901_v22 = vpop.f32.mrf.mxu0 }
 0x5b8   : > { %v907_v25 = vpack.c.bf16 %v901_v22, %v901_v22 }
 0x5b9   : > { %v4434_v26 = vpop.f32.mrf.mxu0 }
 0x5ba   : > { %4457 = vmatmul.mubr.msk.bf16.vlgmr.msra.gmra.mxu0 %vm798_vm3, %v907_v25  ;;  %v1454_v26 = vsel %vm557_vm2, %v1453_v19, 0.0 }
 0x5bb   : > { %v904_v27 = vpop.f32.mrf.mxu0  ;;  %4468 = vmatprep.mubr.msk.bf16.mxu0 %vm5108_vm1, %v5107_v3 }
 0x5bd   : > { %v4435_v28 = vpop.f32.mrf.mxu0 }
 0x5bf   : > { %v1013_v31 = vpop.f32.mrf.mxu0 }
 0x5c0   : > { %v1019_v32 = vpack.c.bf16 %v1013_v31, %v1013_v31 }
 0x5c1   : > { %v4446_v34 = vpop.f32.mrf.mxu0 }
 0x5c2   : > { %4451 = vmatmul.mubr.msk.bf16.vlgmr.msra.gmra.mxu1 %vm798_vm3, %v1019_v32 }
 0x5c3   : > { %4461 = vmatpush3.bf16.xpose.msra.mxu1 %v1120_v35  ;;  %v1016_v36 = vpop.f32.mrf.mxu0  ;;  %4462 = vmatprep.mubr.msk.bf16.mxu1 %vm5108_vm1, %v5107_v3 }
 0x5c4   : > { %4472 = vmatprep.subr.bf16.mxu1 %v5107_v3 }
 0x5c5   : > { %v4447_v38 = vpop.f32.mrf.mxu0 }
 0x5ca   : > { %4463 = vmatmul.mubr.msk.bf16.vlgmr.msra.gmra.mxu1 %vm798_vm3, %v1113_v39 }
 0x5cb   : > { %4474 = vmatprep.mubr.msk.bf16.mxu1 %vm5108_vm1, %v5107_v3  ;;  %4473 = vmatpush3.bf16.msra.mxu1 %v5435_v7 }
 0x5cc   : > { %4484 = vmatprep.subr.bf16.mxu1 %v5107_v3 }
 0x67a   : > { %v1106_v40 = vpop.f32.mrf.mxu0 }
 0x67c   : > { %v4458_v41 = vpop.f32.mrf.mxu0 }
 0x67e   : > { %v1109_v42 = vpop.f32.mrf.mxu0 }
 0x680   : > { %v4459_v43 = vpop.f32.mrf.mxu0 }
 0x682   : > { %v1060_v44 = vpop.f32.mrf.mxu1 }
 0x683   : > { %v5411_v45 = vadd.f32 %v1106_v40, %v1060_v44 }
 0x684   : > { %v4452_v46 = vpop.f32.mrf.mxu1 }
 0x686   : > { %v1063_v47 = vpop.f32.mrf.mxu1 }
 0x688   : > { %v4453_v48 = vpop.f32.mrf.mxu1 }
 0x68a   : > { %v1156_v49 = vpop.f32.mrf.mxu1 }
 0x68b   : > { %v1162_v50 = vmul.f32 0.35355338, %v1156_v49 }
 0x68c   : > { %v4464_v51 = vpop.f32.mrf.mxu1 }
 0x68d   : > { %v1163_v52 = vsel %vm798_vm3, %v1162_v50, -inf }
 0x68e   : > { %1164 = vmax.xlane.f32.xlu1 %v1163_v52  ;;  %v1159_v53 = vpop.f32.mrf.mxu1 }
 0x690   : > { %v4465_v54 = vpop.f32.mrf.mxu1 }
 0x69f   : > { %1273 = vrot.lane.b32.xlu1 %v5343_v37, %s6024_s30 }
 0x6a3   : > { %1271 = vrot.lane.b32.xlu1 %v5343_v37, %s6026_s20 }
 0x717   : > { %v1165_v55 = vpop.xlane.xlu1 %1164 }
 0x718   : > { %v1166_v56 = vsub.f32 %v1162_v50, %v1165_v55 }
 0x71a   : > { %v1167_v57 = vmul.f32 1.442695, %v1166_v56 }
 0x71b   : > { %v1274_v1 = vpop.permute.xlu1 %1273 }
 0x71c   : > { %4872 = vpow2.f32 %v1167_v57  ;;  %v1279_v4 = vsel %vm798_vm3, %v1274_v1, 0 }
 0x71f   : > { %v1272_v5 = vpop.permute.xlu1 %1271 }
 0x729   : > { %v4873_v58 = vpop.eup %4872 }
 0x72a   : > { %v1169_v59 = vsel %vm798_vm3, %v4873_v58, 0.0 }
 0x72b   : > { %1170 = vadd.xlane.f32.xlu0 %v1169_v59 }
 0x741   : > { %1175 = vrot.lane.b32.xlu0 %v5343_v37, %s6028_s22 }
 0x7b4   : > { %v1171_v60 = vpop.xlane.xlu0 %1170 }
 0x7b5   : > { %4874 = vrcp.f32 %v1171_v60 }
 0x7b8   : > { %v1176_v61 = vpop.permute.xlu0 %1175 }
 0x7b9   : > { %v1181_v62 = vsel %vm863_vm4, %v1176_v61, 0 }
 0x7ba   : > { %4467 = vmatpush3.bf16.msra.mxu0 %v1181_v62 }
 0x7bb   : > { %4478 = vmatprep.subr.bf16.mxu0 %v5107_v3 }
 0x7c2   : > { %v4875_v63 = vpop.eup %4874 }
 0x7c3   : > { %v1173_v0 = vmul.f32 %v4875_v63, %v4873_v58 }
 0x7c5   : > { %v1174_v2 = vpack.c.bf16 %v1173_v0, %v1173_v0 }
 0x7c7   : > { %4469 = vmatmul.mubr.msk.bf16.vlgmr.msra.gmra.mxu0 %vm798_vm3, %v1174_v2 }
 0x7c8   : > { %4479 = vmatpush3.bf16.xpose.msra.mxu0 %v1279_v4  ;;  %4480 = vmatprep.mubr.msk.bf16.mxu0 %vm5108_vm1, %v5107_v3 }
 0x7c9   : > { %4490 = vmatprep.subr.bf16.mxu0 %v5107_v3 }
 0x7cf   : > { %4481 = vmatmul.mubr.msk.bf16.vlgmr.msra.gmra.mxu0 %vm798_vm3, %v1272_v5 }
 0x7d0   : > { %4492 = vmatprep.mubr.msk.bf16.mxu0 %vm5108_vm1, %v5107_v3 }
 0x887   : > { %v1217_v8 = vpop.f32.mrf.mxu0 }
 0x888   : > { %v1223_v9 = vpack.c.bf16 %v1217_v8, %v1217_v8 }
 0x889   : > { %v4470_v10 = vpop.f32.mrf.mxu0 }
 0x88a   : > { %4475 = vmatmul.mubr.msk.bf16.vlgmr.msra.gmra.mxu1 %vm798_vm3, %v1223_v9 }
 0x88b   : > { %v1220_v11 = vpop.f32.mrf.mxu0  ;;  %4486 = vmatprep.mubr.msk.bf16.mxu1 %vm5108_vm1, %v5107_v3 }
 0x88d   : > { %v4471_v12 = vpop.f32.mrf.mxu0 }
 0x88f   : > { %v1315_v13 = vpop.f32.mrf.mxu0 }
 0x890   : > { %v1321_v14 = vmul.f32 0.35355338, %v1315_v13 }
 0x891   : > { %v4482_v15 = vpop.f32.mrf.mxu0 }
 0x892   : > { %v1322_v17 = vsel %vm798_vm3, %v1321_v14, -inf }
 0x893   : > { %1323 = vmax.xlane.f32.xlu0 %v1322_v17  ;;  %v1318_v22 = vpop.f32.mrf.mxu0 }
 0x895   : > { %v4483_v25 = vpop.f32.mrf.mxu0 }
 0x897   : > { %1455 = vadd.xlane.f32.xlu0 %v1454_v26 }
 0x8ad   : > { %1334 = vrot.lane.b32.xlu0 %v5343_v37, %s6022_s27  ;;  %s6042_s27 = smov 40  }
 0x91c   : > { %v1324_v27 = vpop.xlane.xlu0 %1323 }
 0x91d   : > { %v1325_v28 = vsub.f32 %v1321_v14, %v1324_v27 }
 0x91f   : > { %v1326_v30 = vmul.f32 1.442695, %v1325_v28 }
 0x920   : > { %v1456_v31 = vpop.xlane.xlu0 %1455 }
 0x921   : > { %4876 = vpow2.f32 %v1326_v30  ;;  %v1457_v42 = vmul.f32 0.03125, %v1456_v31 }
 0x923   : > { %v1458_v43 = vadd.f32 1e-06, %v1457_v42 }
 0x924   : > { %v1335_v32 = vpop.permute.xlu0 %1334 }
 0x925   : > { %v1340_v34 = vsel %vm863_vm4, %v1335_v32, 0  ;;  %4878 = vrsqrt.f32 %v1458_v43 }
 0x926   : > { %4485 = vmatpush3.bf16.msra.mxu1 %v1340_v34 }
 0x927   : > { %4496 = vmatprep.subr.bf16.mxu1 %v5107_v3 }
 0x92e   : > { %v4877_v35 = vpop.eup %4876 }
 0x92f   : > { %v1328_v36 = vsel %vm798_vm3, %v4877_v35, 0.0 }
 0x930   : > { %1329 = vadd.xlane.f32.xlu1 %v1328_v36 }
 0x932   : > { %v4879_v46 = vpop.eup %4878 }
 0x933   : > { %v1460_v50 = vmul.f32 %v4879_v46, %v5310_v20 }
 0x94a   : > { %v1264_v38 = vpop.f32.mrf.mxu1 }
 0x94b   : > { %v1270_v39 = vadd.f32 %v1264_v38, %v5411_v45  ;;  %v1461_v45 = vmul.f32 %v5330_v29, %v1460_v50 }
 0x94c   : > { %v4476_v40 = vpop.f32.mrf.mxu1 }
 0x94d   : > { %v1462_v51 = vpack.c.bf16 %v1461_v45, %v1461_v45 }
 0x94e   : > { %v1267_v37 = vpop.f32.mrf.mxu1 }
 0x950   : > { %v4477_v41 = vpop.f32.mrf.mxu1 }
 0x9b9   : > { %v1330_v44 = vpop.xlane.xlu1 %1329 }
 0x9ba   : > { %4880 = vrcp.f32 %v1330_v44 }
 0x9c7   : > { %v4881_v47 = vpop.eup %4880 }
 0x9c8   : > { %v1332_v48 = vmul.f32 %v4881_v47, %v4877_v35 }
 0x9ca   : > { %v1333_v49 = vpack.c.bf16 %v1332_v48, %v1332_v48 }
 0x9cc   : > { %4487 = vmatmul.mubr.msk.bf16.vlgmr.msra.gmra.mxu1 %vm798_vm3, %v1333_v49 }
 0x9cd   : > { %4497 = vmatpush3.bf16.msra.mxu1 %v5316_v23  ;;  %4500 = vmatprep.mubr.msk.bf16.mxu1 %vm5108_vm1, %v5107_v3  ;;  %v702_v23 = vld [vmem:[%s6012_s7 + $0xc] sm:$0xf] }
 0x9ce   : > { %4498 = vmatprep.subr.bf16.mxu1 %v5107_v3  ;;  %v5468_v52 = vsel %vm863_vm4, %v702_v23, 0 }
 0x9cf   : > { %4491 = vmatpush3.bf16.msra.mxu0 %v5468_v52 }
 0x9d0   : > { %4504 = vmatprep.subr.bf16.mxu0 %v5107_v3 }
 0x9d1   : > { %4499 = vmatpush3.bf16.msra.mxu1 %v5322_v24 }
 0x9d2   : > { %4510 = vmatprep.subr.bf16.mxu1 %v5107_v3 }
 0x9d4   : > { %4501 = vmatmul.mubr.msk.bf16.vlgmr.msra.gmra.mxu1 %vm557_vm2, %v1462_v51 }
 0x9d5   : > { %4512 = vmatprep.mubr.msk.bf16.mxu1 %vm5108_vm1, %v5107_v3 }
 0xa8c   : > { %v1376_v24 = vpop.f32.mrf.mxu1 }
 0xa8d   : > { %v1382_v29 = vpack.c.bf16 %v1376_v24, %v1376_v24 }
 0xa8e   : > { %v4488_v53 = vpop.f32.mrf.mxu1 }
 0xa8f   : > { %4493 = vmatmul.mubr.msk.bf16.vlgmr.msra.gmra.mxu0 %vm798_vm3, %v1382_v29 }
 0xa90   : > { %v1379_v54 = vpop.f32.mrf.mxu1  ;;  %4506 = vmatprep.mubr.msk.bf16.mxu0 %vm5108_vm1, %v5107_v3 }
 0xa92   : > { %v4489_v55 = vpop.f32.mrf.mxu1 }
 0xa94   : > { %v1500_v56 = vpop.f32.mrf.mxu1 }
 0xa95   : > { %v1501_v57 = vadd.f32 %v5340_v33, %v1500_v56 }
 0xa96   : > { %v4502_v58 = vpop.f32.mrf.mxu1 }
 0xa97   : > { %v5476_v59 = vpack.c.bf16 %v1501_v57, %v1501_v57 }
 0xa98   : > { %v1503_v60 = vpop.f32.mrf.mxu1 }
 0xa99   : > { %1618 = vrot.lane.b32.xlu0 %v5476_v59, %s5111_s26  ;;  %1508 = vrot.lane.b32.xlu1 %v5476_v59, %s5110_s18 }
 0xa9a   : > { %v4503_v61 = vpop.f32.mrf.mxu1 }
 0xa9d   : > { %1620 = vrot.lane.b32.xlu1 %v5476_v59, %s5109_s25 }
 0xb0b   : > { %v1509_v62 = vpop.permute.xlu1 %1508  ;;  %v1619_v1 = vpop.permute.xlu0 %1618 }
 0xb0c   : > { %v1514_v63 = vsel %vm798_vm3, %v1509_v62, 0 }
 0xb0d   : > { %4505 = vmatpush3.bf16.xpose.msra.mxu0 %v1514_v63 }
 0xb0e   : > { %4516 = vmatprep.subr.bf16.mxu0 %v5107_v3 }
 0xb0f   : > { %v1621_v33 = vpop.permute.xlu1 %1620 }
 0xb10   : > { %v1626_v0 = vsel %vm798_vm3, %v1621_v33, 0 }
 0xb14   : > { %4507 = vmatmul.mubr.msk.bf16.vlgmr.msra.gmra.mxu0 %vm798_vm3, %v5476_v59 }
 0xb15   : > { %4517 = vmatpush3.bf16.xpose.msra.mxu0 %v1626_v0  ;;  %4518 = vmatprep.mubr.msk.bf16.mxu0 %vm5108_vm1, %v5107_v3 }
 0xb16   : > { %4528 = vmatprep.subr.bf16.mxu0 %v5107_v3 }
 0xb1c   : > { %4519 = vmatmul.mubr.msk.bf16.vlgmr.msra.gmra.mxu0 %vm798_vm3, %v1619_v1 }
 0xb1d   : > { %4529 = vmatpush3.bf16.msra.mxu0 %v5396_v21  ;;  %4530 = vmatprep.mubr.msk.bf16.mxu0 %vm5108_vm1, %v5107_v3 }
 0xb1e   : > { %4540 = vmatprep.subr.bf16.mxu0 %v5107_v3 }
 0xb4f   : > { %v1423_v2 = vpop.f32.mrf.mxu0 }
 0xb50   : > { %v5497_v4 = vadd.f32 %v1423_v2, %v1270_v39 }
 0xb51   : > { %v4494_v5 = vpop.f32.mrf.mxu0 }
 0xb53   : > { %v1426_v6 = vpop.f32.mrf.mxu0 }
 0xb55   : > { %v4495_v8 = vpop.f32.mrf.mxu0 }
 0xbd4   : > { %v1550_v9 = vpop.f32.mrf.mxu0 }
 0xbd5   : > { %v1556_v10 = vmul.f32 0.35355338, %v1550_v9 }
 0xbd6   : > { %v4508_v11 = vpop.f32.mrf.mxu0 }
 0xbd7   : > { %v1557_v12 = vsel %vm798_vm3, %v1556_v10, -inf }
 0xbd8   : > { %1558 = vmax.xlane.f32.xlu1 %v1557_v12  ;;  %v1553_v13 = vpop.f32.mrf.mxu0 }
 0xbda   : > { %v4509_v14 = vpop.f32.mrf.mxu0 }
 0xbdc   : > { %v1662_v21 = vpop.f32.mrf.mxu0 }
 0xbdd   : > { %v1668_v15 = vmul.f32 0.35355338, %v1662_v21 }
 0xbde   : > { %v4520_v17 = vpop.f32.mrf.mxu0 }
 0xbdf   : > { %v1669_v19 = vsel %vm798_vm3, %v1668_v15, -inf }
 0xbe0   : > { %1670 = vmax.xlane.f32.xlu0 %v1669_v19  ;;  %v1665_v22 = vpop.f32.mrf.mxu0 }
 0xbe2   : > { %v4521_v25 = vpop.f32.mrf.mxu0 }
 0xc61   : > { %v1559_v26 = vpop.xlane.xlu1 %1558 }
 0xc62   : > { %v1560_v27 = vsub.f32 %v1556_v10, %v1559_v26 }
 0xc64   : > { %v1561_v28 = vmul.f32 1.442695, %v1560_v27 }
 0xc66   : > { %4882 = vpow2.f32 %v1561_v28 }
 0xc69   : > { %v1671_v30 = vpop.xlane.xlu0 %1670 }
 0xc6a   : > { %v1672_v31 = vsub.f32 %v1668_v15, %v1671_v30 }
 0xc6c   : > { %v1673_v32 = vmul.f32 1.442695, %v1672_v31 }
 0xc6e   : > { %4884 = vpow2.f32 %v1673_v32 }
 0xc73   : > { %v4883_v34 = vpop.eup %4882 }
 0xc74   : > { %v1563_v35 = vsel %vm798_vm3, %v4883_v34, 0.0 }
 0xc75   : > { %1564 = vadd.xlane.f32.xlu0 %v1563_v35 }
 0xc7b   : > { %v4885_v36 = vpop.eup %4884 }
 0xc7c   : > { %v1675_v38 = vsel %vm798_vm3, %v4885_v36, 0.0 }
 0xc7d   : > { %1676 = vadd.xlane.f32.xlu1 %v1675_v38 }
 0xc8b   : > { %1569 = vrot.lane.b32.xlu0 %v5476_v59, %s6036_s23 }
 0xc8e   : > { %1681 = vrot.lane.b32.xlu1 %v5476_v59, %s6034_s29  ;;  %s6047_s29 = smov 104  }
 0xc8f   : > { %1816 = vrot.lane.b32.xlu0 %v5476_v59, %s6032_s19 }
 0xc92   : > { %1818 = vrot.lane.b32.xlu1 %v5476_v59, %s6030_s0  ;;  %s6048_s0 = smov 72  }
 0xcfe   : > { %v1565_v39 = vpop.xlane.xlu0 %1564 }
 0xcff   : > { %4886 = vrcp.f32 %v1565_v39 }
 0xd02   : > { %v1570_v40 = vpop.permute.xlu0 %1569 }
 0xd03   : > { %v1575_v37 = vsel %vm863_vm4, %v1570_v40, 0 }
 0xd04   : > { %4511 = vmatpush3.bf16.msra.mxu1 %v1575_v37 }
 0xd05   : > { %4522 = vmatprep.subr.bf16.mxu1 %v5107_v3 }
 0xd06   : > { %v1677_v41 = vpop.xlane.xlu1 %1676  ;;  %v1817_v60 = vpop.permute.xlu0 %1816 }
 0xd07   : > { %4888 = vrcp.f32 %v1677_v41 }
 0xd0a   : > { %v1682_v44 = vpop.permute.xlu1 %1681 }
 0xd0b   : > { %v1687_v47 = vsel %vm863_vm4, %v1682_v44, 0 }
 0xd0c   : > { %v4887_v42 = vpop.eup %4886 }
 0xd0d   : > { %v1567_v43 = vmul.f32 %v4887_v42, %v4883_v34 }
 0xd0e   : > { %v1819_v53 = vpop.permute.xlu1 %1818 }
 0xd0f   : > { %v1568_v46 = vpack.c.bf16 %v1567_v43, %v1567_v43 }
 0xd11   : > { %4513 = vmatmul.mubr.msk.bf16.vlgmr.msra.gmra.mxu1 %vm798_vm3, %v1568_v46 }
 0xd12   : > { %4523 = vmatpush3.bf16.msra.mxu1 %v1687_v47  ;;  %4524 = vmatprep.mubr.msk.bf16.mxu1 %vm5108_vm1, %v5107_v3 }
 0xd13   : > { %4534 = vmatprep.subr.bf16.mxu1 %v5107_v3 }
 0xd14   : > { %v4889_v48 = vpop.eup %4888 }
 0xd15   : > { %v1679_v49 = vmul.f32 %v4889_v48, %v4885_v36 }
 0xd17   : > { %v1680_v50 = vpack.c.bf16 %v1679_v49, %v1679_v49 }
 0xd19   : > { %4525 = vmatmul.mubr.msk.bf16.vlgmr.msra.gmra.mxu1 %vm798_vm3, %v1680_v50  ;;  %v1430_v50 = vadd.f32 %v5497_v4, %v5306_v16 }
 0xd1a   : > { %4535 = vmatpush3.bf16.msra.mxu1 %v5388_v18  ;;  %4536 = vmatprep.mubr.msk.bf16.mxu1 %vm5108_vm1, %v5107_v3  ;;  %v1824_v18 = vsel %vm798_vm3, %v1819_v53, 0 }
 0xd1b   : > { %4546 = vmatprep.subr.bf16.mxu1 %v5107_v3 }
 0xdd1   : > { %v1611_v45 = vpop.f32.mrf.mxu1 }
 0xdd2   : > { %v1617_v51 = vpack.c.bf16 %v1611_v45, %v1611_v45  ;;  %v4166_v45 = vld [vmem:[%s6013_s8] ss:$0 sm:$0xff] }
 0xdd3   : > { %v4514_v23 = vpop.f32.mrf.mxu1 }
 0xdd4   : > { %4537 = vmatmul.mubr.msk.bf16.vlgmr.msra.gmra.mxu1 %vm798_vm3, %v1617_v51  ;;  %v1437_v51 = vadd.f32 %v4166_v45, %v1430_v50  ;;  %v4850_v50 = vld [vmem:[%s6017_s12 + $0x18] sm:$0xff]  }
 0xdd5   : > { %v1614_v24 = vpop.f32.mrf.mxu1  ;;  %4548 = vmatprep.mubr.msk.bf16.mxu1 %vm5108_vm1, %v5107_v3 }
 0xdd6   : > { %v1438_v24 = vmul.f32 %v1437_v51, %v1437_v51 }
 0xdd7   : > { %v4515_v29 = vpop.f32.mrf.mxu1 }
 0xdd8   : > { %v1439_v29 = vsel %vm557_vm2, %v1438_v24, 0.0 }
 0xdd9   : > { %v1723_v54 = vpop.f32.mrf.mxu1 }
 0xdda   : > { %v1729_v55 = vpack.c.bf16 %v1723_v54, %v1723_v54 }
 0xddb   : > { %v4526_v56 = vpop.f32.mrf.mxu1 }
 0xddc   : > { %4531 = vmatmul.mubr.msk.bf16.vlgmr.msra.gmra.mxu0 %vm798_vm3, %v1729_v55 }
 0xddd   : > { %4541 = vmatpush3.bf16.xpose.msra.mxu0 %v1824_v18  ;;  %v1726_v57 = vpop.f32.mrf.mxu1  ;;  %4542 = vmatprep.mubr.msk.bf16.mxu0 %vm5108_vm1, %v5107_v3 }
 0xdde   : > { %4552 = vmatprep.subr.bf16.mxu0 %v5107_v3 }
 0xddf   : > { %v4527_v58 = vpop.f32.mrf.mxu1 }
 0xde4   : > { %4543 = vmatmul.mubr.msk.bf16.vlgmr.msra.gmra.mxu0 %vm798_vm3, %v1817_v60 }
 0xde5   : > { %4553 = vmatpush3.bf16.msra.mxu0 %v5435_v7  ;;  %4554 = vmatprep.mubr.msk.bf16.mxu0 %vm5108_vm1, %v5107_v3 }
 0xde6   : > { %4564 = vmatprep.subr.bf16.mxu0 %v5107_v3 }
 0xe94   : > { %v1810_v61 = vpop.f32.mrf.mxu1 }
 0xe96   : > { %v4538_v62 = vpop.f32.mrf.mxu1 }
 0xe98   : > { %v1813_v63 = vpop.f32.mrf.mxu1 }
 0xe9a   : > { %v4539_v33 = vpop.f32.mrf.mxu1 }
 0xe9c   : > { %v1767_v0 = vpop.f32.mrf.mxu0 }
 0xe9d   : > { %v5536_v1 = vadd.f32 %v1810_v61, %v1767_v0 }
 0xe9e   : > { %v4532_v2 = vpop.f32.mrf.mxu0 }
 0xea0   : > { %v1770_v5 = vpop.f32.mrf.mxu0 }
 0xea2   : > { %v4533_v6 = vpop.f32.mrf.mxu0 }
 0xea4   : > { %v1860_v8 = vpop.f32.mrf.mxu0 }
 0xea5   : > { %v1866_v9 = vmul.f32 0.35355338, %v1860_v8 }
 0xea6   : > { %v4544_v10 = vpop.f32.mrf.mxu0 }
 0xea7   : > { %v1867_v7 = vsel %vm798_vm3, %v1866_v9, -inf }
 0xea8   : > { %1868 = vmax.xlane.f32.xlu1 %v1867_v7  ;;  %v1863_v11 = vpop.f32.mrf.mxu0  ;;  %v4167_v7 = vld [vmem:[%s6014_s9] ss:$0 sm:$0xff] }
 0xeaa   : > { %v4545_v12 = vpop.f32.mrf.mxu0 }
 0xeb9   : > { %1974 = vrot.lane.b32.xlu1 %v5476_v59, %s6024_s30  ;;  %s6044_s30 = smov 112  }
 0xebd   : > { %1972 = vrot.lane.b32.xlu1 %v5476_v59, %s6026_s20  ;;  %s6045_s20 = smov 80  }
 0xf31   : > { %v1869_v13 = vpop.xlane.xlu1 %1868 }
 0xf32   : > { %v1870_v14 = vsub.f32 %v1866_v9, %v1869_v13 }
 0xf34   : > { %v1871_v21 = vmul.f32 1.442695, %v1870_v14 }
 0xf35   : > { %v1975_v28 = vpop.permute.xlu1 %1974 }
 0xf36   : > { %4890 = vpow2.f32 %v1871_v21  ;;  %v1980_v31 = vsel %vm798_vm3, %v1975_v28, 0 }
 0xf39   : > { %v1973_v32 = vpop.permute.xlu1 %1972 }
 0xf43   : > { %v4891_v15 = vpop.eup %4890 }
 0xf44   : > { %v1873_v17 = vsel %vm798_vm3, %v4891_v15, 0.0 }
 0xf45   : > { %1874 = vadd.xlane.f32.xlu0 %v1873_v17 }
 0xf5b   : > { %1879 = vrot.lane.b32.xlu0 %v5476_v59, %s6028_s22  ;;  %s6046_s22 = smov 48  }
 0xfce   : > { %v1875_v19 = vpop.xlane.xlu0 %1874 }
 0xfcf   : > { %4892 = vrcp.f32 %v1875_v19 }
 0xfd2   : > { %v1880_v22 = vpop.permute.xlu0 %1879 }
 0xfd3   : > { %v1885_v25 = vsel %vm863_vm4, %v1880_v22, 0 }
 0xfd4   : > { %4547 = vmatpush3.bf16.msra.mxu1 %v1885_v25 }
 0xfd5   : > { %4558 = vmatprep.subr.bf16.mxu1 %v5107_v3 }
 0xfdc   : > { %v4893_v26 = vpop.eup %4892 }
 0xfdd   : > { %v1877_v27 = vmul.f32 %v4893_v26, %v4891_v15 }
 0xfdf   : > { %v1878_v30 = vpack.c.bf16 %v1877_v27, %v1877_v27 }
 0xfe1   : > { %4549 = vmatmul.mubr.msk.bf16.vlgmr.msra.gmra.mxu1 %vm798_vm3, %v1878_v30 }
 0xfe2   : > { %4559 = vmatpush3.bf16.xpose.msra.mxu1 %v1980_v31  ;;  %4560 = vmatprep.mubr.msk.bf16.mxu1 %vm5108_vm1, %v5107_v3 }
 0xfe3   : > { %4570 = vmatprep.subr.bf16.mxu1 %v5107_v3 }
 0xfe9   : > { %4561 = vmatmul.mubr.msk.bf16.vlgmr.msra.gmra.mxu1 %vm798_vm3, %v1973_v32 }
 0xfea   : > { %4571 = vmatpush3.bf16.msra.mxu1 %v5468_v52  ;;  %4572 = vmatprep.mubr.msk.bf16.mxu1 %vm5108_vm1, %v5107_v3 }
 0xfeb   : > { %4584 = vmatprep.subr.bf16.mxu1 %v5107_v3 }
0x10a1   : > { %v1921_v34 = vpop.f32.mrf.mxu1 }
0x10a2   : > { %v1927_v35 = vpack.c.bf16 %v1921_v34, %v1921_v34  ;;  %v4848_v34 = vld [vmem:[%s6016_s11 + $0x8] sm:$0xff]  }
0x10a3   : > { %v4550_v36 = vpop.f32.mrf.mxu1 }
0x10a4   : > { %4555 = vmatmul.mubr.msk.bf16.vlgmr.msra.gmra.mxu0 %vm798_vm3, %v1927_v35  ;;  %v4849_v35 = vld [vmem:[%s6016_s11] sm:$0xff]  }
0x10a5   : > { %v1924_v38 = vpop.f32.mrf.mxu1  ;;  %4566 = vmatprep.mubr.msk.bf16.mxu0 %vm5108_vm1, %v5107_v3 }
0x10a7   : > { %v4551_v39 = vpop.f32.mrf.mxu1 }
0x10a9   : > { %v2016_v40 = vpop.f32.mrf.mxu1 }
0x10aa   : > { %v2022_v37 = vmul.f32 0.35355338, %v2016_v40 }
0x10ab   : > { %v4562_v41 = vpop.f32.mrf.mxu1 }
0x10ac   : > { %v2023_v52 = vsel %vm798_vm3, %v2022_v37, -inf }
0x10ad   : > { %2024 = vmax.xlane.f32.xlu0 %v2023_v52  ;;  %v2019_v42 = vpop.f32.mrf.mxu1 }
0x10af   : > { %v4563_v43 = vpop.f32.mrf.mxu1 }
0x10c3   : > { %2035 = vrot.lane.b32.xlu0 %v5476_v59, %s6042_s27 }
0x1136   : > { %v2025_v44 = vpop.xlane.xlu0 %2024 }
0x1137   : > { %v2026_v46 = vsub.f32 %v2022_v37, %v2025_v44  ;;  %v4181_v44 = vld [vmem:[%s6015_s10] ss:$0 sm:$0xff] }
0x1139   : > { %v2027_v47 = vmul.f32 1.442695, %v2026_v46 }
0x113a   : > { %v2036_v48 = vpop.permute.xlu0 %2035 }
0x113b   : > { %4894 = vpow2.f32 %v2027_v47  ;;  %v2041_v49 = vsel %vm863_vm4, %v2036_v48, 0 }
0x113c   : > { %4565 = vmatpush3.bf16.msra.mxu0 %v2041_v49 }
0x113d   : > { %4576 = vmatprep.subr.bf16.mxu0 %v5107_v3 }
0x1148   : > { %v4895_v23 = vpop.eup %4894 }
0x1149   : > { %v2029_v59 = vsel %vm798_vm3, %v4895_v23, 0.0 }
0x114a   : > { %2030 = vadd.xlane.f32.xlu1 %v2029_v59 }
0x114e   : > { %1440 = vadd.xlane.f32.xlu1 %v1439_v29 }
0x1164   : > { %v1965_v53 = vpop.f32.mrf.mxu0 }
0x1165   : > { %v1971_v54 = vadd.f32 %v1965_v53, %v5536_v1 }
0x1166   : > { %v4556_v55 = vpop.f32.mrf.mxu0 }
0x1168   : > { %v1968_v56 = vpop.f32.mrf.mxu0 }
0x116a   : > { %v4557_v18 = vpop.f32.mrf.mxu0 }
0x11d3   : > { %v2031_v16 = vpop.xlane.xlu1 %2030 }
0x11d4   : > { %4896 = vrcp.f32 %v2031_v16 }
0x11d7   : > { %v1441_v0 = vpop.xlane.xlu1 %1440 }
0x11d8   : > { %v1442_v1 = vmul.f32 0.03125, %v1441_v0 }
0x11da   : > { %v1443_v2 = vadd.f32 1e-06, %v1442_v1 }
0x11dc   : > { %4898 = vrsqrt.f32 %v1443_v2 }
0x11e1   : > { %v4897_v4 = vpop.eup %4896 }
0x11e2   : > { %v2033_v57 = vmul.f32 %v4897_v4, %v4895_v23  ;;  %v4853_v23 = vld [vmem:[%s6017_s12] sm:$0xff]  }
0x11e4   : > { %v2034_v58 = vpack.c.bf16 %v2033_v57, %v2033_v57 }
0x11e6   : > { %4567 = vmatmul.mubr.msk.bf16.vlgmr.msra.gmra.mxu0 %vm798_vm3, %v2034_v58 }
0x11e7   : > { %4580 = vmatprep.mubr.msk.bf16.mxu0 %vm5108_vm1, %v5107_v3  ;;  %4577 = vmatpush3.bf16.msra.mxu0 %v4848_v34 }
0x11e8   : > { %4578 = vmatprep.subr.bf16.mxu0 %v5107_v3 }
0x11e9   : > { %v4899_v5 = vpop.eup %4898 }
0x11ea   : > { %v1445_v9 = vmul.f32 %v4899_v5, %v1437_v51  ;;  %v4852_v51 = vld [vmem:[%s6017_s12 + $0x8] sm:$0xff]  }
0x11eb   : > { %4579 = vmatpush3.bf16.msra.mxu0 %v4849_v35 }
0x11ec   : > { %v5584_v14 = vmul.f32 %v4167_v7, %v1445_v9  ;;  %4596 = vmatprep.subr.bf16.mxu0 %v5107_v3 }
0x11ee   : > { %v2139_v19 = vmul.f32 %v5584_v14, %v5584_v14 }
0x11f0   : > { %v2141_v22 = vsel %vm557_vm2, %v2139_v19, 0.0 }
0x12a6   : > { %v2077_v60 = vpop.f32.mrf.mxu0 }
0x12a7   : > { %v2083_v61 = vpack.c.bf16 %v2077_v60, %v2077_v60 }
0x12a8   : > { %v4568_v62 = vpop.f32.mrf.mxu0 }
0x12a9   : > { %4573 = vmatmul.mubr.msk.bf16.vlgmr.msra.gmra.mxu1 %vm798_vm3, %v2083_v61 }
0x12aa   : > { %v2080_v63 = vpop.f32.mrf.mxu0  ;;  %4592 = vmatprep.mubr.msk.bf16.mxu1 %vm5108_vm1, %v5107_v3  ;;  %4585 = vmatpush3.bf16.msra.mxu1 %v4850_v50 }
0x12ab   : > { %4586 = vmatprep.subr.bf16.mxu1 %v5107_v3 }
0x12ac   : > { %v4569_v33 = vpop.f32.mrf.mxu0 }
0x1369   : > { %v2121_v6 = vpop.f32.mrf.mxu1 }
0x136a   : > { %v2127_v8 = vadd.f32 %v2121_v6, %v1971_v54 }
0x136b   : > { %v4574_v10 = vpop.f32.mrf.mxu1 }
0x136c   : > { %v2128_v11 = vadd.f32 %v2127_v8, %v5310_v20 }
0x136d   : > { %v2124_v12 = vpop.f32.mrf.mxu1 }
0x136e   : > { %v2129_v13 = vadd.f32 %v4166_v45, %v2128_v11  ;;  %v4851_v45 = vld [vmem:[%s6017_s12 + $0x10] sm:$0xff]  }
0x136f   : > { %v4575_v21 = vpop.f32.mrf.mxu1  ;;  %4587 = vmatpush3.bf16.msra.mxu1 %v4851_v45 }
0x1370   : > { %v2130_v15 = vmul.f32 %v2129_v13, %v2129_v13  ;;  %4588 = vmatprep.subr.bf16.mxu1 %v5107_v3 }
0x1372   : > { %v2131_v17 = vsel %vm557_vm2, %v2130_v15, 0.0  ;;  %v5639_v15 = vld [vmem:[%s6018_s13] ss:$0 sm:$0xff] }
0x1373   : > { %2132 = vadd.xlane.f32.xlu1 %v2131_v17  ;;  %4589 = vmatpush3.bf16.msra.mxu1 %v4852_v51 }
0x1374   : > { %4590 = vmatprep.subr.bf16.mxu1 %v5107_v3 }
0x1377   : > { %2142 = vadd.xlane.f32.xlu1 %v2141_v22  ;;  %4591 = vmatpush3.bf16.msra.mxu1 %v4853_v23 }
0x1378   : > { %4610 = vmatprep.subr.bf16.mxu1 %v5107_v3 }
0x13fc   : > { %v2133_v25 = vpop.xlane.xlu1 %2132 }
0x13fd   : > { %v2134_v26 = vmul.f32 0.03125, %v2133_v25  ;;  %v5650_v25 = vld [vmem:[%s6010_s5 + $0x18] sm:$0xff]  }
0x13ff   : > { %v2135_v27 = vadd.f32 1e-06, %v2134_v26  ;;  %v5656_v26 = vld [vmem:[%s6010_s5 + $0x10] sm:$0xff]  }
0x1400   : > { %v2143_v36 = vpop.xlane.xlu1 %2142 }
0x1401   : > { %4900 = vrsqrt.f32 %v2135_v27  ;;  %v2147_v38 = vmul.f32 0.03125, %v2143_v36 }
0x1403   : > { %v2149_v39 = vadd.f32 1e-06, %v2147_v38  ;;  %v5674_v38 = vld [vmem:[%s6011_s6 + $0x1] ss:$0 sm:$0xff] }
0x1405   : > { %4902 = vrsqrt.f32 %v2149_v39 }
0x140e   : > { %v4901_v20 = vpop.eup %4900 }
0x140f   : > { %v2137_v28 = vmul.f32 %v4901_v20, %v2129_v13 }
0x1411   : > { %v5590_v30 = vmul.f32 %v4167_v7, %v2137_v28 }
0x1412   : > { %v4903_v52 = vpop.eup %4902 }
0x1413   : > { %v2140_v31 = vmul.f32 %v5590_v30, %v5590_v30  ;;  %v2153_v42 = vmul.f32 %v4903_v52, %v5584_v14 }
0x1415   : > { %v2144_v32 = vsel %vm557_vm2, %v2140_v31, 0.0  ;;  %v2161_v47 = vmul.f32 %v4181_v44, %v2153_v42 }
0x1416   : > { %2145 = vadd.xlane.f32.xlu1 %v2144_v32  ;;  %v5664_v32 = vld [vmem:[%s6009_s4 + $0x1] ss:$0 sm:$0xff] }
0x149f   : > { %v2146_v40 = vpop.xlane.xlu1 %2145 }
0x14a0   : > { %v2148_v37 = vmul.f32 0.03125, %v2146_v40 }
0x14a2   : > { %v2150_v41 = vadd.f32 1e-06, %v2148_v37 }
0x14a4   : > { %4904 = vrsqrt.f32 %v2150_v41 }
0x14b1   : > { %v4905_v43 = vpop.eup %4904 }
0x14b2   : > { %v2154_v46 = vmul.f32 %v4905_v43, %v5590_v30 }
0x14b4   : > { %v2162_v48 = vmul.f32 %v4181_v44, %v2154_v46 }
0x14b6   : > { %v2163_v49 = vpack.c.bf16 %v2162_v48, %v2161_v47 }
0x14b8   : > { %4581 = vmatmul.mubr.msk.bf16.vlgmr.msra.gmra.mxu0 %vm557_vm2, %v2163_v49 }
0x14b9   : > { %4600 = vmatprep.mubr.msk.bf16.mxu0 %vm5108_vm1, %v5107_v3  ;;  %4597 = vmatpush3.bf16.msra.mxu0 %v5650_v25 }
0x14ba   : > { %4598 = vmatprep.subr.bf16.mxu0 %v5107_v3 }
0x14bd   : > { %4599 = vmatpush3.bf16.msra.mxu0 %v5656_v26 }
0x14be   : > { %4604 = vmatprep.subr.bf16.mxu0 %v5107_v3 }
0x1578   : > { %v2213_v59 = vpop.f32.mrf.mxu0 }
0x1579   : > { %2236 = vrot.lane.b32.xlu0 %v2213_v59, %s6036_s23  ;;  %v4185_v54 = vmul.f32 -1.442695, %v2213_v59 }
0x157a   : > { %v4582_v24 = vpop.f32.mrf.mxu0 }
0x157b   : > { %4906 = vpow2.f32 %v4185_v54 }
0x157c   : > { %v2216_v29 = vpop.f32.mrf.mxu0 }
0x157d   : > { %2238 = vrot.lane.b32.xlu1 %v2216_v29, %s6036_s23  ;;  %v4186_v55 = vmul.f32 -1.442695, %v2216_v29 }
0x157e   : > { %v4583_v53 = vpop.f32.mrf.mxu0 }
0x157f   : > { %4908 = vpow2.f32 %v4186_v55 }
0x1588   : > { %v4907_v56 = vpop.eup %4906 }
0x1589   : > { %v2226_v16 = vadd.f32 1.0, %v4907_v56 }
0x158b   : > { %4910 = vrcp.f32 %v2226_v16 }
0x158c   : > { %v4909_v18 = vpop.eup %4908 }
0x158d   : > { %v2227_v4 = vadd.f32 1.0, %v4909_v18 }
0x158f   : > { %4912 = vrcp.f32 %v2227_v4 }
0x1598   : > { %v4911_v57 = vpop.eup %4910 }
0x1599   : > { %v2232_v61 = vmul.f32 %v4911_v57, %v2213_v59 }
0x159c   : > { %v4913_v58 = vpop.eup %4912 }
0x159d   : > { %v2233_v62 = vmul.f32 %v4913_v58, %v2216_v29 }
0x15eb   : > { %v2237_v60 = vpop.permute.xlu0 %2236 }
0x15ec   : > { %v2242_v33 = vmul.f32 %v2237_v60, %v2232_v61 }
0x15ef   : > { %v2239_v63 = vpop.permute.xlu1 %2238 }
0x15f0   : > { %v2243_v0 = vmul.f32 %v2239_v63, %v2233_v62 }
0x15f2   : > { %v2244_v1 = vpack.c.bf16 %v2243_v0, %v2242_v33 }
0x15f4   : > { %4593 = vmatmul.mubr.msk.bf16.vlgmr.msra.gmra.mxu1 %vm2269_vm5, %v2244_v1 }
0x15f5   : > { %4612 = vmatprep.mubr.msk.bf16.mxu1 %vm5108_vm1, %v5107_v3 }
0x16b4   : > { %v2307_v2 = vpop.f32.mrf.mxu1 }
0x16b5   : > { %v2314_v5 = vadd.f32 %v2307_v2, %v5584_v14 }
0x16b6   : > { %v4594_v6 = vpop.f32.mrf.mxu1 }
0x16b7   : > { %v2316_v8 = vmul.f32 %v2314_v5, %v2314_v5 }
0x16b8   : > { %v5633_v9 = vpop.f32.mrf.mxu1 }
0x16b9   : > { %v2318_v10 = vsel %vm557_vm2, %v2316_v8, 0.0 }
0x16ba   : > { %2319 = vadd.xlane.f32.xlu0 %v2318_v10  ;;  %v4595_v7 = vpop.f32.mrf.mxu1 }
0x1743   : > { %v2320_v11 = vpop.xlane.xlu0 %2319 }
0x1744   : > { %v2324_v12 = vmul.f32 0.03125, %v2320_v11 }
0x1746   : > { %v2326_v13 = vadd.f32 1e-06, %v2324_v12 }
0x1748   : > { %4914 = vrsqrt.f32 %v2326_v13 }
0x1755   : > { %v4915_v21 = vpop.eup %4914 }
0x1756   : > { %v2330_v17 = vmul.f32 %v4915_v21, %v2314_v5 }
0x1758   : > { %v5642_v14 = vmul.f32 %v5639_v15, %v2330_v17  ;;  %v4202_v17 = vld [vmem:[%s6012_s7 + $0x10] sm:$0xf] }
0x175a   : > { %v2376_v19 = vmul.f32 %v5642_v14, %v5642_v14 }
0x175c   : > { %v2377_v22 = vsel %vm557_vm2, %v2376_v19, 0.0  ;;  %v5722_v19 = vsel %vm863_vm4, %v4202_v17, 0 }
0x175d   : > { %2378 = vadd.xlane.f32.xlu1 %v2377_v22  ;;  %v4203_v22 = vld [vmem:[%s6012_s7 + $0x14] sm:$0xf] }
0x17e6   : > { %v2379_v27 = vpop.xlane.xlu1 %2378 }
0x17e7   : > { %v2380_v20 = vmul.f32 0.03125, %v2379_v27  ;;  %v5730_v27 = vsel %vm863_vm4, %v4203_v22, 0  ;;  %v4204_v22 = vld [vmem:[%s6012_s7 + $0x18] sm:$0xf] }
0x17e9   : > { %v2381_v28 = vadd.f32 1e-06, %v2380_v20 }
0x17eb   : > { %4916 = vrsqrt.f32 %v2381_v28 }
0x17f8   : > { %v4917_v31 = vpop.eup %4916 }
0x17f9   : > { %v2383_v34 = vmul.f32 %v4917_v31, %v5642_v14 }
0x17fb   : > { %v2390_v35 = vmul.f32 %v5664_v32, %v2383_v34 }
0x17fd   : > { %v2391_v36 = vpack.c.bf16 %v2390_v35, %v2390_v35 }
0x17ff   : > { %4601 = vmatmul.mubr.msk.bf16.vlgmr.msra.gmra.mxu0 %vm557_vm2, %v2391_v36 }
0x1800   : > { %4606 = vmatprep.mubr.msk.bf16.mxu0 %vm5108_vm1, %v5107_v3 }
0x18bf   : > { %v2447_v39 = vpop.f32.mrf.mxu0 }
0x18c0   : > { %v2448_v40 = vadd.f32 %v5674_v38, %v2447_v39 }
0x18c1   : > { %v4602_v37 = vpop.f32.mrf.mxu0 }
0x18c2   : > { %v5677_v41 = vpack.c.bf16 %v2448_v40, %v2448_v40 }
0x18c3   : > { %v2450_v52 = vpop.f32.mrf.mxu0 }
0x18c4   : > { %2567 = vrot.lane.b32.xlu1 %v5677_v41, %s5109_s25  ;;  %2455 = vrot.lane.b32.xlu0 %v5677_v41, %s5110_s18 }
0x18c5   : > { %v4603_v42 = vpop.f32.mrf.mxu0 }
0x18c8   : > { %2565 = vrot.lane.b32.xlu0 %v5677_v41, %s5111_s26 }
0x1936   : > { %v2456_v43 = vpop.permute.xlu0 %2455  ;;  %v2568_v46 = vpop.permute.xlu1 %2567 }
0x1937   : > { %v2461_v44 = vsel %vm798_vm3, %v2456_v43, 0  ;;  %v2573_v47 = vsel %vm798_vm3, %v2568_v46, 0 }
0x1938   : > { %4605 = vmatpush3.bf16.xpose.msra.mxu0 %v2461_v44 }
0x1939   : > { %4616 = vmatprep.subr.bf16.mxu0 %v5107_v3 }
0x193a   : > { %v2566_v48 = vpop.permute.xlu0 %2565 }
0x193f   : > { %4607 = vmatmul.mubr.msk.bf16.vlgmr.msra.gmra.mxu0 %vm798_vm3, %v5677_v41 }
0x1940   : > { %4617 = vmatpush3.bf16.xpose.msra.mxu0 %v2573_v47  ;;  %4618 = vmatprep.mubr.msk.bf16.mxu0 %vm5108_vm1, %v5107_v3 }
0x1941   : > { %4628 = vmatprep.subr.bf16.mxu0 %v5107_v3 }
0x1947   : > { %4619 = vmatmul.mubr.msk.bf16.vlgmr.msra.gmra.mxu0 %vm798_vm3, %v2566_v48 }
0x1948   : > { %4630 = vmatprep.mubr.msk.bf16.mxu0 %vm5108_vm1, %v5107_v3  ;;  %4629 = vmatpush3.bf16.msra.mxu0 %v5730_v27 }
0x1949   : > { %4640 = vmatprep.subr.bf16.mxu0 %v5107_v3 }
0x19ff   : > { %v2497_v49 = vpop.f32.mrf.mxu0 }
0x1a00   : > { %v2503_v50 = vmul.f32 0.35355338, %v2497_v49 }
0x1a01   : > { %v4608_v45 = vpop.f32.mrf.mxu0 }
0x1a02   : > { %v2504_v51 = vsel %vm798_vm3, %v2503_v50, -inf }
0x1a03   : > { %2505 = vmax.xlane.f32.xlu0 %v2504_v51  ;;  %v2500_v23 = vpop.f32.mrf.mxu0 }
0x1a05   : > { %v4609_v59 = vpop.f32.mrf.mxu0 }
0x1a07   : > { %v2609_v24 = vpop.f32.mrf.mxu0 }
0x1a08   : > { %v2615_v29 = vmul.f32 0.35355338, %v2609_v24 }
0x1a09   : > { %v4620_v53 = vpop.f32.mrf.mxu0 }
0x1a0a   : > { %v2616_v54 = vsel %vm798_vm3, %v2615_v29, -inf }
0x1a0b   : > { %2617 = vmax.xlane.f32.xlu1 %v2616_v54  ;;  %v2612_v55 = vpop.f32.mrf.mxu0 }
0x1a0d   : > { %v4621_v56 = vpop.f32.mrf.mxu0 }
0x1a1c   : > { %2628 = vrot.lane.b32.xlu1 %v5677_v41, %s6043_s28 }
0x1a20   : > { %2769 = vrot.lane.b32.xlu1 %v5677_v41, %s6044_s30 }
0x1a8c   : > { %v2506_v18 = vpop.xlane.xlu0 %2505 }
0x1a8d   : > { %v2507_v16 = vsub.f32 %v2503_v50, %v2506_v18 }
0x1a8f   : > { %v2508_v4 = vmul.f32 1.442695, %v2507_v16 }
0x1a91   : > { %4918 = vpow2.f32 %v2508_v4 }
0x1a94   : > { %v2618_v57 = vpop.xlane.xlu1 %2617 }
0x1a95   : > { %v2619_v58 = vsub.f32 %v2615_v29, %v2618_v57 }
0x1a97   : > { %v2620_v60 = vmul.f32 1.442695, %v2619_v58 }
0x1a98   : > { %v2629_v10 = vpop.permute.xlu1 %2628 }
0x1a99   : > { %4920 = vpow2.f32 %v2620_v60  ;;  %v2634_v11 = vsel %vm863_vm4, %v2629_v10, 0 }
0x1a9c   : > { %v2770_v44 = vpop.permute.xlu1 %2769 }
0x1a9e   : > { %v4919_v61 = vpop.eup %4918 }
0x1a9f   : > { %v2510_v62 = vsel %vm798_vm3, %v4919_v61, 0.0 }
0x1aa0   : > { %2511 = vadd.xlane.f32.xlu0 %v2510_v62  ;;  %v2315_v62 = vadd.f32 %v5633_v9, %v5590_v30 }
0x1aa6   : > { %v4921_v63 = vpop.eup %4920 }
0x1aa7   : > { %v2622_v33 = vsel %vm798_vm3, %v4921_v63, 0.0 }
0x1aa8   : > { %2623 = vadd.xlane.f32.xlu0 %v2622_v33 }
0x1abe   : > { %2516 = vrot.lane.b32.xlu0 %v5677_v41, %s6036_s23 }
0x1ac2   : > { %2771 = vrot.lane.b32.xlu0 %v5677_v41, %s6045_s20 }
0x1b29   : > { %v2512_v0 = vpop.xlane.xlu0 %2511 }
0x1b2a   : > { %4922 = vrcp.f32 %v2512_v0 }
0x1b31   : > { %v2624_v1 = vpop.xlane.xlu0 %2623 }
0x1b32   : > { %4924 = vrcp.f32 %v2624_v1 }
0x1b35   : > { %v2517_v2 = vpop.permute.xlu0 %2516 }
0x1b36   : > { %v2522_v5 = vsel %vm863_vm4, %v2517_v2, 0 }
0x1b37   : > { %v4923_v6 = vpop.eup %4922  ;;  %4611 = vmatpush3.bf16.msra.mxu1 %v2522_v5 }
0x1b38   : > { %4622 = vmatprep.subr.bf16.mxu1 %v5107_v3  ;;  %v2514_v8 = vmul.f32 %v4923_v6, %v4919_v61 }
0x1b39   : > { %v2772_v36 = vpop.permute.xlu0 %2771 }
0x1b3a   : > { %v2515_v7 = vpack.c.bf16 %v2514_v8, %v2514_v8  ;;  %v2777_v52 = vsel %vm798_vm3, %v2772_v36, 0 }
0x1b3c   : > { %4613 = vmatmul.mubr.msk.bf16.vlgmr.msra.gmra.mxu1 %vm798_vm3, %v2515_v7 }
0x1b3d   : > { %4623 = vmatpush3.bf16.msra.mxu1 %v2634_v11  ;;  %4624 = vmatprep.mubr.msk.bf16.mxu1 %vm5108_vm1, %v5107_v3 }
0x1b3e   : > { %4634 = vmatprep.subr.bf16.mxu1 %v5107_v3 }
0x1b3f   : > { %v4925_v12 = vpop.eup %4924 }
0x1b40   : > { %v2626_v13 = vmul.f32 %v4925_v12, %v4921_v63  ;;  %v2317_v63 = vmul.f32 %v2315_v62, %v2315_v62 }
0x1b42   : > { %v2627_v21 = vpack.c.bf16 %v2626_v13, %v2626_v13  ;;  %v2321_v33 = vsel %vm557_vm2, %v2317_v63, 0.0 }
0x1b44   : > { %4625 = vmatmul.mubr.msk.bf16.vlgmr.msra.gmra.mxu1 %vm798_vm3, %v2627_v21 }
0x1b45   : > { %4636 = vmatprep.mubr.msk.bf16.mxu1 %vm5108_vm1, %v5107_v3  ;;  %4635 = vmatpush3.bf16.msra.mxu1 %v5722_v19 }
0x1b46   : > { %4646 = vmatprep.subr.bf16.mxu1 %v5107_v3 }
0x1bfc   : > { %v2558_v20 = vpop.f32.mrf.mxu1 }
0x1bfd   : > { %v2564_v28 = vpack.c.bf16 %v2558_v20, %v2558_v20  ;;  %v5778_v20 = vsel %vm863_vm4, %v4204_v22, 0 }
0x1bfe   : > { %v4614_v31 = vpop.f32.mrf.mxu1 }
0x1bff   : > { %4637 = vmatmul.mubr.msk.bf16.vlgmr.msra.gmra.mxu1 %vm798_vm3, %v2564_v28 }
0x1c00   : > { %v2561_v34 = vpop.f32.mrf.mxu1  ;;  %4648 = vmatprep.mubr.msk.bf16.mxu1 %vm5108_vm1, %v5107_v3 }
0x1c02   : > { %v4615_v35 = vpop.f32.mrf.mxu1 }
0x1c04   : > { %v2670_v39 = vpop.f32.mrf.mxu1 }
0x1c05   : > { %v2676_v40 = vpack.c.bf16 %v2670_v39, %v2670_v39 }
0x1c06   : > { %v4626_v37 = vpop.f32.mrf.mxu1 }
0x1c07   : > { %4631 = vmatmul.mubr.msk.bf16.vlgmr.msra.gmra.mxu0 %vm798_vm3, %v2676_v40 }
0x1c08   : > { %4641 = vmatpush3.bf16.xpose.msra.mxu0 %v2777_v52  ;;  %v2673_v42 = vpop.f32.mrf.mxu1  ;;  %4642 = vmatprep.mubr.msk.bf16.mxu0 %vm5108_vm1, %v5107_v3 }
0x1c09   : > { %4652 = vmatprep.subr.bf16.mxu0 %v5107_v3 }
0x1c0a   : > { %v4627_v43 = vpop.f32.mrf.mxu1 }
0x1c0f   : > { %4643 = vmatmul.mubr.msk.bf16.vlgmr.msra.gmra.mxu0 %vm798_vm3, %v2770_v44 }
0x1c10   : > { %4654 = vmatprep.mubr.msk.bf16.mxu0 %vm5108_vm1, %v5107_v3  ;;  %4653 = vmatpush3.bf16.msra.mxu0 %v5778_v20 }
0x1c11   : > { %4664 = vmatprep.subr.bf16.mxu0 %v5107_v3 }
0x1cbf   : > { %v2763_v46 = vpop.f32.mrf.mxu1 }
0x1cc1   : > { %v4638_v47 = vpop.f32.mrf.mxu1 }
0x1cc3   : > { %v2766_v48 = vpop.f32.mrf.mxu1 }
0x1cc5   : > { %v4639_v49 = vpop.f32.mrf.mxu1 }
0x1cc7   : > { %v2717_v50 = vpop.f32.mrf.mxu0 }
0x1cc8   : > { %v5745_v45 = vadd.f32 %v2763_v46, %v2717_v50 }
0x1cc9   : > { %v4632_v51 = vpop.f32.mrf.mxu0 }
0x1ccb   : > { %v2720_v23 = vpop.f32.mrf.mxu0 }
0x1ccd   : > { %v4633_v59 = vpop.f32.mrf.mxu0 }
0x1ccf   : > { %v2813_v24 = vpop.f32.mrf.mxu0 }
0x1cd0   : > { %v2819_v29 = vmul.f32 0.35355338, %v2813_v24 }
0x1cd1   : > { %v4644_v53 = vpop.f32.mrf.mxu0 }
0x1cd2   : > { %v2820_v54 = vsel %vm798_vm3, %v2819_v29, -inf }
0x1cd3   : > { %2821 = vmax.xlane.f32.xlu0 %v2820_v54  ;;  %v2816_v55 = vpop.f32.mrf.mxu0 }
0x1cd5   : > { %v4645_v56 = vpop.f32.mrf.mxu0 }
0x1ce9   : > { %2832 = vrot.lane.b32.xlu0 %v5677_v41, %s6046_s22 }
0x1ced   : > { %2928 = vrot.lane.b32.xlu0 %v5677_v41, %s6047_s29 }
0x1d5c   : > { %v2822_v18 = vpop.xlane.xlu0 %2821 }
0x1d5d   : > { %v2823_v16 = vsub.f32 %v2819_v29, %v2822_v18 }
0x1d5f   : > { %v2824_v4 = vmul.f32 1.442695, %v2823_v16 }
0x1d60   : > { %v2833_v57 = vpop.permute.xlu0 %2832 }
0x1d61   : > { %4926 = vpow2.f32 %v2824_v4  ;;  %v2838_v58 = vsel %vm863_vm4, %v2833_v57, 0 }
0x1d62   : > { %4647 = vmatpush3.bf16.msra.mxu1 %v2838_v58 }
0x1d63   : > { %4658 = vmatprep.subr.bf16.mxu1 %v5107_v3 }
0x1d64   : > { %v2929_v30 = vpop.permute.xlu0 %2928 }
0x1d6e   : > { %v4927_v60 = vpop.eup %4926 }
0x1d6f   : > { %v2826_v61 = vsel %vm798_vm3, %v4927_v60, 0.0 }
0x1d70   : > { %2827 = vadd.xlane.f32.xlu1 %v2826_v61 }
0x1d81   : > { %2930 = vrot.lane.b32.xlu1 %v5677_v41, %s6048_s0 }
0x1da5   : > { %2322 = vadd.xlane.f32.xlu1 %v2321_v33 }
0x1df9   : > { %v2828_v0 = vpop.xlane.xlu1 %2827 }
0x1dfa   : > { %4928 = vrcp.f32 %v2828_v0 }
0x1dfd   : > { %v2931_v5 = vpop.permute.xlu1 %2930 }
0x1dfe   : > { %v2936_v8 = vsel %vm798_vm3, %v2931_v5, 0 }
0x1e07   : > { %v4929_v1 = vpop.eup %4928 }
0x1e08   : > { %v2830_v2 = vmul.f32 %v4929_v1, %v4927_v60 }
0x1e0a   : > { %v2831_v6 = vpack.c.bf16 %v2830_v2, %v2830_v2 }
0x1e0c   : > { %4649 = vmatmul.mubr.msk.bf16.vlgmr.msra.gmra.mxu1 %vm798_vm3, %v2831_v6 }
0x1e0d   : > { %4659 = vmatpush3.bf16.xpose.msra.mxu1 %v2936_v8  ;;  %4660 = vmatprep.mubr.msk.bf16.mxu1 %vm5108_vm1, %v5107_v3 }
0x1e0e   : > { %4670 = vmatprep.subr.bf16.mxu1 %v5107_v3 }
0x1e14   : > { %4661 = vmatmul.mubr.msk.bf16.vlgmr.msra.gmra.mxu1 %vm798_vm3, %v2929_v30 }
0x1e15   : > { %4672 = vmatprep.mubr.msk.bf16.mxu1 %vm5108_vm1, %v5107_v3 }
0x1e2e   : > { %v2323_v9 = vpop.xlane.xlu1 %2322 }
0x1e2f   : > { %v2325_v10 = vmul.f32 0.03125, %v2323_v9 }
0x1e31   : > { %v2327_v7 = vadd.f32 1e-06, %v2325_v10 }
0x1e33   : > { %4930 = vrsqrt.f32 %v2327_v7 }
0x1e40   : > { %v4931_v11 = vpop.eup %4930 }
0x1e41   : > { %v2331_v12 = vmul.f32 %v4931_v11, %v2315_v62 }
0x1e43   : > { %v5769_v13 = vmul.f32 %v5639_v15, %v2331_v12 }
0x1e45   : > { %v3110_v21 = vmul.f32 %v5769_v13, %v5769_v13 }
0x1e47   : > { %v3111_v17 = vsel %vm557_vm2, %v3110_v21, 0.0 }
0x1e48   : > { %3112 = vadd.xlane.f32.xlu1 %v3111_v17 }
0x1ecc   : > { %v2874_v28 = vpop.f32.mrf.mxu1 }
0x1ecd   : > { %v2880_v15 = vpack.c.bf16 %v2874_v28, %v2874_v28 }
0x1ece   : > { %v4650_v31 = vpop.f32.mrf.mxu1 }
0x1ecf   : > { %4655 = vmatmul.mubr.msk.bf16.vlgmr.msra.gmra.mxu0 %vm798_vm3, %v2880_v15 }
0x1ed0   : > { %v2877_v34 = vpop.f32.mrf.mxu1  ;;  %4666 = vmatprep.mubr.msk.bf16.mxu0 %vm5108_vm1, %v5107_v3 }
0x1ed1   : > { %v3113_v24 = vpop.xlane.xlu1 %3112 }
0x1ed2   : > { %v4651_v35 = vpop.f32.mrf.mxu1  ;;  %v3114_v29 = vmul.f32 0.03125, %v3113_v24 }
0x1ed4   : > { %v2972_v36 = vpop.f32.mrf.mxu1  ;;  %v3115_v53 = vadd.f32 1e-06, %v3114_v29 }
0x1ed5   : > { %v2978_v39 = vmul.f32 0.35355338, %v2972_v36 }
0x1ed6   : > { %v4662_v40 = vpop.f32.mrf.mxu1 }
0x1ed7   : > { %v2979_v37 = vsel %vm798_vm3, %v2978_v39, -inf }
0x1ed8   : > { %2980 = vmax.xlane.f32.xlu0 %v2979_v37  ;;  %v2975_v52 = vpop.f32.mrf.mxu1 }
0x1eda   : > { %v4663_v42 = vpop.f32.mrf.mxu1 }
0x1f61   : > { %v2981_v43 = vpop.xlane.xlu0 %2980 }
0x1f62   : > { %v2982_v44 = vsub.f32 %v2978_v39, %v2981_v43 }
0x1f64   : > { %v2983_v46 = vmul.f32 1.442695, %v2982_v44 }
0x1f66   : > { %4932 = vpow2.f32 %v2983_v46 }
0x1f67   : > { %4934 = vrsqrt.f32 %v3115_v53 }
0x1f73   : > { %v4933_v47 = vpop.eup %4932 }
0x1f74   : > { %v2985_v48 = vsel %vm798_vm3, %v4933_v47, 0.0 }
0x1f75   : > { %2986 = vadd.xlane.f32.xlu0 %v2985_v48 }
0x1f8b   : > { %2991 = vrot.lane.b32.xlu0 %v5677_v41, %s6042_s27  ;;  %v4935_v41 = vpop.eup %4934 }
0x1f8c   : > { %v3117_v4 = vmul.f32 %v4935_v41, %v5769_v13 }
0x1f8e   : > { %v3118_v57 = vmul.f32 %v5664_v32, %v3117_v4 }
0x1f8f   : > { %v2921_v49 = vpop.f32.mrf.mxu0 }
0x1f90   : > { %v5790_v50 = vadd.f32 %v2921_v49, %v5745_v45  ;;  %v3119_v58 = vpack.c.bf16 %v3118_v57, %v3118_v57 }
0x1f91   : > { %v4656_v51 = vpop.f32.mrf.mxu0 }
0x1f93   : > { %v2924_v23 = vpop.f32.mrf.mxu0 }
0x1f95   : > { %v4657_v59 = vpop.f32.mrf.mxu0 }
0x1ffe   : > { %v2987_v54 = vpop.xlane.xlu0 %2986 }
0x1fff   : > { %4936 = vrcp.f32 %v2987_v54 }
0x2002   : > { %v2992_v55 = vpop.permute.xlu0 %2991 }
0x2003   : > { %v2997_v56 = vsel %vm863_vm4, %v2992_v55, 0 }
0x2004   : > { %4665 = vmatpush3.bf16.msra.mxu0 %v2997_v56 }
0x2005   : > { %4676 = vmatprep.subr.bf16.mxu0 %v5107_v3 }
0x200c   : > { %v4937_v18 = vpop.eup %4936 }
0x200d   : > { %v2989_v16 = vmul.f32 %v4937_v18, %v4933_v47 }
0x200f   : > { %v2990_v45 = vpack.c.bf16 %v2989_v16, %v2989_v16 }
0x2011   : > { %4667 = vmatmul.mubr.msk.bf16.vlgmr.msra.gmra.mxu0 %vm798_vm3, %v2990_v45 }
0x2012   : > { %4677 = vmatpush3.bf16.msra.mxu0 %v5650_v25  ;;  %4680 = vmatprep.mubr.msk.bf16.mxu0 %vm5108_vm1, %v5107_v3  ;;  %v4205_v25 = vld [vmem:[%s6012_s7 + $0x1c] sm:$0xf] }
0x2013   : > { %4678 = vmatprep.subr.bf16.mxu0 %v5107_v3  ;;  %v5810_v60 = vsel %vm863_vm4, %v4205_v25, 0 }
0x2014   : > { %4671 = vmatpush3.bf16.msra.mxu1 %v5810_v60 }
0x2015   : > { %4684 = vmatprep.subr.bf16.mxu1 %v5107_v3 }
0x2016   : > { %4679 = vmatpush3.bf16.msra.mxu0 %v5656_v26 }
0x2017   : > { %4690 = vmatprep.subr.bf16.mxu0 %v5107_v3 }
0x2019   : > { %4681 = vmatmul.mubr.msk.bf16.vlgmr.msra.gmra.mxu0 %vm557_vm2, %v3119_v58 }
0x201a   : > { %4692 = vmatprep.mubr.msk.bf16.mxu0 %vm5108_vm1, %v5107_v3 }
0x20d1   : > { %v3033_v26 = vpop.f32.mrf.mxu0 }
0x20d2   : > { %v3039_v32 = vpack.c.bf16 %v3033_v26, %v3033_v26 }
0x20d3   : > { %v4668_v61 = vpop.f32.mrf.mxu0 }
0x20d4   : > { %4673 = vmatmul.mubr.msk.bf16.vlgmr.msra.gmra.mxu1 %vm798_vm3, %v3039_v32 }
0x20d5   : > { %v3036_v62 = vpop.f32.mrf.mxu0  ;;  %4686 = vmatprep.mubr.msk.bf16.mxu1 %vm5108_vm1, %v5107_v3 }
0x20d7   : > { %v4669_v63 = vpop.f32.mrf.mxu0 }
0x20d9   : > { %v3157_v33 = vpop.f32.mrf.mxu0 }
0x20da   : > { %v3158_v0 = vadd.f32 %v5674_v38, %v3157_v33 }
0x20db   : > { %v4682_v1 = vpop.f32.mrf.mxu0 }
0x20dc   : > { %v5818_v2 = vpack.c.bf16 %v3158_v0, %v3158_v0 }
0x20dd   : > { %v3160_v5 = vpop.f32.mrf.mxu0 }
0x20de   : > { %3275 = vrot.lane.b32.xlu0 %v5818_v2, %s5111_s26  ;;  %3165 = vrot.lane.b32.xlu1 %v5818_v2, %s5110_s18 }
0x20df   : > { %v4683_v6 = vpop.f32.mrf.mxu0 }
0x20e2   : > { %3277 = vrot.lane.b32.xlu1 %v5818_v2, %s5109_s25  ;;  %s6049_s25 = smov 64  }
0x2150   : > { %v3166_v8 = vpop.permute.xlu1 %3165  ;;  %v3276_v10 = vpop.permute.xlu0 %3275 }
0x2151   : > { %v3171_v30 = vsel %vm798_vm3, %v3166_v8, 0 }
0x2152   : > { %4685 = vmatpush3.bf16.xpose.msra.mxu1 %v3171_v30 }
0x2153   : > { %4696 = vmatprep.subr.bf16.mxu1 %v5107_v3 }
0x2154   : > { %v3278_v38 = vpop.permute.xlu1 %3277 }
0x2155   : > { %v3283_v9 = vsel %vm798_vm3, %v3278_v38, 0 }
0x2159   : > { %4687 = vmatmul.mubr.msk.bf16.vlgmr.msra.gmra.mxu1 %vm798_vm3, %v5818_v2 }
0x215a   : > { %4697 = vmatpush3.bf16.xpose.msra.mxu1 %v3283_v9  ;;  %4698 = vmatprep.mubr.msk.bf16.mxu1 %vm5108_vm1, %v5107_v3 }
0x215b   : > { %4708 = vmatprep.subr.bf16.mxu1 %v5107_v3 }
0x2161   : > { %4699 = vmatmul.mubr.msk.bf16.vlgmr.msra.gmra.mxu1 %vm798_vm3, %v3276_v10 }
0x2162   : > { %4709 = vmatpush3.bf16.msra.mxu1 %v5730_v27  ;;  %4710 = vmatprep.mubr.msk.bf16.mxu1 %vm5108_vm1, %v5107_v3 }
0x2163   : > { %4720 = vmatprep.subr.bf16.mxu1 %v5107_v3 }
0x2194   : > { %v3080_v7 = vpop.f32.mrf.mxu1 }
0x2195   : > { %v5840_v11 = vadd.f32 %v3080_v7, %v5790_v50 }
0x2196   : > { %v4674_v12 = vpop.f32.mrf.mxu1 }
0x2198   : > { %v3083_v21 = vpop.f32.mrf.mxu1 }
0x219a   : > { %v4675_v17 = vpop.f32.mrf.mxu1 }
0x2219   : > { %v3207_v22 = vpop.f32.mrf.mxu1 }
0x221a   : > { %v3213_v28 = vmul.f32 0.35355338, %v3207_v22 }
0x221b   : > { %v4688_v15 = vpop.f32.mrf.mxu1 }
0x221c   : > { %v3214_v31 = vsel %vm798_vm3, %v3213_v28, -inf }
0x221d   : > { %3215 = vmax.xlane.f32.xlu1 %v3214_v31  ;;  %v3210_v34 = vpop.f32.mrf.mxu1 }
0x221f   : > { %v4689_v27 = vpop.f32.mrf.mxu1 }
0x2221   : > { %v3319_v35 = vpop.f32.mrf.mxu1 }
0x2222   : > { %v3325_v36 = vmul.f32 0.35355338, %v3319_v35 }
0x2223   : > { %v4700_v39 = vpop.f32.mrf.mxu1 }
0x2224   : > { %v3326_v40 = vsel %vm798_vm3, %v3325_v36, -inf }
0x2225   : > { %3327 = vmax.xlane.f32.xlu0 %v3326_v40  ;;  %v3322_v37 = vpop.f32.mrf.mxu1 }
0x2227   : > { %v4701_v52 = vpop.f32.mrf.mxu1 }
0x22a6   : > { %v3216_v42 = vpop.xlane.xlu1 %3215 }
0x22a7   : > { %v3217_v43 = vsub.f32 %v3213_v28, %v3216_v42 }
0x22a9   : > { %v3218_v44 = vmul.f32 1.442695, %v3217_v43 }
0x22ab   : > { %4938 = vpow2.f32 %v3218_v44 }
0x22ae   : > { %v3328_v46 = vpop.xlane.xlu0 %3327 }
0x22af   : > { %v3329_v47 = vsub.f32 %v3325_v36, %v3328_v46 }
0x22b1   : > { %v3330_v48 = vmul.f32 1.442695, %v3329_v47 }
0x22b3   : > { %4940 = vpow2.f32 %v3330_v48 }
0x22b8   : > { %v4939_v49 = vpop.eup %4938 }
0x22b9   : > { %v3220_v50 = vsel %vm798_vm3, %v4939_v49, 0.0 }
0x22ba   : > { %3221 = vadd.xlane.f32.xlu0 %v3220_v50 }
0x22c0   : > { %v4941_v51 = vpop.eup %4940 }
0x22c1   : > { %v3332_v23 = vsel %vm798_vm3, %v4941_v51, 0.0 }
0x22c2   : > { %3333 = vadd.xlane.f32.xlu1 %v3332_v23 }
0x22d0   : > { %3226 = vrot.lane.b32.xlu0 %v5818_v2, %s6049_s25 }
0x22d3   : > { %3338 = vrot.lane.b32.xlu1 %v5818_v2, %s6043_s28 }
0x22d4   : > { %3473 = vrot.lane.b32.xlu0 %v5818_v2, %s6044_s30 }
0x22d7   : > { %3475 = vrot.lane.b32.xlu1 %v5818_v2, %s6045_s20 }
0x2343   : > { %v3222_v59 = vpop.xlane.xlu0 %3221 }
0x2344   : > { %4942 = vrcp.f32 %v3222_v59 }
0x2347   : > { %v3227_v24 = vpop.permute.xlu0 %3226 }
0x2348   : > { %v3232_v29 = vsel %vm863_vm4, %v3227_v24, 0 }
0x2349   : > { %4691 = vmatpush3.bf16.msra.mxu0 %v3232_v29 }
0x234a   : > { %4702 = vmatprep.subr.bf16.mxu0 %v5107_v3 }
0x234b   : > { %v3334_v53 = vpop.xlane.xlu1 %3333  ;;  %v3474_v5 = vpop.permute.xlu0 %3473 }
0x234c   : > { %4944 = vrcp.f32 %v3334_v53 }
0x234f   : > { %v3339_v56 = vpop.permute.xlu1 %3338 }
0x2350   : > { %v3344_v18 = vsel %vm863_vm4, %v3339_v56, 0 }
0x2351   : > { %v4943_v54 = vpop.eup %4942 }
0x2352   : > { %v3224_v55 = vmul.f32 %v4943_v54, %v4939_v49 }
0x2353   : > { %v3476_v61 = vpop.permute.xlu1 %3475 }
0x2354   : > { %v3225_v41 = vpack.c.bf16 %v3224_v55, %v3224_v55 }
0x2356   : > { %4693 = vmatmul.mubr.msk.bf16.vlgmr.msra.gmra.mxu0 %vm798_vm3, %v3225_v41 }
0x2357   : > { %4703 = vmatpush3.bf16.msra.mxu0 %v3344_v18  ;;  %4704 = vmatprep.mubr.msk.bf16.mxu0 %vm5108_vm1, %v5107_v3 }
0x2358   : > { %4714 = vmatprep.subr.bf16.mxu0 %v5107_v3 }
0x2359   : > { %v4945_v16 = vpop.eup %4944 }
0x235a   : > { %v3336_v45 = vmul.f32 %v4945_v16, %v4941_v51 }
0x235c   : > { %v3337_v4 = vpack.c.bf16 %v3336_v45, %v3336_v45 }
0x235e   : > { %4705 = vmatmul.mubr.msk.bf16.vlgmr.msra.gmra.mxu0 %vm798_vm3, %v3337_v4  ;;  %v3087_v4 = vadd.f32 %v5840_v11, %v5642_v14 }
0x235f   : > { %4715 = vmatpush3.bf16.msra.mxu0 %v5722_v19  ;;  %4716 = vmatprep.mubr.msk.bf16.mxu0 %vm5108_vm1, %v5107_v3  ;;  %v3481_v19 = vsel %vm798_vm3, %v3476_v61, 0 }
0x2360   : > { %4726 = vmatprep.subr.bf16.mxu0 %v5107_v3 }
0x2416   : > { %v3268_v57 = vpop.f32.mrf.mxu0 }
0x2417   : > { %v3274_v58 = vpack.c.bf16 %v3268_v57, %v3268_v57  ;;  %v4236_v57 = vld [vmem:[%s6013_s8 + $0x1] ss:$0 sm:$0xff] }
0x2418   : > { %v4694_v25 = vpop.f32.mrf.mxu0 }
0x2419   : > { %4717 = vmatmul.mubr.msk.bf16.vlgmr.msra.gmra.mxu0 %vm798_vm3, %v3274_v58  ;;  %v3094_v58 = vadd.f32 %v4236_v57, %v3087_v4  ;;  %v4858_v4 = vld [vmem:[%s6017_s12 + $0x38] sm:$0xff]  }
0x241a   : > { %v3271_v26 = vpop.f32.mrf.mxu0  ;;  %4728 = vmatprep.mubr.msk.bf16.mxu0 %vm5108_vm1, %v5107_v3 }
0x241b   : > { %v3095_v26 = vmul.f32 %v3094_v58, %v3094_v58 }
0x241c   : > { %v4695_v32 = vpop.f32.mrf.mxu0 }
0x241d   : > { %v3096_v32 = vsel %vm557_vm2, %v3095_v26, 0.0 }
0x241e   : > { %v3380_v62 = vpop.f32.mrf.mxu0 }
0x241f   : > { %v3386_v63 = vpack.c.bf16 %v3380_v62, %v3380_v62 }
0x2420   : > { %v4706_v33 = vpop.f32.mrf.mxu0 }
0x2421   : > { %4711 = vmatmul.mubr.msk.bf16.vlgmr.msra.gmra.mxu1 %vm798_vm3, %v3386_v63 }
0x2422   : > { %4721 = vmatpush3.bf16.xpose.msra.mxu1 %v3481_v19  ;;  %v3383_v0 = vpop.f32.mrf.mxu0  ;;  %4722 = vmatprep.mubr.msk.bf16.mxu1 %vm5108_vm1, %v5107_v3 }
0x2423   : > { %4732 = vmatprep.subr.bf16.mxu1 %v5107_v3 }
0x2424   : > { %v4707_v1 = vpop.f32.mrf.mxu0 }
0x2429   : > { %4723 = vmatmul.mubr.msk.bf16.vlgmr.msra.gmra.mxu1 %vm798_vm3, %v3474_v5 }
0x242a   : > { %4733 = vmatpush3.bf16.msra.mxu1 %v5778_v20  ;;  %4734 = vmatprep.mubr.msk.bf16.mxu1 %vm5108_vm1, %v5107_v3 }
0x242b   : > { %4744 = vmatprep.subr.bf16.mxu1 %v5107_v3 }
0x24d9   : > { %v3467_v6 = vpop.f32.mrf.mxu0 }
0x24db   : > { %v4718_v8 = vpop.f32.mrf.mxu0 }
0x24dd   : > { %v3470_v30 = vpop.f32.mrf.mxu0 }
0x24df   : > { %v4719_v38 = vpop.f32.mrf.mxu0 }
0x24e1   : > { %v3424_v9 = vpop.f32.mrf.mxu1 }
0x24e2   : > { %v5879_v10 = vadd.f32 %v3467_v6, %v3424_v9 }
0x24e3   : > { %v4712_v7 = vpop.f32.mrf.mxu1 }
0x24e5   : > { %v3427_v12 = vpop.f32.mrf.mxu1 }
0x24e7   : > { %v4713_v21 = vpop.f32.mrf.mxu1 }
0x24e9   : > { %v3517_v17 = vpop.f32.mrf.mxu1 }
0x24ea   : > { %v3523_v22 = vmul.f32 0.35355338, %v3517_v17 }
0x24eb   : > { %v4724_v28 = vpop.f32.mrf.mxu1 }
0x24ec   : > { %v3524_v20 = vsel %vm798_vm3, %v3523_v22, -inf }
0x24ed   : > { %3525 = vmax.xlane.f32.xlu1 %v3524_v20  ;;  %v3520_v15 = vpop.f32.mrf.mxu1  ;;  %v4237_v20 = vld [vmem:[%s6014_s9 + $0x1] ss:$0 sm:$0xff] }
0x24ef   : > { %v4725_v31 = vpop.f32.mrf.mxu1 }
0x24fe   : > { %3631 = vrot.lane.b32.xlu1 %v5818_v2, %s6048_s0 }
0x2502   : > { %3629 = vrot.lane.b32.xlu1 %v5818_v2, %s6047_s29 }
0x2576   : > { %v3526_v34 = vpop.xlane.xlu1 %3525 }
0x2577   : > { %v3527_v27 = vsub.f32 %v3523_v22, %v3526_v34 }
0x2579   : > { %v3528_v35 = vmul.f32 1.442695, %v3527_v27 }
0x257a   : > { %v3632_v44 = vpop.permute.xlu1 %3631 }
0x257b   : > { %4946 = vpow2.f32 %v3528_v35  ;;  %v3637_v47 = vsel %vm798_vm3, %v3632_v44, 0 }
0x257e   : > { %v3630_v48 = vpop.permute.xlu1 %3629 }
0x2588   : > { %v4947_v36 = vpop.eup %4946 }
0x2589   : > { %v3530_v39 = vsel %vm798_vm3, %v4947_v36, 0.0 }
0x258a   : > { %3531 = vadd.xlane.f32.xlu0 %v3530_v39 }
0x25a0   : > { %3536 = vrot.lane.b32.xlu0 %v5818_v2, %s6046_s22 }
0x2613   : > { %v3532_v40 = vpop.xlane.xlu0 %3531 }
0x2614   : > { %4948 = vrcp.f32 %v3532_v40 }
0x2617   : > { %v3537_v37 = vpop.permute.xlu0 %3536 }
0x2618   : > { %v3542_v52 = vsel %vm863_vm4, %v3537_v37, 0 }
0x2619   : > { %4727 = vmatpush3.bf16.msra.mxu0 %v3542_v52 }
0x261a   : > { %4738 = vmatprep.subr.bf16.mxu0 %v5107_v3 }
0x2621   : > { %v4949_v42 = vpop.eup %4948 }
0x2622   : > { %v3534_v43 = vmul.f32 %v4949_v42, %v4947_v36 }
0x2624   : > { %v3535_v46 = vpack.c.bf16 %v3534_v43, %v3534_v43 }
0x2626   : > { %4729 = vmatmul.mubr.msk.bf16.vlgmr.msra.gmra.mxu0 %vm798_vm3, %v3535_v46 }
0x2627   : > { %4739 = vmatpush3.bf16.xpose.msra.mxu0 %v3637_v47  ;;  %4740 = vmatprep.mubr.msk.bf16.mxu0 %vm5108_vm1, %v5107_v3 }
0x2628   : > { %4750 = vmatprep.subr.bf16.mxu0 %v5107_v3 }
0x262e   : > { %4741 = vmatmul.mubr.msk.bf16.vlgmr.msra.gmra.mxu0 %vm798_vm3, %v3630_v48 }
0x262f   : > { %4751 = vmatpush3.bf16.msra.mxu0 %v5810_v60  ;;  %4752 = vmatprep.mubr.msk.bf16.mxu0 %vm5108_vm1, %v5107_v3 }
0x2630   : > { %4764 = vmatprep.subr.bf16.mxu0 %v5107_v3 }
0x26e6   : > { %v3578_v49 = vpop.f32.mrf.mxu0 }
0x26e7   : > { %v3584_v50 = vpack.c.bf16 %v3578_v49, %v3578_v49  ;;  %v4856_v49 = vld [vmem:[%s6016_s11 + $0x18] sm:$0xff]  }
0x26e8   : > { %v4730_v51 = vpop.f32.mrf.mxu0 }
0x26e9   : > { %4735 = vmatmul.mubr.msk.bf16.vlgmr.msra.gmra.mxu1 %vm798_vm3, %v3584_v50  ;;  %v4857_v50 = vld [vmem:[%s6016_s11 + $0x10] sm:$0xff]  }
0x26ea   : > { %v3581_v23 = vpop.f32.mrf.mxu0  ;;  %4746 = vmatprep.mubr.msk.bf16.mxu1 %vm5108_vm1, %v5107_v3 }
0x26ec   : > { %v4731_v59 = vpop.f32.mrf.mxu0 }
0x26ee   : > { %v3673_v24 = vpop.f32.mrf.mxu0 }
0x26ef   : > { %v3679_v29 = vmul.f32 0.35355338, %v3673_v24 }
0x26f0   : > { %v4742_v53 = vpop.f32.mrf.mxu0 }
0x26f1   : > { %v3680_v60 = vsel %vm798_vm3, %v3679_v29, -inf }
0x26f2   : > { %3681 = vmax.xlane.f32.xlu0 %v3680_v60  ;;  %v3676_v54 = vpop.f32.mrf.mxu0 }
0x26f4   : > { %v4743_v55 = vpop.f32.mrf.mxu0 }
0x2708   : > { %3692 = vrot.lane.b32.xlu0 %v5818_v2, %s6042_s27 }
0x277b   : > { %v3682_v56 = vpop.xlane.xlu0 %3681 }
0x277c   : > { %v3683_v41 = vsub.f32 %v3679_v29, %v3682_v56  ;;  %v4251_v56 = vld [vmem:[%s6015_s10 + $0x1] ss:$0 sm:$0xff] }
0x277e   : > { %v3684_v18 = vmul.f32 1.442695, %v3683_v41 }
0x277f   : > { %v3693_v16 = vpop.permute.xlu0 %3692 }
0x2780   : > { %4950 = vpow2.f32 %v3684_v18  ;;  %v3698_v45 = vsel %vm863_vm4, %v3693_v16, 0 }
0x2781   : > { %4745 = vmatpush3.bf16.msra.mxu1 %v3698_v45 }
0x2782   : > { %4756 = vmatprep.subr.bf16.mxu1 %v5107_v3 }
0x278d   : > { %v4951_v25 = vpop.eup %4950 }
0x278e   : > { %v3686_v2 = vsel %vm798_vm3, %v4951_v25, 0.0 }
0x278f   : > { %3687 = vadd.xlane.f32.xlu1 %v3686_v2 }
0x2793   : > { %3097 = vadd.xlane.f32.xlu1 %v3096_v32 }
0x27a9   : > { %v3622_v61 = vpop.f32.mrf.mxu1 }
0x27aa   : > { %v3628_v62 = vadd.f32 %v3622_v61, %v5879_v10 }
0x27ab   : > { %v4736_v63 = vpop.f32.mrf.mxu1 }
0x27ad   : > { %v3625_v33 = vpop.f32.mrf.mxu1 }
0x27af   : > { %v4737_v19 = vpop.f32.mrf.mxu1 }
0x2818   : > { %v3688_v14 = vpop.xlane.xlu1 %3687 }
0x2819   : > { %4952 = vrcp.f32 %v3688_v14 }
0x281c   : > { %v3098_v9 = vpop.xlane.xlu1 %3097 }
0x281d   : > { %v3099_v10 = vmul.f32 0.03125, %v3098_v9 }
0x281f   : > { %v3100_v7 = vadd.f32 1e-06, %v3099_v10 }
0x2821   : > { %4954 = vrsqrt.f32 %v3100_v7 }
0x2826   : > { %v4953_v11 = vpop.eup %4952 }
0x2827   : > { %v3690_v0 = vmul.f32 %v4953_v11, %v4951_v25  ;;  %v4861_v25 = vld [vmem:[%s6017_s12 + $0x20] sm:$0xff]  }
0x2829   : > { %v3691_v1 = vpack.c.bf16 %v3690_v0, %v3690_v0 }
0x282b   : > { %4747 = vmatmul.mubr.msk.bf16.vlgmr.msra.gmra.mxu1 %vm798_vm3, %v3691_v1 }
0x282c   : > { %4760 = vmatprep.mubr.msk.bf16.mxu1 %vm5108_vm1, %v5107_v3  ;;  %4757 = vmatpush3.bf16.msra.mxu1 %v4856_v49 }
0x282d   : > { %4758 = vmatprep.subr.bf16.mxu1 %v5107_v3 }
0x282e   : > { %v4955_v12 = vpop.eup %4954 }
0x282f   : > { %v3102_v22 = vmul.f32 %v4955_v12, %v3094_v58  ;;  %v4860_v58 = vld [vmem:[%s6017_s12 + $0x28] sm:$0xff]  }
0x2830   : > { %4759 = vmatpush3.bf16.msra.mxu1 %v4857_v50 }
0x2831   : > { %v5927_v27 = vmul.f32 %v4237_v20, %v3102_v22 }
0x2833   : > { %v3796_v40 = vmul.f32 %v5927_v27, %v5927_v27 }
0x2835   : > { %v3798_v37 = vsel %vm557_vm2, %v3796_v40, 0.0 }
0x28eb   : > { %v3734_v5 = vpop.f32.mrf.mxu1 }
0x28ec   : > { %v3740_v6 = vpack.c.bf16 %v3734_v5, %v3734_v5 }
0x28ed   : > { %v4748_v8 = vpop.f32.mrf.mxu1 }
0x28ee   : > { %4753 = vmatmul.mubr.msk.bf16.vlgmr.msra.gmra.mxu0 %vm798_vm3, %v3740_v6 }
0x28ef   : > { %v3737_v30 = vpop.f32.mrf.mxu1  ;;  %4772 = vmatprep.mubr.msk.bf16.mxu0 %vm5108_vm1, %v5107_v3  ;;  %4765 = vmatpush3.bf16.msra.mxu0 %v4858_v4 }
0x28f0   : > { %4766 = vmatprep.subr.bf16.mxu0 %v5107_v3 }
0x28f1   : > { %v4749_v38 = vpop.f32.mrf.mxu1 }
0x29ae   : > { %v3778_v21 = vpop.f32.mrf.mxu0 }
0x29af   : > { %v3784_v17 = vadd.f32 %v3778_v21, %v3628_v62 }
0x29b0   : > { %v4754_v28 = vpop.f32.mrf.mxu0 }
0x29b1   : > { %v3785_v15 = vadd.f32 %v3784_v17, %v5769_v13 }
0x29b2   : > { %v3781_v31 = vpop.f32.mrf.mxu0 }
0x29b3   : > { %v3786_v34 = vadd.f32 %v4236_v57, %v3785_v15  ;;  %v4859_v57 = vld [vmem:[%s6017_s12 + $0x30] sm:$0xff]  }
0x29b4   : > { %v4755_v35 = vpop.f32.mrf.mxu0  ;;  %4767 = vmatpush3.bf16.msra.mxu0 %v4859_v57 }
0x29b5   : > { %v3787_v36 = vmul.f32 %v3786_v34, %v3786_v34  ;;  %4768 = vmatprep.subr.bf16.mxu0 %v5107_v3  ;;  %v556_v35 = vld [vmem:[#allocation2 + $0x8] sm:$0xff] }
0x29b6   : > { %559 = vst.msk [vmem:[%s5283_s17 + $0x8] sm:$0xff] %vm557_vm2, %v556_v35 }
0x29b7   : > { %v3788_v39 = vsel %vm557_vm2, %v3787_v36, 0.0 }
0x29b8   : > { %3789 = vadd.xlane.f32.xlu1 %v3788_v39  ;;  %4769 = vmatpush3.bf16.msra.mxu0 %v4860_v58 }
0x29b9   : > { %4770 = vmatprep.subr.bf16.mxu0 %v5107_v3 }
0x29bc   : > { %3799 = vadd.xlane.f32.xlu1 %v3798_v37  ;;  %4771 = vmatpush3.bf16.msra.mxu0 %v4861_v25 }
0x2a41   : > { %v3790_v52 = vpop.xlane.xlu1 %3789 }
0x2a42   : > { %v3791_v42 = vmul.f32 0.03125, %v3790_v52 }
0x2a44   : > { %v3792_v43 = vadd.f32 1e-06, %v3791_v42 }
0x2a45   : > { %v3800_v51 = vpop.xlane.xlu1 %3799 }
0x2a46   : > { %4956 = vrsqrt.f32 %v3792_v43  ;;  %v3804_v23 = vmul.f32 0.03125, %v3800_v51  ;;  %v4262_v43 = vld [vmem:[%s6018_s13 + $0x1] ss:$0 sm:$0xff] }
0x2a48   : > { %v3806_v59 = vadd.f32 1e-06, %v3804_v23 }
0x2a4a   : > { %4958 = vrsqrt.f32 %v3806_v59 }
0x2a53   : > { %v4957_v13 = vpop.eup %4956 }
0x2a54   : > { %v3794_v44 = vmul.f32 %v4957_v13, %v3786_v34  ;;  %v555_v34 = vld [vmem:[#allocation2] sm:$0xff] }
0x2a55   : > { %558 = vst.msk [vmem:[%s5283_s17] sm:$0xff] %vm557_vm2, %v555_v34 }
0x2a56   : > { %v5933_v46 = vmul.f32 %v4237_v20, %v3794_v44 }
0x2a57   : > { %v4959_v60 = vpop.eup %4958 }
0x2a58   : > { %v3797_v47 = vmul.f32 %v5933_v46, %v5933_v46  ;;  %v3810_v54 = vmul.f32 %v4959_v60, %v5927_v27 }
0x2a5a   : > { %v3801_v48 = vsel %vm557_vm2, %v3797_v47, 0.0  ;;  %v3818_v18 = vmul.f32 %v4251_v56, %v3810_v54 }
0x2a5b   : > { %3802 = vadd.xlane.f32.xlu1 %v3801_v48 }
0x2ae4   : > { %v3803_v24 = vpop.xlane.xlu1 %3802 }
0x2ae5   : > { %v3805_v29 = vmul.f32 0.03125, %v3803_v24 }
0x2ae7   : > { %v3807_v53 = vadd.f32 1e-06, %v3805_v29 }
0x2ae9   : > { %4960 = vrsqrt.f32 %v3807_v53 }
0x2af6   : > { %v4961_v55 = vpop.eup %4960 }
0x2af7   : > { %v3811_v41 = vmul.f32 %v4961_v55, %v5933_v46 }
0x2af9   : > { %v3819_v16 = vmul.f32 %v4251_v56, %v3811_v41 }
0x2afb   : > { %v3820_v45 = vpack.c.bf16 %v3819_v16, %v3818_v18 }
0x2afd   : > { %4761 = vmatmul.mubr.msk.bf16.vlgmr.msra.gmra.mxu1 %vm557_vm2, %v3820_v45 }
0x2bbd   : > { %v3870_v2 = vpop.f32.mrf.mxu1 }
0x2bbe   : > { %3893 = vrot.lane.b32.xlu0 %v3870_v2, %s6049_s25  ;;  %v4255_v62 = vmul.f32 -1.442695, %v3870_v2 }
0x2bbf   : > { %v4762_v26 = vpop.f32.mrf.mxu1 }
0x2bc0   : > { %4962 = vpow2.f32 %v4255_v62 }
0x2bc1   : > { %v3873_v32 = vpop.f32.mrf.mxu1 }
0x2bc2   : > { %3895 = vrot.lane.b32.xlu1 %v3873_v32, %s6049_s25  ;;  %v4256_v63 = vmul.f32 -1.442695, %v3873_v32 }
0x2bc3   : > { %v4763_v61 = vpop.f32.mrf.mxu1 }
0x2bc4   : > { %4964 = vpow2.f32 %v4256_v63 }
0x2bcd   : > { %v4963_v33 = vpop.eup %4962 }
0x2bce   : > { %v3883_v3 = vadd.f32 1.0, %v4963_v33 }
0x2bd0   : > { %4966 = vrcp.f32 %v3883_v3 }
0x2bd1   : > { %v4965_v19 = vpop.eup %4964 }
0x2bd2   : > { %v3884_v14 = vadd.f32 1.0, %v4965_v19 }
0x2bd4   : > { %4968 = vrcp.f32 %v3884_v14 }
0x2bdd   : > { %v4967_v11 = vpop.eup %4966 }
0x2bde   : > { %v3889_v5 = vmul.f32 %v4967_v11, %v3870_v2 }
0x2be1   : > { %v4969_v0 = vpop.eup %4968 }
0x2be2   : > { %v3890_v6 = vmul.f32 %v4969_v0, %v3873_v32 }
0x2c30   : > { %v3894_v1 = vpop.permute.xlu0 %3893 }
0x2c31   : > { %v3899_v30 = vmul.f32 %v3894_v1, %v3889_v5 }
0x2c34   : > { %v3896_v8 = vpop.permute.xlu1 %3895 }
0x2c35   : > { %v3900_v38 = vmul.f32 %v3896_v8, %v3890_v6 }
0x2c37   : > { %v3901_v9 = vpack.c.bf16 %v3900_v38, %v3899_v30 }
0x2c39   : > { %4773 = vmatmul.mubr.msk.bf16.vlgmr.msra.gmra.mxu0 %vm2269_vm5, %v3901_v9 }
0x2cf9   : > { %v3963_v10 = vpop.f32.mrf.mxu0 }
0x2cfa   : > { %v3970_v7 = vadd.f32 %v3963_v10, %v5927_v27 }
0x2cfb   : > { %v4774_v12 = vpop.f32.mrf.mxu0 }
0x2cfc   : > { %v3972_v21 = vmul.f32 %v3970_v7, %v3970_v7 }
0x2cfd   : > { %v3966_v17 = vpop.f32.mrf.mxu0 }
0x2cfe   : > { %v3971_v22 = vadd.f32 %v3966_v17, %v5933_v46  ;;  %v3974_v28 = vsel %vm557_vm2, %v3972_v21, 0.0 }
0x2cff   : > { %3975 = vadd.xlane.f32.xlu0 %v3974_v28  ;;  %v4775_v20 = vpop.f32.mrf.mxu0 }
0x2d00   : > { %v3973_v15 = vmul.f32 %v3971_v22, %v3971_v22 }
0x2d02   : > { %v3977_v31 = vsel %vm557_vm2, %v3973_v15, 0.0 }
0x2d03   : > { %3978 = vadd.xlane.f32.xlu1 %v3977_v31 }
0x2d88   : > { %v3976_v27 = vpop.xlane.xlu0 %3975 }
0x2d89   : > { %v3980_v36 = vmul.f32 0.03125, %v3976_v27 }
0x2d8b   : > { %v3982_v39 = vadd.f32 1e-06, %v3980_v36 }
0x2d8c   : > { %v3979_v40 = vpop.xlane.xlu1 %3978 }
0x2d8d   : > { %4970 = vrsqrt.f32 %v3982_v39  ;;  %v3981_v37 = vmul.f32 0.03125, %v3979_v40 }
0x2d8f   : > { %v3983_v52 = vadd.f32 1e-06, %v3981_v37 }
0x2d91   : > { %4972 = vrsqrt.f32 %v3983_v52 }
0x2d9a   : > { %v4971_v42 = vpop.eup %4970 }
0x2d9b   : > { %v3986_v13 = vmul.f32 %v4971_v42, %v3970_v7 }
0x2d9d   : > { %v3994_v44 = vmul.f32 %v4262_v43, %v3986_v13 }
0x2d9e   : > { %v4973_v46 = vpop.eup %4972 }
0x2d9f   : > { %3996 = vst.msk [vmem:[#allocation2] sm:$0xff] %vm557_vm2, %v3994_v44  ;;  %v3987_v47 = vmul.f32 %v4973_v46, %v3971_v22  ;;  %4001 = sbr.rel (%p4263_p2) target bundleno = 11852 (0x2e4c), region = 100 }
0x2da1   : > { %v3995_v48 = vmul.f32 %v4262_v43, %v3987_v47 }
0x2da3   : > { %3997 = vst.msk [vmem:[#allocation2 + $0x8] sm:$0xff] %vm557_vm2, %v3995_v48 }
0x2da4   : > { %v4003_v49 = vmul.f32 %v3994_v44, %v3994_v44  ;;  %v4004_v50 = vmul.f32 %v3995_v48, %v3995_v48  ;;  %v4264_v56 = vld [vmem:[%s6019_s14] ss:$0 sm:$0xff] }
0x2da6   : > { %v4005_v51 = vsel %vm557_vm2, %v4003_v49, 0.0  ;;  %v4008_v23 = vsel %vm557_vm2, %v4004_v50, 0.0 }
0x2da7   : > { %4006 = vadd.xlane.f32.xlu0 %v4005_v51 }
0x2dab   : > { %4009 = vadd.xlane.f32.xlu0 %v4008_v23 }
0x2e30   : > { %v4007_v59 = vpop.xlane.xlu0 %4006 }
0x2e31   : > { %v4011_v24 = vmul.f32 0.03125, %v4007_v59 }
0x2e33   : > { %v4013_v29 = vadd.f32 1e-06, %v4011_v24 }
0x2e34   : > { %v4010_v53 = vpop.xlane.xlu0 %4009 }
0x2e35   : > { %4974 = vrsqrt.f32 %v4013_v29  ;;  %v4012_v60 = vmul.f32 0.03125, %v4010_v53 }
0x2e37   : > { %v4014_v54 = vadd.f32 1e-06, %v4012_v60 }
0x2e39   : > { %4976 = vrsqrt.f32 %v4014_v54 }
0x2e42   : > { %v4975_v55 = vpop.eup %4974 }
0x2e43   : > { %v4017_v41 = vmul.f32 %v4975_v55, %v3994_v44 }
0x2e45   : > { %v4025_v18 = vmul.f32 %v4264_v56, %v4017_v41 }
0x2e46   : > { %v4977_v16 = vpop.eup %4976 }
0x2e47   : > { %4027 = vst.msk [vmem:[#allocation9] sm:$0xff] %vm557_vm2, %v4025_v18  ;;  %v4018_v45 = vmul.f32 %v4977_v16, %v3995_v48 }
0x2e49   : > { %v4026_v4 = vmul.f32 %v4264_v56, %v4018_v45 }
0x2e4b   : > { %4028 = vst.msk [vmem:[#allocation9 + $0x8] sm:$0xff] %vm557_vm2, %v4026_v4 }
0x2e4c PF: > { %p4808_p3 = scmp.eq.s32.totalorder %s5214_s24, 2  ;;  %s5120_s23 = smov [#allocation9]  }
0x2e4d   : > { %s4043_s19 = sshll.u32 %s5120_s23, 4  ;;  %s4044_s19 = int_to_ptr.vmem [resolvable:$true] %s4043_s19 }
0x2e4e   : > { %s5056_s18 = scalar_lea.vmem %s4044_s19, 256  ;;  %p5063_p12 = scmp.lt.s32.totalorder %s4044_s19, %s4044_s19 }
0x2e4f   : > { %p5057_p4 = scmp.ne.s32.totalorder %s4044_s19, %s5056_s18  ;;  %p5064_p13 = scmp.lt.s32.totalorder %s5056_s18, %s5056_s18 }
0x2e51   : > { %p5058_p6 = pnand %p5057_p4, %p4808_p3  ;;  %p5065_p0 = por %p5064_p13, %p5063_p12 }
0x2e53   : > { %p5059_p11 = pneg %p5058_p6 }
0x2e55   : > { %p5066_p1 = pnand %p5065_p0, %p5059_p11 }
0x2e57   : > { %5069 = shalt.err (!%p5066_p1)
}
0x2e58   : > { %s5121_s26 = smov 128   ;;  %s5122_s27 = smov 8  }
0x2e59   : > { %4789 = dma.vmem_to_hbm [thread:$0]  (%p4808_p3), %s4044_s19, 256, %s6021_s16, [#allocation5], %s5121_s26, %s5121_s26, %s5122_s27  }
0x2e5a   : > { %5093 = dma.done.wait (%p4808_p3), [#allocation5], 256  }
0x2e5b   : > { %5095 = vsyncadd (%p4808_p3), [#allocation5], 4294967040 }
0x2e5c PF: > { %s30_s21 = sadd.s32 1, %s5098_s21  }
0x2e5d   : > { %p27_p5 = scmp.ge.s32.totalorder %s30_s21, 5  }
0x2e5f   :  { %29 = sbr.rel (!%p27_p5) target bundleno = 5 (0x5), region = 147 }
0x2e64   :  { %4067 = vsyncpa [#allocation4], 1 }
0x2e65   :  { %4069 = vsyncpa [#allocation4 + $0x1], 1 }
0x2e66   :  { %4070 = vsyncpa [#allocation7], 1 }
0x2e67   :  { %4071 = vsyncpa [#allocation5], 1 }
0x2e68   :  { %4073 = vsyncpa [#allocation5 + $0x1], 1 }

</bundles_post_ra>
